<compile_context>
chip_gen: v7x
topology: tpu7x:2x2x1
jax: 0.10.0
libtpu: 0.0.40
codegen_flags: <defaults>
</compile_context>

<pallas_src>
import functools

import jax
import jax.numpy as jnp
from jax import lax
from jax.experimental import pallas as pl
from jax.experimental.pallas import tpu as pltpu

_WL = 8      # left/right column halo -> interior stores land sublane-aligned
_CPAD = 128  # lane-dense width used for the conv2 MXU matmul (NOT for the output)


def _flow_head_kernel(x_ref, w1_ref, b1_ref, w2_ref, b2_ref, o_ref,
                      xpad_ref, hpad_ref, hacc_ref, oacc_ref,
                      *, TH, W, Cin, Ch, n_out, n_t):
    """One (batch, row-tile) grid step of conv2(relu(conv1(x))).

    x_ref   : (1, H, W, Cin) f32     full image for this batch (VMEM resident)
    w1_ref  : (9, Cin, Ch)   bf16    conv1 weight, tap-major (dy*3+dx)
    b1_ref  : (1, Ch)        f32
    w2_ref  : (9, Ch, 128)   bf16    conv2 weight, Cout zero-padded to 128 lanes
    b2_ref  : (1, 128)       f32     conv2 bias, zero-padded
    o_ref   : (1, TH, W, n_out)      true-width output row tile (no padding)
    xpad_ref: (TH+4, W+16, Cin) bf16 zero-padded input window (per tile)
    hpad_ref: (TH+2, W+16, Ch)  bf16 zero-padded hidden tile
    hacc_ref: ((TH+2)*W, Ch) f32     conv1 accumulator
    oacc_ref: (TH*W, 128)    f32     conv2 accumulator
    """
    t = pl.program_id(1)
    rs = pl.multiple_of(t * TH, TH)          # first output row of this tile
    bf = xpad_ref.dtype
    WL = _WL
    WP = W + 2 * WL

    # ---------------- stage the zero-padded bf16 input window (per tile) ----
    # Column halo strips are zeroed every step (cheap) so the row-tile axis is
    # fully independent -> both grid axes can be marked "parallel".
    xpad_ref[:, 0:WL, :] = jnp.zeros((TH + 4, WL, Cin), bf)
    xpad_ref[:, WL + W:WP, :] = jnp.zeros((TH + 4, WL, Cin), bf)
    # Core rows are always inside the image; the interior store sits at column
    # offset 8 (sublane-aligned).
    xpad_ref[2:TH + 2, WL:WL + W, :] = x_ref[0, pl.ds(rs, TH), :, :].astype(bf)

    # Two-row top / bottom halos: rows from the neighbouring tiles, or conv1's
    # SAME zero padding at the image boundary.
    @pl.when(t == 0)
    def _():
        xpad_ref[0:2, WL:WL + W, :] = jnp.zeros((2, W, Cin), bf)

    @pl.when(t > 0)
    def _():
        xpad_ref[0:2, WL:WL + W, :] = x_ref[0, pl.ds(rs - 2, 2), :, :].astype(bf)

    @pl.when(t == n_t - 1)
    def _():
        xpad_ref[TH + 2:TH + 4, WL:WL + W, :] = jnp.zeros((2, W, Cin), bf)

    @pl.when(t < n_t - 1)
    def _():
        xpad_ref[TH + 2:TH + 4, WL:WL + W, :] = (
            x_ref[0, pl.ds(rs + TH, 2), :, :].astype(bf))

    # ---------------- conv1 + bias + ReLU: 9 shifted accumulating matmuls ---
    # Per tap: load the shifted (TH+2, W, Cin) window straight off the padded
    # ref (bounded vreg pressure), one MXU matmul, accumulate in f32 VMEM.
    M1 = (TH + 2) * W
    k = 0
    for dy in range(3):
        for dx in range(3):
            xt = xpad_ref[dy:dy + TH + 2, WL - 1 + dx:WL - 1 + dx + W, :]
            part = jnp.dot(xt.reshape(M1, Cin), w1_ref[k],
                           preferred_element_type=jnp.float32)
            if k == 0:
                hacc_ref[...] = part
            else:
                hacc_ref[...] += part
            k += 1
    h = jnp.maximum(hacc_ref[...] + b1_ref[...], 0.0).astype(bf)

    # ---------------- stage the zero-padded hidden tile ----------------------
    hpad_ref[:, 0:WL, :] = jnp.zeros((TH + 2, WL, Ch), bf)
    hpad_ref[:, WL + W:WP, :] = jnp.zeros((TH + 2, WL, Ch), bf)
    hpad_ref[:, WL:WL + W, :] = h.reshape(TH + 2, W, Ch)

    # Hidden rows outside the image are conv2's zero padding, not conv1 output.
    @pl.when(t == 0)
    def _():
        hpad_ref[0:1, :, :] = jnp.zeros((1, WP, Ch), bf)

    @pl.when(t == n_t - 1)
    def _():
        hpad_ref[TH + 1:TH + 2, :, :] = jnp.zeros((1, WP, Ch), bf)

    # ---------------- conv2: 9 shifted accumulating matmuls ------------------
    M2 = TH * W
    k = 0
    for dy in range(3):
        for dx in range(3):
            ht = hpad_ref[dy:dy + TH, WL - 1 + dx:WL - 1 + dx + W, :]
            part = jnp.dot(ht.reshape(M2, Ch), w2_ref[k],
                           preferred_element_type=jnp.float32)
            if k == 0:
                oacc_ref[...] = part
            else:
                oacc_ref[...] += part
            k += 1

    out = oacc_ref[...] + b2_ref[...]
    # Only the n_out (=2) real channels are written back to HBM.
    o_ref[0] = out[:, :n_out].reshape(TH, W, n_out).astype(o_ref.dtype)


def _vmem_bytes(TH, H, W, Cin, Ch):
    """Rough per-core VMEM footprint for a candidate row tile."""
    WP = W + 2 * _WL
    return (2 * H * W * Cin * 4                        # f32 input block (x2 buffers)
            + 2 * TH * W * 2 * 4                       # output block (x2 buffers)
            + 2 * (9 * Cin * Ch + 9 * Ch * _CPAD) * 2  # bf16 weights (x2 buffers)
            + (TH + 4) * WP * Cin * 2                  # xpad
            + (TH + 2) * WP * Ch * 2                   # hpad
            + (TH + 2) * W * Ch * 4                    # hacc
            + TH * W * _CPAD * 4)                      # oacc


def _pick_row_tile(H, W, Cin, Ch, budget_bytes=36 * 1024 * 1024):
    """Largest row tile dividing H whose footprint fits the VMEM budget."""
    cands = sorted({th for th in (128, 64, 32, 16, 8, 4) if H % th == 0} | {H},
                   reverse=True)
    for th in cands:
        if _vmem_bytes(th, H, W, Cin, Ch) <= budget_bytes:
            return th
    return cands[-1]


def flow_head(x, w1, b1, w2, b2, *, row_tile=None):
    """FlowHead.forward: conv2(relu(conv1(x))).

    x: (B, H, W, Cin) NHWC; w1: (3,3,Cin,Ch); w2: (3,3,Ch,n_out); b*: (C,).
    Returns (B, H, W, n_out) in x.dtype.
    """
    B, H, W, Cin = x.shape
    Ch = w1.shape[-1]
    n_out = w2.shape[-1]

    if row_tile is None:
        row_tile = _pick_row_tile(H, W, Cin, Ch)
    TH = row_tile
    assert H % TH == 0, (H, TH)
    n_t = H // TH

    # Parameter-side preprocessing only (tiny tensors); the activation x is
    # passed through untouched.
    w1m = w1.reshape(9, Cin, Ch).astype(jnp.bfloat16)
    w2m = jnp.pad(w2, ((0, 0), (0, 0), (0, 0), (0, _CPAD - n_out)))
    w2m = w2m.reshape(9, Ch, _CPAD).astype(jnp.bfloat16)
    b1m = b1.reshape(1, Ch).astype(jnp.float32)
    b2m = jnp.pad(b2.reshape(1, n_out),
                  ((0, 0), (0, _CPAD - n_out))).astype(jnp.float32)

    kernel = functools.partial(_flow_head_kernel, TH=TH, W=W, Cin=Cin, Ch=Ch,
                               n_out=n_out, n_t=n_t)
    WP = W + 2 * _WL

    return pl.pallas_call(
        kernel,
        out_shape=jax.ShapeDtypeStruct((B, H, W, n_out), x.dtype),
        grid=(B, n_t),
        in_specs=[
            # full image per batch, resident across the row-tile axis
            pl.BlockSpec((1, H, W, Cin), lambda b, t: (b, 0, 0, 0)),
            pl.BlockSpec((9, Cin, Ch), lambda b, t: (0, 0, 0)),
            pl.BlockSpec((1, Ch), lambda b, t: (0, 0)),
            pl.BlockSpec((9, Ch, _CPAD), lambda b, t: (0, 0, 0)),
            pl.BlockSpec((1, _CPAD), lambda b, t: (0, 0)),
        ],
        # True-width output tile: only n_out channels ever hit HBM.
        out_specs=pl.BlockSpec((1, TH, W, n_out), lambda b, t: (b, t, 0, 0)),
        scratch_shapes=[
            pltpu.VMEM((TH + 4, WP, Cin), jnp.bfloat16),   # padded input window
            pltpu.VMEM((TH + 2, WP, Ch), jnp.bfloat16),    # padded hidden tile
            pltpu.VMEM(((TH + 2) * W, Ch), jnp.float32),   # conv1 accumulator
            pltpu.VMEM((TH * W, _CPAD), jnp.float32),      # conv2 accumulator
        ],
        compiler_params=pltpu.CompilerParams(
            # per-tile work is self-contained -> both axes parallel (megacore)
            dimension_semantics=("parallel", "parallel"),
            vmem_limit_bytes=48 * 1024 * 1024),
    )(x, w1m, b1m, w2m, b2m)


# ----------------------------- reference ------------------------------------
def _ref_conv(x, w, b):
    y = lax.conv_general_dilated(
        x, w, window_strides=(1, 1), padding="SAME",
        dimension_numbers=("NHWC", "HWIO", "NHWC"),
        precision=lax.Precision.HIGHEST)
    return y + b.reshape(1, 1, 1, -1)


def _ref_flow_head(x, w1, b1, w2, b2):
    return _ref_conv(jnp.maximum(_ref_conv(x, w1, b1), 0.0), w2, b2)


if __name__ == "__main__":
    # Small shapes consistent with the module (input_dim -> hidden_dim -> 2).
    B, H, W = 2, 16, 16
    input_dim, hidden_dim = 16, 32

    key = jax.random.PRNGKey(0)
    kx, k1, k2, kb1, kb2 = jax.random.split(key, 5)

    x = jax.random.normal(kx, (B, H, W, input_dim), jnp.float32)
    w1 = jax.random.normal(k1, (3, 3, input_dim, hidden_dim), jnp.float32) * 0.05
    b1 = jax.random.normal(kb1, (hidden_dim,), jnp.float32) * 0.05
    w2 = jax.random.normal(k2, (3, 3, hidden_dim, 2), jnp.float32) * 0.05
    b2 = jax.random.normal(kb2, (2,), jnp.float32) * 0.05

    # row_tile=8 -> 2 row tiles per image, exercising the tiled/halo path.
    out = jax.block_until_ready(flow_head(x, w1, b1, w2, b2, row_tile=8))
    assert out.shape == (B, H, W, 2), out.shape

    # Tight check against a reference using the same bf16-rounded matmul
    # operands and bf16 hidden activation (f32 accumulation), mirroring the
    # kernel's MXU path.
    q = lambda a: a.astype(jnp.bfloat16).astype(jnp.float32)
    h_ref = jnp.maximum(_ref_conv(q(x), q(w1), b1), 0.0)
    ref_q = _ref_conv(q(h_ref), q(w2), b2)
    assert jnp.allclose(out, ref_q, atol=1e-2, rtol=1e-2), \
        float(jnp.max(jnp.abs(out - ref_q)))

    # Loose check against the full-f32 reference.
    ref = _ref_flow_head(x, w1, b1, w2, b2)
    assert jnp.allclose(out, ref, atol=5e-2, rtol=5e-2), \
        float(jnp.max(jnp.abs(out - ref)))

    print("KERNEL_OK")
</pallas_src>

<mosaic_0001>
module attributes {stable_mosaic.version = 11 : i64} {
  func.func @_flow_head_kernel(%arg0: i32, %arg1: i32, %arg2: memref<1x16x16x16xf32, #tpu.memory_space<vmem>>, %arg3: memref<9x16x32xbf16, #tpu.memory_space<vmem>>, %arg4: memref<1x32xf32, #tpu.memory_space<vmem>>, %arg5: memref<9x32x128xbf16, #tpu.memory_space<vmem>>, %arg6: memref<1x128xf32, #tpu.memory_space<vmem>>, %arg7: memref<1x8x16x2xf32, #tpu.memory_space<vmem>>, %arg8: memref<12x32x16xbf16, #tpu.memory_space<vmem>>, %arg9: memref<10x32x32xbf16, #tpu.memory_space<vmem>>, %arg10: memref<160x32xf32, #tpu.memory_space<vmem>>, %arg11: memref<128x128xf32, #tpu.memory_space<vmem>>) attributes {dimension_semantics = [#tpu.dimension_semantics<parallel>, #tpu.dimension_semantics<parallel>], iteration_bounds = array<i64: 2, 2>, scalar_prefetch = 0 : i64, scratch_operands = 4 : i64, tpu.core_type = #tpu.core_type<tc>, window_params = [{transform_indices = @transform_0, window_bounds = array<i64: 1, 16, 16, 16>}, {pipeline_mode = #tpu.pipeline_mode<synchronous>, transform_indices = @transform_1, window_bounds = array<i64: 9, 16, 32>}, {pipeline_mode = #tpu.pipeline_mode<synchronous>, transform_indices = @transform_2, window_bounds = array<i64: 1, 32>}, {pipeline_mode = #tpu.pipeline_mode<synchronous>, transform_indices = @transform_3, window_bounds = array<i64: 9, 32, 128>}, {pipeline_mode = #tpu.pipeline_mode<synchronous>, transform_indices = @transform_4, window_bounds = array<i64: 1, 128>}, {transform_indices = @transform_5, window_bounds = array<i64: 1, 8, 16, 2>}]} {
    %c8_i32 = arith.constant 8 : i32
    %0 = arith.muli %arg1, %c8_i32 : i32
    %1 = tpu.assume_multiple %0, 8 : i32
    %cst = arith.constant 0.000000e+00 : bf16
    %2 = vector.broadcast %cst : bf16 to vector<12x8x16xbf16>
    %c0 = arith.constant 0 : index
    %c0_0 = arith.constant 0 : index
    %c0_1 = arith.constant 0 : index
    %3 = vector.load %arg8[%c0, %c0_0, %c0_1] : memref<12x32x16xbf16, #tpu.memory_space<vmem>>, vector<12x8x16xbf16>
    tpu.vector_store %arg8[%c0, %c0_0, %c0_1], %2 {strides = array<i32>} : memref<12x32x16xbf16, #tpu.memory_space<vmem>>, vector<12x8x16xbf16>,
    %cst_2 = arith.constant 0.000000e+00 : bf16
    %4 = vector.broadcast %cst_2 : bf16 to vector<12x8x16xbf16>
    %c0_3 = arith.constant 0 : index
    %c24 = arith.constant 24 : index
    %c0_4 = arith.constant 0 : index
    %5 = vector.load %arg8[%c0_3, %c24, %c0_4] : memref<12x32x16xbf16, #tpu.memory_space<vmem>>, vector<12x8x16xbf16>
    tpu.vector_store %arg8[%c0_3, %c24, %c0_4], %4 {strides = array<i32>} : memref<12x32x16xbf16, #tpu.memory_space<vmem>>, vector<12x8x16xbf16>,
    %c0_5 = arith.constant 0 : index
    %6 = arith.index_cast %1 : i32 to index
    %c0_6 = arith.constant 0 : index
    %c0_7 = arith.constant 0 : index
    %7 = vector.load %arg2[%c0_5, %6, %c0_6, %c0_7] : memref<1x16x16x16xf32, #tpu.memory_space<vmem>>, vector<1x8x16x16xf32>
    %8 = vector.shape_cast %7 : vector<1x8x16x16xf32> to vector<8x16x16xf32>
    %9 = arith.truncf %8 : vector<8x16x16xf32> to vector<8x16x16xbf16>
    %c2 = arith.constant 2 : index
    %c8 = arith.constant 8 : index
    %c0_8 = arith.constant 0 : index
    %10 = vector.load %arg8[%c2, %c8, %c0_8] : memref<12x32x16xbf16, #tpu.memory_space<vmem>>, vector<8x16x16xbf16>
    tpu.vector_store %arg8[%c2, %c8, %c0_8], %9 {strides = array<i32>} : memref<12x32x16xbf16, #tpu.memory_space<vmem>>, vector<8x16x16xbf16>,
    %c0_i32 = arith.constant 0 : i32
    %11 = arith.cmpi eq, %arg1, %c0_i32 : i32
    %12 = arith.extui %11 : i1 to i32
    %c0_i32_9 = arith.constant 0 : i32
    %13 = arith.cmpi ne, %12, %c0_i32_9 : i32
    scf.if %13 {
      %cst_230 = arith.constant 0.000000e+00 : bf16
      %191 = vector.broadcast %cst_230 : bf16 to vector<2x16x16xbf16>
      %c0_231 = arith.constant 0 : index
      %c8_232 = arith.constant 8 : index
      %c0_233 = arith.constant 0 : index
      %192 = vector.load %arg8[%c0_231, %c8_232, %c0_233] : memref<12x32x16xbf16, #tpu.memory_space<vmem>>, vector<2x16x16xbf16>
      tpu.vector_store %arg8[%c0_231, %c8_232, %c0_233], %191 {strides = array<i32>} : memref<12x32x16xbf16, #tpu.memory_space<vmem>>, vector<2x16x16xbf16>,
    } else {
    }
    %c0_i32_10 = arith.constant 0 : i32
    %14 = arith.cmpi sgt, %arg1, %c0_i32_10 : i32
    %15 = arith.extui %14 : i1 to i32
    %c0_i32_11 = arith.constant 0 : i32
    %16 = arith.cmpi ne, %15, %c0_i32_11 : i32
    scf.if %16 {
      %c2_i32 = arith.constant 2 : i32
      %191 = arith.subi %1, %c2_i32 : i32
      %c0_230 = arith.constant 0 : index
      %192 = arith.index_cast %191 : i32 to index
      %c0_231 = arith.constant 0 : index
      %c0_232 = arith.constant 0 : index
      %193 = vector.load %arg2[%c0_230, %192, %c0_231, %c0_232] : memref<1x16x16x16xf32, #tpu.memory_space<vmem>>, vector<1x2x16x16xf32>
      %194 = vector.shape_cast %193 : vector<1x2x16x16xf32> to vector<2x16x16xf32>
      %195 = arith.truncf %194 : vector<2x16x16xf32> to vector<2x16x16xbf16>
      %c0_233 = arith.constant 0 : index
      %c8_234 = arith.constant 8 : index
      %c0_235 = arith.constant 0 : index
      %196 = vector.load %arg8[%c0_233, %c8_234, %c0_235] : memref<12x32x16xbf16, #tpu.memory_space<vmem>>, vector<2x16x16xbf16>
      tpu.vector_store %arg8[%c0_233, %c8_234, %c0_235], %195 {strides = array<i32>} : memref<12x32x16xbf16, #tpu.memory_space<vmem>>, vector<2x16x16xbf16>,
    } else {
    }
    %c1_i32 = arith.constant 1 : i32
    %17 = arith.cmpi eq, %arg1, %c1_i32 : i32
    %18 = arith.extui %17 : i1 to i32
    %c0_i32_12 = arith.constant 0 : i32
    %19 = arith.cmpi ne, %18, %c0_i32_12 : i32
    scf.if %19 {
      %cst_230 = arith.constant 0.000000e+00 : bf16
      %191 = vector.broadcast %cst_230 : bf16 to vector<2x16x16xbf16>
      %c10 = arith.constant 10 : index
      %c8_231 = arith.constant 8 : index
      %c0_232 = arith.constant 0 : index
      %192 = vector.load %arg8[%c10, %c8_231, %c0_232] : memref<12x32x16xbf16, #tpu.memory_space<vmem>>, vector<2x16x16xbf16>
      tpu.vector_store %arg8[%c10, %c8_231, %c0_232], %191 {strides = array<i32>} : memref<12x32x16xbf16, #tpu.memory_space<vmem>>, vector<2x16x16xbf16>,
    } else {
    }
    %c1_i32_13 = arith.constant 1 : i32
    %20 = arith.cmpi slt, %arg1, %c1_i32_13 : i32
    %21 = arith.extui %20 : i1 to i32
    %c0_i32_14 = arith.constant 0 : i32
    %22 = arith.cmpi ne, %21, %c0_i32_14 : i32
    scf.if %22 {
      %c8_i32_230 = arith.constant 8 : i32
      %191 = arith.addi %1, %c8_i32_230 : i32
      %c0_231 = arith.constant 0 : index
      %192 = arith.index_cast %191 : i32 to index
      %c0_232 = arith.constant 0 : index
      %c0_233 = arith.constant 0 : index
      %193 = vector.load %arg2[%c0_231, %192, %c0_232, %c0_233] : memref<1x16x16x16xf32, #tpu.memory_space<vmem>>, vector<1x2x16x16xf32>
      %194 = vector.shape_cast %193 : vector<1x2x16x16xf32> to vector<2x16x16xf32>
      %195 = arith.truncf %194 : vector<2x16x16xf32> to vector<2x16x16xbf16>
      %c10 = arith.constant 10 : index
      %c8_234 = arith.constant 8 : index
      %c0_235 = arith.constant 0 : index
      %196 = vector.load %arg8[%c10, %c8_234, %c0_235] : memref<12x32x16xbf16, #tpu.memory_space<vmem>>, vector<2x16x16xbf16>
      tpu.vector_store %arg8[%c10, %c8_234, %c0_235], %195 {strides = array<i32>} : memref<12x32x16xbf16, #tpu.memory_space<vmem>>, vector<2x16x16xbf16>,
    } else {
    }
    %c0_15 = arith.constant 0 : index
    %c7 = arith.constant 7 : index
    %c0_16 = arith.constant 0 : index
    %23 = vector.load %arg8[%c0_15, %c7, %c0_16] : memref<12x32x16xbf16, #tpu.memory_space<vmem>>, vector<10x16x16xbf16>
    %24 = vector.shape_cast %23 : vector<10x16x16xbf16> to vector<160x16xbf16>
    %c0_17 = arith.constant 0 : index
    %c0_18 = arith.constant 0 : index
    %c0_19 = arith.constant 0 : index
    %25 = vector.load %arg3[%c0_17, %c0_18, %c0_19] : memref<9x16x32xbf16, #tpu.memory_space<vmem>>, vector<1x16x32xbf16>
    %26 = vector.shape_cast %25 : vector<1x16x32xbf16> to vector<16x32xbf16>
    %cst_20 = arith.constant dense<0.000000e+00> : vector<160x32xf32>
    %27 = tpu.matmul %24, %26, %cst_20 {dimension_numbers = #tpu.dot_dimension_numbers<[1], [0], [0], [1], [0, 0, 1, 1], [], []>} : vector<160x16xbf16>, vector<16x32xbf16>, vector<160x32xf32> -> vector<160x32xf32>
    %c0_21 = arith.constant 0 : index
    %c0_22 = arith.constant 0 : index
    %28 = vector.load %arg10[%c0_21, %c0_22] : memref<160x32xf32, #tpu.memory_space<vmem>>, vector<160x32xf32>
    tpu.vector_store %arg10[%c0_21, %c0_22], %27 {strides = array<i32>} : memref<160x32xf32, #tpu.memory_space<vmem>>, vector<160x32xf32>,
    %c0_23 = arith.constant 0 : index
    %c8_24 = arith.constant 8 : index
    %c0_25 = arith.constant 0 : index
    %29 = vector.load %arg8[%c0_23, %c8_24, %c0_25] : memref<12x32x16xbf16, #tpu.memory_space<vmem>>, vector<10x16x16xbf16>
    %30 = vector.shape_cast %29 : vector<10x16x16xbf16> to vector<160x16xbf16>
    %c1 = arith.constant 1 : index
    %c0_26 = arith.constant 0 : index
    %c0_27 = arith.constant 0 : index
    %31 = vector.load %arg3[%c1, %c0_26, %c0_27] : memref<9x16x32xbf16, #tpu.memory_space<vmem>>, vector<1x16x32xbf16>
    %32 = vector.shape_cast %31 : vector<1x16x32xbf16> to vector<16x32xbf16>
    %cst_28 = arith.constant dense<0.000000e+00> : vector<160x32xf32>
    %33 = tpu.matmul %30, %32, %cst_28 {dimension_numbers = #tpu.dot_dimension_numbers<[1], [0], [0], [1], [0, 0, 1, 1], [], []>} : vector<160x16xbf16>, vector<16x32xbf16>, vector<160x32xf32> -> vector<160x32xf32>
    %c0_29 = arith.constant 0 : index
    %c0_30 = arith.constant 0 : index
    %34 = vector.load %arg10[%c0_29, %c0_30] : memref<160x32xf32, #tpu.memory_space<vmem>>, vector<160x32xf32>
    %35 = arith.addf %34, %33 : vector<160x32xf32>
    %c0_31 = arith.constant 0 : index
    %c0_32 = arith.constant 0 : index
    %36 = vector.load %arg10[%c0_31, %c0_32] : memref<160x32xf32, #tpu.memory_space<vmem>>, vector<160x32xf32>
    tpu.vector_store %arg10[%c0_31, %c0_32], %35 {strides = array<i32>} : memref<160x32xf32, #tpu.memory_space<vmem>>, vector<160x32xf32>,
    %c0_33 = arith.constant 0 : index
    %c9 = arith.constant 9 : index
    %c0_34 = arith.constant 0 : index
    %37 = vector.load %arg8[%c0_33, %c9, %c0_34] : memref<12x32x16xbf16, #tpu.memory_space<vmem>>, vector<10x16x16xbf16>
    %38 = vector.shape_cast %37 : vector<10x16x16xbf16> to vector<160x16xbf16>
    %c2_35 = arith.constant 2 : index
    %c0_36 = arith.constant 0 : index
    %c0_37 = arith.constant 0 : index
    %39 = vector.load %arg3[%c2_35, %c0_36, %c0_37] : memref<9x16x32xbf16, #tpu.memory_space<vmem>>, vector<1x16x32xbf16>
    %40 = vector.shape_cast %39 : vector<1x16x32xbf16> to vector<16x32xbf16>
    %cst_38 = arith.constant dense<0.000000e+00> : vector<160x32xf32>
    %41 = tpu.matmul %38, %40, %cst_38 {dimension_numbers = #tpu.dot_dimension_numbers<[1], [0], [0], [1], [0, 0, 1, 1], [], []>} : vector<160x16xbf16>, vector<16x32xbf16>, vector<160x32xf32> -> vector<160x32xf32>
    %c0_39 = arith.constant 0 : index
    %c0_40 = arith.constant 0 : index
    %42 = vector.load %arg10[%c0_39, %c0_40] : memref<160x32xf32, #tpu.memory_space<vmem>>, vector<160x32xf32>
    %43 = arith.addf %42, %41 : vector<160x32xf32>
    %c0_41 = arith.constant 0 : index
    %c0_42 = arith.constant 0 : index
    %44 = vector.load %arg10[%c0_41, %c0_42] : memref<160x32xf32, #tpu.memory_space<vmem>>, vector<160x32xf32>
    tpu.vector_store %arg10[%c0_41, %c0_42], %43 {strides = array<i32>} : memref<160x32xf32, #tpu.memory_space<vmem>>, vector<160x32xf32>,
    %c1_43 = arith.constant 1 : index
    %c7_44 = arith.constant 7 : index
    %c0_45 = arith.constant 0 : index
    %45 = vector.load %arg8[%c1_43, %c7_44, %c0_45] : memref<12x32x16xbf16, #tpu.memory_space<vmem>>, vector<10x16x16xbf16>
    %46 = vector.shape_cast %45 : vector<10x16x16xbf16> to vector<160x16xbf16>
    %c3 = arith.constant 3 : index
    %c0_46 = arith.constant 0 : index
    %c0_47 = arith.constant 0 : index
    %47 = vector.load %arg3[%c3, %c0_46, %c0_47] : memref<9x16x32xbf16, #tpu.memory_space<vmem>>, vector<1x16x32xbf16>
    %48 = vector.shape_cast %47 : vector<1x16x32xbf16> to vector<16x32xbf16>
    %cst_48 = arith.constant dense<0.000000e+00> : vector<160x32xf32>
    %49 = tpu.matmul %46, %48, %cst_48 {dimension_numbers = #tpu.dot_dimension_numbers<[1], [0], [0], [1], [0, 0, 1, 1], [], []>} : vector<160x16xbf16>, vector<16x32xbf16>, vector<160x32xf32> -> vector<160x32xf32>
    %c0_49 = arith.constant 0 : index
    %c0_50 = arith.constant 0 : index
    %50 = vector.load %arg10[%c0_49, %c0_50] : memref<160x32xf32, #tpu.memory_space<vmem>>, vector<160x32xf32>
    %51 = arith.addf %50, %49 : vector<160x32xf32>
    %c0_51 = arith.constant 0 : index
    %c0_52 = arith.constant 0 : index
    %52 = vector.load %arg10[%c0_51, %c0_52] : memref<160x32xf32, #tpu.memory_space<vmem>>, vector<160x32xf32>
    tpu.vector_store %arg10[%c0_51, %c0_52], %51 {strides = array<i32>} : memref<160x32xf32, #tpu.memory_space<vmem>>, vector<160x32xf32>,
    %c1_53 = arith.constant 1 : index
    %c8_54 = arith.constant 8 : index
    %c0_55 = arith.constant 0 : index
    %53 = vector.load %arg8[%c1_53, %c8_54, %c0_55] : memref<12x32x16xbf16, #tpu.memory_space<vmem>>, vector<10x16x16xbf16>
    %54 = vector.shape_cast %53 : vector<10x16x16xbf16> to vector<160x16xbf16>
    %c4 = arith.constant 4 : index
    %c0_56 = arith.constant 0 : index
    %c0_57 = arith.constant 0 : index
    %55 = vector.load %arg3[%c4, %c0_56, %c0_57] : memref<9x16x32xbf16, #tpu.memory_space<vmem>>, vector<1x16x32xbf16>
    %56 = vector.shape_cast %55 : vector<1x16x32xbf16> to vector<16x32xbf16>
    %cst_58 = arith.constant dense<0.000000e+00> : vector<160x32xf32>
    %57 = tpu.matmul %54, %56, %cst_58 {dimension_numbers = #tpu.dot_dimension_numbers<[1], [0], [0], [1], [0, 0, 1, 1], [], []>} : vector<160x16xbf16>, vector<16x32xbf16>, vector<160x32xf32> -> vector<160x32xf32>
    %c0_59 = arith.constant 0 : index
    %c0_60 = arith.constant 0 : index
    %58 = vector.load %arg10[%c0_59, %c0_60] : memref<160x32xf32, #tpu.memory_space<vmem>>, vector<160x32xf32>
    %59 = arith.addf %58, %57 : vector<160x32xf32>
    %c0_61 = arith.constant 0 : index
    %c0_62 = arith.constant 0 : index
    %60 = vector.load %arg10[%c0_61, %c0_62] : memref<160x32xf32, #tpu.memory_space<vmem>>, vector<160x32xf32>
    tpu.vector_store %arg10[%c0_61, %c0_62], %59 {strides = array<i32>} : memref<160x32xf32, #tpu.memory_space<vmem>>, vector<160x32xf32>,
    %c1_63 = arith.constant 1 : index
    %c9_64 = arith.constant 9 : index
    %c0_65 = arith.constant 0 : index
    %61 = vector.load %arg8[%c1_63, %c9_64, %c0_65] : memref<12x32x16xbf16, #tpu.memory_space<vmem>>, vector<10x16x16xbf16>
    %62 = vector.shape_cast %61 : vector<10x16x16xbf16> to vector<160x16xbf16>
    %c5 = arith.constant 5 : index
    %c0_66 = arith.constant 0 : index
    %c0_67 = arith.constant 0 : index
    %63 = vector.load %arg3[%c5, %c0_66, %c0_67] : memref<9x16x32xbf16, #tpu.memory_space<vmem>>, vector<1x16x32xbf16>
    %64 = vector.shape_cast %63 : vector<1x16x32xbf16> to vector<16x32xbf16>
    %cst_68 = arith.constant dense<0.000000e+00> : vector<160x32xf32>
    %65 = tpu.matmul %62, %64, %cst_68 {dimension_numbers = #tpu.dot_dimension_numbers<[1], [0], [0], [1], [0, 0, 1, 1], [], []>} : vector<160x16xbf16>, vector<16x32xbf16>, vector<160x32xf32> -> vector<160x32xf32>
    %c0_69 = arith.constant 0 : index
    %c0_70 = arith.constant 0 : index
    %66 = vector.load %arg10[%c0_69, %c0_70] : memref<160x32xf32, #tpu.memory_space<vmem>>, vector<160x32xf32>
    %67 = arith.addf %66, %65 : vector<160x32xf32>
    %c0_71 = arith.constant 0 : index
    %c0_72 = arith.constant 0 : index
    %68 = vector.load %arg10[%c0_71, %c0_72] : memref<160x32xf32, #tpu.memory_space<vmem>>, vector<160x32xf32>
    tpu.vector_store %arg10[%c0_71, %c0_72], %67 {strides = array<i32>} : memref<160x32xf32, #tpu.memory_space<vmem>>, vector<160x32xf32>,
    %c2_73 = arith.constant 2 : index
    %c7_74 = arith.constant 7 : index
    %c0_75 = arith.constant 0 : index
    %69 = vector.load %arg8[%c2_73, %c7_74, %c0_75] : memref<12x32x16xbf16, #tpu.memory_space<vmem>>, vector<10x16x16xbf16>
    %70 = vector.shape_cast %69 : vector<10x16x16xbf16> to vector<160x16xbf16>
    %c6 = arith.constant 6 : index
    %c0_76 = arith.constant 0 : index
    %c0_77 = arith.constant 0 : index
    %71 = vector.load %arg3[%c6, %c0_76, %c0_77] : memref<9x16x32xbf16, #tpu.memory_space<vmem>>, vector<1x16x32xbf16>
    %72 = vector.shape_cast %71 : vector<1x16x32xbf16> to vector<16x32xbf16>
    %cst_78 = arith.constant dense<0.000000e+00> : vector<160x32xf32>
    %73 = tpu.matmul %70, %72, %cst_78 {dimension_numbers = #tpu.dot_dimension_numbers<[1], [0], [0], [1], [0, 0, 1, 1], [], []>} : vector<160x16xbf16>, vector<16x32xbf16>, vector<160x32xf32> -> vector<160x32xf32>
    %c0_79 = arith.constant 0 : index
    %c0_80 = arith.constant 0 : index
    %74 = vector.load %arg10[%c0_79, %c0_80] : memref<160x32xf32, #tpu.memory_space<vmem>>, vector<160x32xf32>
    %75 = arith.addf %74, %73 : vector<160x32xf32>
    %c0_81 = arith.constant 0 : index
    %c0_82 = arith.constant 0 : index
    %76 = vector.load %arg10[%c0_81, %c0_82] : memref<160x32xf32, #tpu.memory_space<vmem>>, vector<160x32xf32>
    tpu.vector_store %arg10[%c0_81, %c0_82], %75 {strides = array<i32>} : memref<160x32xf32, #tpu.memory_space<vmem>>, vector<160x32xf32>,
    %c2_83 = arith.constant 2 : index
    %c8_84 = arith.constant 8 : index
    %c0_85 = arith.constant 0 : index
    %77 = vector.load %arg8[%c2_83, %c8_84, %c0_85] : memref<12x32x16xbf16, #tpu.memory_space<vmem>>, vector<10x16x16xbf16>
    %78 = vector.shape_cast %77 : vector<10x16x16xbf16> to vector<160x16xbf16>
    %c7_86 = arith.constant 7 : index
    %c0_87 = arith.constant 0 : index
    %c0_88 = arith.constant 0 : index
    %79 = vector.load %arg3[%c7_86, %c0_87, %c0_88] : memref<9x16x32xbf16, #tpu.memory_space<vmem>>, vector<1x16x32xbf16>
    %80 = vector.shape_cast %79 : vector<1x16x32xbf16> to vector<16x32xbf16>
    %cst_89 = arith.constant dense<0.000000e+00> : vector<160x32xf32>
    %81 = tpu.matmul %78, %80, %cst_89 {dimension_numbers = #tpu.dot_dimension_numbers<[1], [0], [0], [1], [0, 0, 1, 1], [], []>} : vector<160x16xbf16>, vector<16x32xbf16>, vector<160x32xf32> -> vector<160x32xf32>
    %c0_90 = arith.constant 0 : index
    %c0_91 = arith.constant 0 : index
    %82 = vector.load %arg10[%c0_90, %c0_91] : memref<160x32xf32, #tpu.memory_space<vmem>>, vector<160x32xf32>
    %83 = arith.addf %82, %81 : vector<160x32xf32>
    %c0_92 = arith.constant 0 : index
    %c0_93 = arith.constant 0 : index
    %84 = vector.load %arg10[%c0_92, %c0_93] : memref<160x32xf32, #tpu.memory_space<vmem>>, vector<160x32xf32>
    tpu.vector_store %arg10[%c0_92, %c0_93], %83 {strides = array<i32>} : memref<160x32xf32, #tpu.memory_space<vmem>>, vector<160x32xf32>,
    %c2_94 = arith.constant 2 : index
    %c9_95 = arith.constant 9 : index
    %c0_96 = arith.constant 0 : index
    %85 = vector.load %arg8[%c2_94, %c9_95, %c0_96] : memref<12x32x16xbf16, #tpu.memory_space<vmem>>, vector<10x16x16xbf16>
    %86 = vector.shape_cast %85 : vector<10x16x16xbf16> to vector<160x16xbf16>
    %c8_97 = arith.constant 8 : index
    %c0_98 = arith.constant 0 : index
    %c0_99 = arith.constant 0 : index
    %87 = vector.load %arg3[%c8_97, %c0_98, %c0_99] : memref<9x16x32xbf16, #tpu.memory_space<vmem>>, vector<1x16x32xbf16>
    %88 = vector.shape_cast %87 : vector<1x16x32xbf16> to vector<16x32xbf16>
    %cst_100 = arith.constant dense<0.000000e+00> : vector<160x32xf32>
    %89 = tpu.matmul %86, %88, %cst_100 {dimension_numbers = #tpu.dot_dimension_numbers<[1], [0], [0], [1], [0, 0, 1, 1], [], []>} : vector<160x16xbf16>, vector<16x32xbf16>, vector<160x32xf32> -> vector<160x32xf32>
    %c0_101 = arith.constant 0 : index
    %c0_102 = arith.constant 0 : index
    %90 = vector.load %arg10[%c0_101, %c0_102] : memref<160x32xf32, #tpu.memory_space<vmem>>, vector<160x32xf32>
    %91 = arith.addf %90, %89 : vector<160x32xf32>
    %c0_103 = arith.constant 0 : index
    %c0_104 = arith.constant 0 : index
    %92 = vector.load %arg10[%c0_103, %c0_104] : memref<160x32xf32, #tpu.memory_space<vmem>>, vector<160x32xf32>
    tpu.vector_store %arg10[%c0_103, %c0_104], %91 {strides = array<i32>} : memref<160x32xf32, #tpu.memory_space<vmem>>, vector<160x32xf32>,
    %c0_105 = arith.constant 0 : index
    %c0_106 = arith.constant 0 : index
    %93 = vector.load %arg10[%c0_105, %c0_106] : memref<160x32xf32, #tpu.memory_space<vmem>>, vector<160x32xf32>
    %c0_107 = arith.constant 0 : index
    %c0_108 = arith.constant 0 : index
    %94 = vector.load %arg4[%c0_107, %c0_108] : memref<1x32xf32, #tpu.memory_space<vmem>>, vector<1x32xf32>
    %95 = vector.broadcast %94 : vector<1x32xf32> to vector<160x32xf32>
    %96 = arith.addf %93, %95 : vector<160x32xf32>
    %cst_109 = arith.constant 0.000000e+00 : f32
    %97 = vector.broadcast %cst_109 : f32 to vector<160x32xf32>
    %98 = arith.maximumf %96, %97 : vector<160x32xf32>
    %99 = arith.truncf %98 : vector<160x32xf32> to vector<160x32xbf16>
    %cst_110 = arith.constant 0.000000e+00 : bf16
    %100 = vector.broadcast %cst_110 : bf16 to vector<10x8x32xbf16>
    %c0_111 = arith.constant 0 : index
    %c0_112 = arith.constant 0 : index
    %c0_113 = arith.constant 0 : index
    %101 = vector.load %arg9[%c0_111, %c0_112, %c0_113] : memref<10x32x32xbf16, #tpu.memory_space<vmem>>, vector<10x8x32xbf16>
    tpu.vector_store %arg9[%c0_111, %c0_112, %c0_113], %100 {strides = array<i32>} : memref<10x32x32xbf16, #tpu.memory_space<vmem>>, vector<10x8x32xbf16>,
    %cst_114 = arith.constant 0.000000e+00 : bf16
    %102 = vector.broadcast %cst_114 : bf16 to vector<10x8x32xbf16>
    %c0_115 = arith.constant 0 : index
    %c24_116 = arith.constant 24 : index
    %c0_117 = arith.constant 0 : index
    %103 = vector.load %arg9[%c0_115, %c24_116, %c0_117] : memref<10x32x32xbf16, #tpu.memory_space<vmem>>, vector<10x8x32xbf16>
    tpu.vector_store %arg9[%c0_115, %c24_116, %c0_117], %102 {strides = array<i32>} : memref<10x32x32xbf16, #tpu.memory_space<vmem>>, vector<10x8x32xbf16>,
    %104 = vector.shape_cast %99 : vector<160x32xbf16> to vector<10x16x32xbf16>
    %c0_118 = arith.constant 0 : index
    %c8_119 = arith.constant 8 : index
    %c0_120 = arith.constant 0 : index
    %105 = vector.load %arg9[%c0_118, %c8_119, %c0_120] : memref<10x32x32xbf16, #tpu.memory_space<vmem>>, vector<10x16x32xbf16>
    tpu.vector_store %arg9[%c0_118, %c8_119, %c0_120], %104 {strides = array<i32>} : memref<10x32x32xbf16, #tpu.memory_space<vmem>>, vector<10x16x32xbf16>,
    %c0_i32_121 = arith.constant 0 : i32
    %106 = arith.cmpi eq, %arg1, %c0_i32_121 : i32
    %107 = arith.extui %106 : i1 to i32
    %c0_i32_122 = arith.constant 0 : i32
    %108 = arith.cmpi ne, %107, %c0_i32_122 : i32
    scf.if %108 {
      %cst_230 = arith.constant 0.000000e+00 : bf16
      %191 = vector.broadcast %cst_230 : bf16 to vector<1x32x32xbf16>
      %c0_231 = arith.constant 0 : index
      %c0_232 = arith.constant 0 : index
      %c0_233 = arith.constant 0 : index
      %192 = vector.load %arg9[%c0_231, %c0_232, %c0_233] : memref<10x32x32xbf16, #tpu.memory_space<vmem>>, vector<1x32x32xbf16>
      tpu.vector_store %arg9[%c0_231, %c0_232, %c0_233], %191 {strides = array<i32>} : memref<10x32x32xbf16, #tpu.memory_space<vmem>>, vector<1x32x32xbf16>,
    } else {
    }
    %c1_i32_123 = arith.constant 1 : i32
    %109 = arith.cmpi eq, %arg1, %c1_i32_123 : i32
    %110 = arith.extui %109 : i1 to i32
    %c0_i32_124 = arith.constant 0 : i32
    %111 = arith.cmpi ne, %110, %c0_i32_124 : i32
    scf.if %111 {
      %cst_230 = arith.constant 0.000000e+00 : bf16
      %191 = vector.broadcast %cst_230 : bf16 to vector<1x32x32xbf16>
      %c9_231 = arith.constant 9 : index
      %c0_232 = arith.constant 0 : index
      %c0_233 = arith.constant 0 : index
      %192 = vector.load %arg9[%c9_231, %c0_232, %c0_233] : memref<10x32x32xbf16, #tpu.memory_space<vmem>>, vector<1x32x32xbf16>
      tpu.vector_store %arg9[%c9_231, %c0_232, %c0_233], %191 {strides = array<i32>} : memref<10x32x32xbf16, #tpu.memory_space<vmem>>, vector<1x32x32xbf16>,
    } else {
    }
    %c0_125 = arith.constant 0 : index
    %c7_126 = arith.constant 7 : index
    %c0_127 = arith.constant 0 : index
    %112 = vector.load %arg9[%c0_125, %c7_126, %c0_127] : memref<10x32x32xbf16, #tpu.memory_space<vmem>>, vector<8x16x32xbf16>
    %113 = vector.shape_cast %112 : vector<8x16x32xbf16> to vector<128x32xbf16>
    %c0_128 = arith.constant 0 : index
    %c0_129 = arith.constant 0 : index
    %c0_130 = arith.constant 0 : index
    %114 = vector.load %arg5[%c0_128, %c0_129, %c0_130] : memref<9x32x128xbf16, #tpu.memory_space<vmem>>, vector<1x32x128xbf16>
    %115 = vector.shape_cast %114 : vector<1x32x128xbf16> to vector<32x128xbf16>
    %cst_131 = arith.constant dense<0.000000e+00> : vector<128x128xf32>
    %116 = tpu.matmul %113, %115, %cst_131 {dimension_numbers = #tpu.dot_dimension_numbers<[1], [0], [0], [1], [0, 0, 1, 1], [], []>} : vector<128x32xbf16>, vector<32x128xbf16>, vector<128x128xf32> -> vector<128x128xf32>
    %c0_132 = arith.constant 0 : index
    %c0_133 = arith.constant 0 : index
    %117 = vector.load %arg11[%c0_132, %c0_133] : memref<128x128xf32, #tpu.memory_space<vmem>>, vector<128x128xf32>
    tpu.vector_store %arg11[%c0_132, %c0_133], %116 {strides = array<i32>} : memref<128x128xf32, #tpu.memory_space<vmem>>, vector<128x128xf32>,
    %c0_134 = arith.constant 0 : index
    %c8_135 = arith.constant 8 : index
    %c0_136 = arith.constant 0 : index
    %118 = vector.load %arg9[%c0_134, %c8_135, %c0_136] : memref<10x32x32xbf16, #tpu.memory_space<vmem>>, vector<8x16x32xbf16>
    %119 = vector.shape_cast %118 : vector<8x16x32xbf16> to vector<128x32xbf16>
    %c1_137 = arith.constant 1 : index
    %c0_138 = arith.constant 0 : index
    %c0_139 = arith.constant 0 : index
    %120 = vector.load %arg5[%c1_137, %c0_138, %c0_139] : memref<9x32x128xbf16, #tpu.memory_space<vmem>>, vector<1x32x128xbf16>
    %121 = vector.shape_cast %120 : vector<1x32x128xbf16> to vector<32x128xbf16>
    %cst_140 = arith.constant dense<0.000000e+00> : vector<128x128xf32>
    %122 = tpu.matmul %119, %121, %cst_140 {dimension_numbers = #tpu.dot_dimension_numbers<[1], [0], [0], [1], [0, 0, 1, 1], [], []>} : vector<128x32xbf16>, vector<32x128xbf16>, vector<128x128xf32> -> vector<128x128xf32>
    %c0_141 = arith.constant 0 : index
    %c0_142 = arith.constant 0 : index
    %123 = vector.load %arg11[%c0_141, %c0_142] : memref<128x128xf32, #tpu.memory_space<vmem>>, vector<128x128xf32>
    %124 = arith.addf %123, %122 : vector<128x128xf32>
    %c0_143 = arith.constant 0 : index
    %c0_144 = arith.constant 0 : index
    %125 = vector.load %arg11[%c0_143, %c0_144] : memref<128x128xf32, #tpu.memory_space<vmem>>, vector<128x128xf32>
    tpu.vector_store %arg11[%c0_143, %c0_144], %124 {strides = array<i32>} : memref<128x128xf32, #tpu.memory_space<vmem>>, vector<128x128xf32>,
    %c0_145 = arith.constant 0 : index
    %c9_146 = arith.constant 9 : index
    %c0_147 = arith.constant 0 : index
    %126 = vector.load %arg9[%c0_145, %c9_146, %c0_147] : memref<10x32x32xbf16, #tpu.memory_space<vmem>>, vector<8x16x32xbf16>
    %127 = vector.shape_cast %126 : vector<8x16x32xbf16> to vector<128x32xbf16>
    %c2_148 = arith.constant 2 : index
    %c0_149 = arith.constant 0 : index
    %c0_150 = arith.constant 0 : index
    %128 = vector.load %arg5[%c2_148, %c0_149, %c0_150] : memref<9x32x128xbf16, #tpu.memory_space<vmem>>, vector<1x32x128xbf16>
    %129 = vector.shape_cast %128 : vector<1x32x128xbf16> to vector<32x128xbf16>
    %cst_151 = arith.constant dense<0.000000e+00> : vector<128x128xf32>
    %130 = tpu.matmul %127, %129, %cst_151 {dimension_numbers = #tpu.dot_dimension_numbers<[1], [0], [0], [1], [0, 0, 1, 1], [], []>} : vector<128x32xbf16>, vector<32x128xbf16>, vector<128x128xf32> -> vector<128x128xf32>
    %c0_152 = arith.constant 0 : index
    %c0_153 = arith.constant 0 : index
    %131 = vector.load %arg11[%c0_152, %c0_153] : memref<128x128xf32, #tpu.memory_space<vmem>>, vector<128x128xf32>
    %132 = arith.addf %131, %130 : vector<128x128xf32>
    %c0_154 = arith.constant 0 : index
    %c0_155 = arith.constant 0 : index
    %133 = vector.load %arg11[%c0_154, %c0_155] : memref<128x128xf32, #tpu.memory_space<vmem>>, vector<128x128xf32>
    tpu.vector_store %arg11[%c0_154, %c0_155], %132 {strides = array<i32>} : memref<128x128xf32, #tpu.memory_space<vmem>>, vector<128x128xf32>,
    %c1_156 = arith.constant 1 : index
    %c7_157 = arith.constant 7 : index
    %c0_158 = arith.constant 0 : index
    %134 = vector.load %arg9[%c1_156, %c7_157, %c0_158] : memref<10x32x32xbf16, #tpu.memory_space<vmem>>, vector<8x16x32xbf16>
    %135 = vector.shape_cast %134 : vector<8x16x32xbf16> to vector<128x32xbf16>
    %c3_159 = arith.constant 3 : index
    %c0_160 = arith.constant 0 : index
    %c0_161 = arith.constant 0 : index
    %136 = vector.load %arg5[%c3_159, %c0_160, %c0_161] : memref<9x32x128xbf16, #tpu.memory_space<vmem>>, vector<1x32x128xbf16>
    %137 = vector.shape_cast %136 : vector<1x32x128xbf16> to vector<32x128xbf16>
    %cst_162 = arith.constant dense<0.000000e+00> : vector<128x128xf32>
    %138 = tpu.matmul %135, %137, %cst_162 {dimension_numbers = #tpu.dot_dimension_numbers<[1], [0], [0], [1], [0, 0, 1, 1], [], []>} : vector<128x32xbf16>, vector<32x128xbf16>, vector<128x128xf32> -> vector<128x128xf32>
    %c0_163 = arith.constant 0 : index
    %c0_164 = arith.constant 0 : index
    %139 = vector.load %arg11[%c0_163, %c0_164] : memref<128x128xf32, #tpu.memory_space<vmem>>, vector<128x128xf32>
    %140 = arith.addf %139, %138 : vector<128x128xf32>
    %c0_165 = arith.constant 0 : index
    %c0_166 = arith.constant 0 : index
    %141 = vector.load %arg11[%c0_165, %c0_166] : memref<128x128xf32, #tpu.memory_space<vmem>>, vector<128x128xf32>
    tpu.vector_store %arg11[%c0_165, %c0_166], %140 {strides = array<i32>} : memref<128x128xf32, #tpu.memory_space<vmem>>, vector<128x128xf32>,
    %c1_167 = arith.constant 1 : index
    %c8_168 = arith.constant 8 : index
    %c0_169 = arith.constant 0 : index
    %142 = vector.load %arg9[%c1_167, %c8_168, %c0_169] : memref<10x32x32xbf16, #tpu.memory_space<vmem>>, vector<8x16x32xbf16>
    %143 = vector.shape_cast %142 : vector<8x16x32xbf16> to vector<128x32xbf16>
    %c4_170 = arith.constant 4 : index
    %c0_171 = arith.constant 0 : index
    %c0_172 = arith.constant 0 : index
    %144 = vector.load %arg5[%c4_170, %c0_171, %c0_172] : memref<9x32x128xbf16, #tpu.memory_space<vmem>>, vector<1x32x128xbf16>
    %145 = vector.shape_cast %144 : vector<1x32x128xbf16> to vector<32x128xbf16>
    %cst_173 = arith.constant dense<0.000000e+00> : vector<128x128xf32>
    %146 = tpu.matmul %143, %145, %cst_173 {dimension_numbers = #tpu.dot_dimension_numbers<[1], [0], [0], [1], [0, 0, 1, 1], [], []>} : vector<128x32xbf16>, vector<32x128xbf16>, vector<128x128xf32> -> vector<128x128xf32>
    %c0_174 = arith.constant 0 : index
    %c0_175 = arith.constant 0 : index
    %147 = vector.load %arg11[%c0_174, %c0_175] : memref<128x128xf32, #tpu.memory_space<vmem>>, vector<128x128xf32>
    %148 = arith.addf %147, %146 : vector<128x128xf32>
    %c0_176 = arith.constant 0 : index
    %c0_177 = arith.constant 0 : index
    %149 = vector.load %arg11[%c0_176, %c0_177] : memref<128x128xf32, #tpu.memory_space<vmem>>, vector<128x128xf32>
    tpu.vector_store %arg11[%c0_176, %c0_177], %148 {strides = array<i32>} : memref<128x128xf32, #tpu.memory_space<vmem>>, vector<128x128xf32>,
    %c1_178 = arith.constant 1 : index
    %c9_179 = arith.constant 9 : index
    %c0_180 = arith.constant 0 : index
    %150 = vector.load %arg9[%c1_178, %c9_179, %c0_180] : memref<10x32x32xbf16, #tpu.memory_space<vmem>>, vector<8x16x32xbf16>
    %151 = vector.shape_cast %150 : vector<8x16x32xbf16> to vector<128x32xbf16>
    %c5_181 = arith.constant 5 : index
    %c0_182 = arith.constant 0 : index
    %c0_183 = arith.constant 0 : index
    %152 = vector.load %arg5[%c5_181, %c0_182, %c0_183] : memref<9x32x128xbf16, #tpu.memory_space<vmem>>, vector<1x32x128xbf16>
    %153 = vector.shape_cast %152 : vector<1x32x128xbf16> to vector<32x128xbf16>
    %cst_184 = arith.constant dense<0.000000e+00> : vector<128x128xf32>
    %154 = tpu.matmul %151, %153, %cst_184 {dimension_numbers = #tpu.dot_dimension_numbers<[1], [0], [0], [1], [0, 0, 1, 1], [], []>} : vector<128x32xbf16>, vector<32x128xbf16>, vector<128x128xf32> -> vector<128x128xf32>
    %c0_185 = arith.constant 0 : index
    %c0_186 = arith.constant 0 : index
    %155 = vector.load %arg11[%c0_185, %c0_186] : memref<128x128xf32, #tpu.memory_space<vmem>>, vector<128x128xf32>
    %156 = arith.addf %155, %154 : vector<128x128xf32>
    %c0_187 = arith.constant 0 : index
    %c0_188 = arith.constant 0 : index
    %157 = vector.load %arg11[%c0_187, %c0_188] : memref<128x128xf32, #tpu.memory_space<vmem>>, vector<128x128xf32>
    tpu.vector_store %arg11[%c0_187, %c0_188], %156 {strides = array<i32>} : memref<128x128xf32, #tpu.memory_space<vmem>>, vector<128x128xf32>,
    %c2_189 = arith.constant 2 : index
    %c7_190 = arith.constant 7 : index
    %c0_191 = arith.constant 0 : index
    %158 = vector.load %arg9[%c2_189, %c7_190, %c0_191] : memref<10x32x32xbf16, #tpu.memory_space<vmem>>, vector<8x16x32xbf16>
    %159 = vector.shape_cast %158 : vector<8x16x32xbf16> to vector<128x32xbf16>
    %c6_192 = arith.constant 6 : index
    %c0_193 = arith.constant 0 : index
    %c0_194 = arith.constant 0 : index
    %160 = vector.load %arg5[%c6_192, %c0_193, %c0_194] : memref<9x32x128xbf16, #tpu.memory_space<vmem>>, vector<1x32x128xbf16>
    %161 = vector.shape_cast %160 : vector<1x32x128xbf16> to vector<32x128xbf16>
    %cst_195 = arith.constant dense<0.000000e+00> : vector<128x128xf32>
    %162 = tpu.matmul %159, %161, %cst_195 {dimension_numbers = #tpu.dot_dimension_numbers<[1], [0], [0], [1], [0, 0, 1, 1], [], []>} : vector<128x32xbf16>, vector<32x128xbf16>, vector<128x128xf32> -> vector<128x128xf32>
    %c0_196 = arith.constant 0 : index
    %c0_197 = arith.constant 0 : index
    %163 = vector.load %arg11[%c0_196, %c0_197] : memref<128x128xf32, #tpu.memory_space<vmem>>, vector<128x128xf32>
    %164 = arith.addf %163, %162 : vector<128x128xf32>
    %c0_198 = arith.constant 0 : index
    %c0_199 = arith.constant 0 : index
    %165 = vector.load %arg11[%c0_198, %c0_199] : memref<128x128xf32, #tpu.memory_space<vmem>>, vector<128x128xf32>
    tpu.vector_store %arg11[%c0_198, %c0_199], %164 {strides = array<i32>} : memref<128x128xf32, #tpu.memory_space<vmem>>, vector<128x128xf32>,
    %c2_200 = arith.constant 2 : index
    %c8_201 = arith.constant 8 : index
    %c0_202 = arith.constant 0 : index
    %166 = vector.load %arg9[%c2_200, %c8_201, %c0_202] : memref<10x32x32xbf16, #tpu.memory_space<vmem>>, vector<8x16x32xbf16>
    %167 = vector.shape_cast %166 : vector<8x16x32xbf16> to vector<128x32xbf16>
    %c7_203 = arith.constant 7 : index
    %c0_204 = arith.constant 0 : index
    %c0_205 = arith.constant 0 : index
    %168 = vector.load %arg5[%c7_203, %c0_204, %c0_205] : memref<9x32x128xbf16, #tpu.memory_space<vmem>>, vector<1x32x128xbf16>
    %169 = vector.shape_cast %168 : vector<1x32x128xbf16> to vector<32x128xbf16>
    %cst_206 = arith.constant dense<0.000000e+00> : vector<128x128xf32>
    %170 = tpu.matmul %167, %169, %cst_206 {dimension_numbers = #tpu.dot_dimension_numbers<[1], [0], [0], [1], [0, 0, 1, 1], [], []>} : vector<128x32xbf16>, vector<32x128xbf16>, vector<128x128xf32> -> vector<128x128xf32>
    %c0_207 = arith.constant 0 : index
    %c0_208 = arith.constant 0 : index
    %171 = vector.load %arg11[%c0_207, %c0_208] : memref<128x128xf32, #tpu.memory_space<vmem>>, vector<128x128xf32>
    %172 = arith.addf %171, %170 : vector<128x128xf32>
    %c0_209 = arith.constant 0 : index
    %c0_210 = arith.constant 0 : index
    %173 = vector.load %arg11[%c0_209, %c0_210] : memref<128x128xf32, #tpu.memory_space<vmem>>, vector<128x128xf32>
    tpu.vector_store %arg11[%c0_209, %c0_210], %172 {strides = array<i32>} : memref<128x128xf32, #tpu.memory_space<vmem>>, vector<128x128xf32>,
    %c2_211 = arith.constant 2 : index
    %c9_212 = arith.constant 9 : index
    %c0_213 = arith.constant 0 : index
    %174 = vector.load %arg9[%c2_211, %c9_212, %c0_213] : memref<10x32x32xbf16, #tpu.memory_space<vmem>>, vector<8x16x32xbf16>
    %175 = vector.shape_cast %174 : vector<8x16x32xbf16> to vector<128x32xbf16>
    %c8_214 = arith.constant 8 : index
    %c0_215 = arith.constant 0 : index
    %c0_216 = arith.constant 0 : index
    %176 = vector.load %arg5[%c8_214, %c0_215, %c0_216] : memref<9x32x128xbf16, #tpu.memory_space<vmem>>, vector<1x32x128xbf16>
    %177 = vector.shape_cast %176 : vector<1x32x128xbf16> to vector<32x128xbf16>
    %cst_217 = arith.constant dense<0.000000e+00> : vector<128x128xf32>
    %178 = tpu.matmul %175, %177, %cst_217 {dimension_numbers = #tpu.dot_dimension_numbers<[1], [0], [0], [1], [0, 0, 1, 1], [], []>} : vector<128x32xbf16>, vector<32x128xbf16>, vector<128x128xf32> -> vector<128x128xf32>
    %c0_218 = arith.constant 0 : index
    %c0_219 = arith.constant 0 : index
    %179 = vector.load %arg11[%c0_218, %c0_219] : memref<128x128xf32, #tpu.memory_space<vmem>>, vector<128x128xf32>
    %180 = arith.addf %179, %178 : vector<128x128xf32>
    %c0_220 = arith.constant 0 : index
    %c0_221 = arith.constant 0 : index
    %181 = vector.load %arg11[%c0_220, %c0_221] : memref<128x128xf32, #tpu.memory_space<vmem>>, vector<128x128xf32>
    tpu.vector_store %arg11[%c0_220, %c0_221], %180 {strides = array<i32>} : memref<128x128xf32, #tpu.memory_space<vmem>>, vector<128x128xf32>,
    %c0_222 = arith.constant 0 : index
    %c0_223 = arith.constant 0 : index
    %182 = vector.load %arg11[%c0_222, %c0_223] : memref<128x128xf32, #tpu.memory_space<vmem>>, vector<128x128xf32>
    %c0_224 = arith.constant 0 : index
    %c0_225 = arith.constant 0 : index
    %183 = vector.load %arg6[%c0_224, %c0_225] : memref<1x128xf32, #tpu.memory_space<vmem>>, vector<1x128xf32>
    %184 = vector.broadcast %183 : vector<1x128xf32> to vector<128x128xf32>
    %185 = arith.addf %182, %184 : vector<128x128xf32>
    %186 = vector.extract_strided_slice %185 {offsets = [0, 0], sizes = [128, 2], strides = [1, 1]} : vector<128x128xf32> to vector<128x2xf32>
    %187 = vector.shape_cast %186 : vector<128x2xf32> to vector<8x16x2xf32>
    %c0_226 = arith.constant 0 : index
    %c0_227 = arith.constant 0 : index
    %c0_228 = arith.constant 0 : index
    %c0_229 = arith.constant 0 : index
    %188 = vector.load %arg7[%c0_226, %c0_227, %c0_228, %c0_229] : memref<1x8x16x2xf32, #tpu.memory_space<vmem>>, vector<1x8x16x2xf32>
    %189 = vector.shape_cast %188 : vector<1x8x16x2xf32> to vector<8x16x2xf32>
    %190 = vector.shape_cast %187 : vector<8x16x2xf32> to vector<1x8x16x2xf32>
    tpu.vector_store %arg7[%c0_226, %c0_227, %c0_228, %c0_229], %190 {strides = array<i32>} : memref<1x8x16x2xf32, #tpu.memory_space<vmem>>, vector<1x8x16x2xf32>,
    return
  }
  func.func @transform_0(%arg0: i32, %arg1: i32) -> (i32, i32, i32, i32) {
    %c0_i32 = arith.constant 0 : i32
    %c0_i32_0 = arith.constant 0 : i32
    %c0_i32_1 = arith.constant 0 : i32
    %c0_i32_2 = arith.constant 0 : i32
    return %arg0, %c0_i32, %c0_i32_0, %c0_i32_1 : i32, i32, i32, i32
  }
  func.func @transform_1(%arg0: i32, %arg1: i32) -> (i32, i32, i32) {
    %c0_i32 = arith.constant 0 : i32
    %c0_i32_0 = arith.constant 0 : i32
    %c0_i32_1 = arith.constant 0 : i32
    %c0_i32_2 = arith.constant 0 : i32
    return %c0_i32, %c0_i32_0, %c0_i32_1 : i32, i32, i32
  }
  func.func @transform_2(%arg0: i32, %arg1: i32) -> (i32, i32) {
    %c0_i32 = arith.constant 0 : i32
    %c0_i32_0 = arith.constant 0 : i32
    %c0_i32_1 = arith.constant 0 : i32
    return %c0_i32, %c0_i32_0 : i32, i32
  }
  func.func @transform_3(%arg0: i32, %arg1: i32) -> (i32, i32, i32) {
    %c0_i32 = arith.constant 0 : i32
    %c0_i32_0 = arith.constant 0 : i32
    %c0_i32_1 = arith.constant 0 : i32
    %c0_i32_2 = arith.constant 0 : i32
    return %c0_i32, %c0_i32_0, %c0_i32_1 : i32, i32, i32
  }
  func.func @transform_4(%arg0: i32, %arg1: i32) -> (i32, i32) {
    %c0_i32 = arith.constant 0 : i32
    %c0_i32_0 = arith.constant 0 : i32
    %c0_i32_1 = arith.constant 0 : i32
    return %c0_i32, %c0_i32_0 : i32, i32
  }
  func.func @transform_5(%arg0: i32, %arg1: i32) -> (i32, i32, i32, i32) {
    %c0_i32 = arith.constant 0 : i32
    %c0_i32_0 = arith.constant 0 : i32
    %c0_i32_1 = arith.constant 0 : i32
    return %arg0, %arg1, %c0_i32, %c0_i32_0 : i32, i32, i32, i32
  }
}

</mosaic_0001>

<bundles_post_ra>
// kernel: tpu_custom_call.1
= control target key start
LH: loop header
LB: loop body
LE: loop exit
PB: predicated region body
PF: predicated region fallthrough
CT: control target
= control target key end

     0   :  { %10 = vsyncpa [#allocation7], 0  ;;  %s9083_s0 = inlined_call_operand.hbm [shape: f32[2,16,16,16], index: 0, kind: input, shape index: {}]   ;;  %s9084_s1 = inlined_call_operand.hbm [shape: bf16[9,16,32], index: 1, kind: input, shape index: {}]   ;;  %s9085_s2 = inlined_call_operand.vmem [shape: f32[1,32], index: 2, kind: input, shape index: {}]   ;;  %s9086_s3 = inlined_call_operand.hbm [shape: bf16[9,32,128], index: 3, kind: input, shape index: {}]   ;;  %s9087_s4 = inlined_call_operand.vmem [shape: f32[1,128], index: 4, kind: input, shape index: {}]   ;;  %s9088_s5 = inlined_call_operand.vmem [shape: f32[2,16,16,2], index: 5, kind: output, shape index: {}]  }
   0x1   :  { %12 = vsyncpa [#allocation7 + $0x1], 0 }
   0x2   :  { %13 = vsyncpa [#allocation9], 0  ;;  %s8000_s18 = smov 0   ;;  %s8002_s19 = smov 0  }
   0x3   :  { %s8004_s20 = smov 0   ;;  %s8006_s21 = smov 0  }
   0x4   :  { %s8008_s22 = smov 0   ;;  %s8010_s23 = smov 0  }
   0x5   :  { %s8012_s24 = smov 0   ;;  %s8014_s25 = smov 0  }
   0x6 LB: > { %s6748_s26 = sadd.s32 4294967295, %s7956_s25   ;;  %p51_p0 = scmp.ne.s32.totalorder %s7932_s19, %s7928_s18  ;;  %s7956_s25 = sphi %s8014_s25, %s19_s25   ;;  %s7952_s24 = sphi %s8012_s24, %s9108_s24   ;;  %s7948_s23 = sphi %s8010_s23, %s9107_s23   ;;  %s7944_s22 = sphi %s8008_s22, %s9106_s22   ;;  %s7940_s21 = sphi %s8006_s21, %s9105_s21   ;;  %s7936_s20 = sphi %s8004_s20, %s9104_s20   ;;  %s7932_s19 = sphi %s8002_s19, %s9103_s19   ;;  %s7928_s18 = sphi %s8000_s18, %s9102_s18  }
   0x7   : > { %p8040_p1 = scmp.eq.s32.totalorder %s6748_s26, 0  ;;  %p6750_p2 = scmp.ge.s32.totalorder %s7956_s25, 1 }
   0x8   : > { %p174_p3 = scmp.lt.s32.totalorder %s7956_s25, 5  ;;  %s7958_s30 = smov [#allocation8]  }
   0x9   : > { %s9093_s27 = scalar_select %p8040_p1, 1, 0 }
   0xa   : > { %p8048_p4 = por %p8040_p1, %p51_p0  ;;  %p8052_p5 = pnand %p6750_p2, %p174_p3 }
   0xb   : > { %s186_s6 = sshll.u32 %s7958_s30, 4  ;;  %s7959_s8 = smov [#allocation10]   ;;  %s187_s6 = int_to_ptr.vmem [resolvable:$true] %s186_s6 }
   0xc   : > { %s9094_s28 = scalar_select %p8048_p4, 1, 0 }
   0xd   : > { %s9095_s29 = scalar_select %p8052_p5, 1, 0 }
   0xe   : > { %p7682_p6 = pneg %p8052_p5  ;;  %s202_s9 = sshll.u32 %s7959_s8, 4  ;;  %s8064_s9 = int_to_ptr.vmem [resolvable:$true] %s202_s9 }
   0xf   : > { %s7800_s12 = scalar_lea.hbm %s9084_s1, 1152 }
  0x10   : > { %p8060_p7 = pnand %p7682_p6, %p8040_p1  ;;  %p7801_p8 = scmp.ne.s32.totalorder %s9084_s1, %s7800_s12 }
  0x11   : > { %p7807_p12 = scmp.lt.u32.totalorder %s7800_s12, %s9084_s1 }
  0x12   : > { %p7802_p9 = pneg %p8060_p7 }
  0x14   : > { %p7803_p10 = pnand %p7802_p9, %p7801_p8 }
  0x16   : > { %p7804_p11 = pneg %p7803_p10 }
  0x18   : > { %p7809_p13 = pnand %p7807_p12, %p7804_p11 }
  0x1a   : > { %7812 = shalt.err (!%p7809_p13)
}
  0x1b   : > { %s7813_s17 = scalar_lea.vmem %s187_s6, 1152  ;;  %p7821_p6 = scmp.lt.s32.totalorder %s187_s6, %s187_s6 }
  0x1c   : > { %p7814_p0 = scmp.ne.s32.totalorder %s187_s6, %s7813_s17  ;;  %p7822_p1 = scmp.lt.s32.totalorder %s7813_s17, %s7813_s17 }
  0x1e   : > { %p7816_p2 = pnand %p7814_p0, %p7802_p9  ;;  %p7823_p4 = por %p7822_p1, %p7821_p6 }
  0x20   : > { %p7817_p3 = pneg %p7816_p2 }
  0x22   : > { %p7824_p5 = pnand %p7823_p4, %p7817_p3 }
  0x24   : > { %7827 = shalt.err (!%p7824_p5)
}
  0x25   : > { %s7960_s18 = smov 64   ;;  %s7961_s26 = smov 4  }
  0x26   : > { %7685 = dma.hbm_to_vmem [thread:$0]  (!%p8060_p7), %s9084_s1, 1152, %s187_s6, [#allocation9], %s7960_s18, %s7960_s18, %s7961_s26  }
  0x27   : > { %s7828_s12 = scalar_lea.hbm %s9086_s3, 2304 }
  0x28   : > { %p7829_p8 = scmp.ne.s32.totalorder %s9086_s3, %s7828_s12  ;;  %p7835_p5 = scmp.lt.u32.totalorder %s7828_s12, %s9086_s3 }
  0x2a   : > { %p7831_p1 = pnand %p7829_p8, %p7802_p9 }
  0x2c   : > { %p7832_p4 = pneg %p7831_p1 }
  0x2e   : > { %p7837_p10 = pnand %p7835_p5, %p7832_p4 }
  0x30   : > { %7840 = shalt.err (!%p7837_p10)
}
  0x31   : > { %s7841_s6 = scalar_lea.vmem %s8064_s9, 2304  ;;  %p7849_p0 = scmp.lt.s32.totalorder %s8064_s9, %s8064_s9 }
  0x32   : > { %p7842_p11 = scmp.ne.s32.totalorder %s8064_s9, %s7841_s6  ;;  %p7850_p2 = scmp.lt.s32.totalorder %s7841_s6, %s7841_s6 }
  0x34   : > { %p7844_p12 = pnand %p7842_p11, %p7802_p9  ;;  %p7851_p3 = por %p7850_p2, %p7849_p0 }
  0x36   : > { %p7845_p13 = pneg %p7844_p12 }
  0x38   : > { %p7852_p6 = pnand %p7851_p3, %p7845_p13 }
  0x3a   : > { %7855 = shalt.err (!%p7852_p6)
}
  0x3b   : > { %7688 = dma.hbm_to_vmem [thread:$0]  (!%p8060_p7), %s9086_s3, 2304, %s8064_s9, [#allocation9], %s7960_s18, %s7960_s18, %s7961_s26  }
  0x3c   : > { %s28_s8 = sadd.s32 1, %s7948_s23  ;;  %s31_s10 = sadd.s32 1, %s7952_s24 }
  0x3d   : > { %p29_p9 = scmp.ge.s32.totalorder %s28_s8, 2  ;;  %s38_s7 = sadd.s32 1, %s7936_s20 }
  0x3e   : > { %p45_p8 = scmp.ne.s32.totalorder %s7936_s20, %s7932_s19  ;;  %p46_p1 = scmp.eq.s32.totalorder %s7956_s25, 0 }
  0x3f   : > { %s9110_s8 = smov (%p29_p9, %s28_s8), 0  ;;  %s9112_s10 = smov (!%p29_p9, %s31_s10), %s7952_s24 }
  0x40   : > { %p8122_p4 = por %p46_p1, %p45_p8  ;;  %p7695_p5 = scmp.lt.s32.totalorder %s7956_s25, 4 }
  0x41   : > { %p33_p10 = scmp.ge.s32.totalorder %s9112_s10, 2  ;;  %s219_s12 = sand.u32 1, %s7936_s20  }
  0x42   : > { %s6754_s9 = sshll.u32 %s219_s12, 8  ;;  %s6974_s18 = sshll.u32 %s7952_s24, 12 }
  0x43   : > { %s9114_s10 = smov (%p33_p10, %s9112_s10), 0  ;;  %s8136_s15 = scalar_lea.hbm %s9083_s0, %s6974_s18 }
  0x44   : > { %s35_s26 = ssub.s32 %s7952_s24, %s9114_s10  ;;  %s223_s16 = scalar_lea.vmem [#allocation6], %s6754_s9 }
  0x45   : > { %p36_p7 = scmp.eq.s32.totalorder %s35_s26, 0  ;;  %s230_s6 = sshll.u32 %s223_s16, 4  ;;  %s8138_s6 = int_to_ptr.vmem [resolvable:$true] %s230_s6 }
  0x46   : > { %p8142_p11 = pnand %p7695_p5, %p8122_p4  ;;  %s8149_s18 = scalar_lea.sflag [#allocation7], %s219_s12 }
  0x47   : > { %s8147_s30 = scalar_select %p36_p7, %s7936_s20, %s38_s7  }
  0x48   : > { %s7856_s13 = scalar_lea.hbm %s8136_s15, 4096  ;;  %p7858_p13 = pneg %p8142_p11 }
  0x49   : > { %p7857_p12 = scmp.ne.s32.totalorder %s8136_s15, %s7856_s13  ;;  %s7861_s26 = scalar_lea.hbm %s9083_s0, 8192 }
  0x4a   : > { %p7862_p3 = scmp.lt.u32.totalorder %s8136_s15, %s9083_s0  ;;  %p7863_p6 = scmp.lt.u32.totalorder %s7861_s26, %s7856_s13 }
  0x4b   : > { %p7859_p0 = pnand %p7858_p13, %p7857_p12  ;;  %p7865_p8 = scmp.lt.u32.totalorder %s7856_s13, %s8136_s15 }
  0x4c   : > { %p7864_p9 = por %p7863_p6, %p7862_p3 }
  0x4d   : > { %p7860_p2 = pneg %p7859_p0 }
  0x4e   : > { %p7866_p1 = por %p7865_p8, %p7864_p9 }
  0x50   : > { %p7867_p4 = pnand %p7866_p1, %p7860_p2 }
  0x52   : > { %7870 = shalt.err (!%p7867_p4)
}
  0x53   : > { %s7871_s7 = scalar_lea.vmem %s8138_s6, 4096  ;;  %s7962_s12 = smov [#allocation6]  }
  0x54   : > { %p7872_p5 = scmp.ne.s32.totalorder %s8138_s6, %s7871_s7  ;;  %s7876_s9 = sshll.u32 %s7962_s12, 4  ;;  %s7877_s9 = int_to_ptr.vmem [resolvable:$false] %s7876_s9 }
  0x55   : > { %s7878_s11 = scalar_lea.vmem %s7877_s9, 8192  ;;  %p7879_p12 = scmp.lt.s32.totalorder %s8138_s6, %s7877_s9 }
  0x56   : > { %p7874_p10 = pnand %p7872_p5, %p7858_p13  ;;  %p7880_p0 = scmp.lt.s32.totalorder %s7878_s11, %s7871_s7 }
  0x58   : > { %p7875_p7 = pneg %p7874_p10  ;;  %p7881_p3 = por %p7880_p0, %p7879_p12 }
  0x5a   : > { %p7882_p6 = pnand %p7881_p3, %p7875_p7 }
  0x5c   : > { %7885 = shalt.err (!%p7882_p6)
}
  0x5d   : > { %s7963_s13 = smov 128   ;;  %s7964_s26 = smov 8  }
  0x5e   : > { %7692 = dma.hbm_to_vmem [thread:$0]  (!%p8142_p11), %s8136_s15, 4096, %s8138_s6, %s8149_s18, %s7963_s13, %s7963_s13, %s7964_s26  }
  0x5f   : > { %p9099_p13 = scmp.ne.s32.totalorder %s9095_s29, 0 }
  0x60   : > { %s244_s14 = sand.u32 (!%p9099_p13), 1, %s7932_s19   ;;  %p9100_p2 = scmp.ne.s32.totalorder (!%p9099_p13), %s9094_s28, 0 }
  0x61   : > { %242 = sbr.rel (%p9099_p13) target bundleno = 1236 (0x4d4), region = 40  ;;  %s8180_s16 = sshll.u32 (!%p9099_p13), %s244_s14, 8 }
  0x62   : > { %s245_s7 = scalar_lea.sflag (!%p9099_p13), [#allocation7], %s244_s14  ;;  %s248_s12 = scalar_lea.vmem (!%p9099_p13), [#allocation6], %s8180_s16 }
  0x68   : > { %7919 = dma.done.wait (%p9100_p2), %s245_s7, 4096  }
  0x69   : > { %7921 = vsyncadd (%p9100_p2), %s245_s7, 4294963200  ;;  %p9101_p9 = scmp.ne.s32.totalorder %s9093_s27, 0 }
  0x6b   : > { %7923 = dma.done.wait (%p9101_p9), [#allocation9], 3456  }
  0x6c   : > { %7925 = vsyncadd (%p9101_p9), [#allocation9], 4294963840  ;;  %s8192_s29 = sshll.u32 %s7940_s21, 3  ;;  %p289_p11 = scmp.lt.s32.totalorder %s7944_s22, 1  ;;  %vm301_vm0 = vcmask 125952   ;;  %v7965_v0 = vmov 0  }
  0x6d   : > { %p291_p8 = scmp.lt.s32.totalorder %s8192_s29, 15  ;;  %302 = vst.msk [vmem:[#allocation2] sm:$0xf] %vm301_vm0, %v7965_v0  ;;  %303 = vst.msk [vmem:[#allocation2 + $0x10] sm:$0xf] %vm301_vm0, %v7965_v0  ;;  %vm314_vm1 = vcmask 130052  }
  0x6e   : > { %304 = vst.msk [vmem:[#allocation2 + $0x20] sm:$0xf] %vm301_vm0, %v7965_v0  ;;  %305 = vst.msk [vmem:[#allocation2 + $0x30] sm:$0xf] %vm301_vm0, %v7965_v0  ;;  %s6975_s27 = sshll.u32 %s7940_s21, 7  ;;  %s9116_s22 = smov (!%p289_p11, %s7944_s22), 1 }
  0x6f   : > { %306 = vst.msk [vmem:[#allocation2 + $0x40] sm:$0xf] %vm301_vm0, %v7965_v0  ;;  %307 = vst.msk [vmem:[#allocation2 + $0x50] sm:$0xf] %vm301_vm0, %v7965_v0  ;;  %s292_s28 = scalar_select %p291_p8, %s8192_s29, 15 }
  0x70   : > { %308 = vst.msk [vmem:[#allocation2 + $0x60] sm:$0xf] %vm301_vm0, %v7965_v0  ;;  %309 = vst.msk [vmem:[#allocation2 + $0x70] sm:$0xf] %vm301_vm0, %v7965_v0  ;;  %s6763_s15 = sshll.u32 %s9116_s22, 5  ;;  %s8253_s6 = scalar_lea.vmem %s248_s12, %s6975_s27 [#allocation6] }
  0x71   : > { %310 = vst.msk [vmem:[#allocation2 + $0x80] sm:$0xf] %vm301_vm0, %v7965_v0  ;;  %311 = vst.msk [vmem:[#allocation2 + $0x90] sm:$0xf] %vm301_vm0, %v7965_v0  ;;  %s6762_s17 = sshll.u32 %s292_s28, 1  ;;  %v329_v1 = vld [vmem:[%s8253_s6] sm:$0xff] }
  0x72   : > { %312 = vst.msk [vmem:[#allocation2 + $0xa0] sm:$0xf] %vm301_vm0, %v7965_v0  ;;  %313 = vst.msk [vmem:[#allocation2 + $0xb0] sm:$0xf] %vm301_vm0, %v7965_v0  ;;  %s295_s18 = sadd.s32 %s6763_s15, %s6762_s17  ;;  %v330_v2 = vld [vmem:[%s8253_s6 + $0x8] sm:$0xff]  ;;  %v331_v3 = vld [vmem:[%s8253_s6 + $0x10] sm:$0xff] }
  0x73   : > { %315 = vst.msk [vmem:[#allocation2 + $0x8] sm:$0xf0] %vm314_vm1, %v7965_v0  ;;  %316 = vst.msk [vmem:[#allocation2 + $0x18] sm:$0xf0] %vm314_vm1, %v7965_v0  ;;  %s6764_s9 = sshll.u32 %s295_s18, 3  ;;  %v345_v4 = vpack.c.bf16 %v330_v2, %v329_v1  ;;  %v332_v5 = vld [vmem:[%s8253_s6 + $0x18] sm:$0xff] }
  0x74   : > { %317 = vst.msk [vmem:[#allocation2 + $0x28] sm:$0xf0] %vm314_vm1, %v7965_v0  ;;  %318 = vst.msk [vmem:[#allocation2 + $0x38] sm:$0xf0] %vm314_vm1, %v7965_v0  ;;  %s8261_s13 = scalar_lea.vmem %s9088_s5, %s6764_s9  ;;  %v333_v6 = vld [vmem:[%s8253_s6 + $0x20] sm:$0xff]  ;;  %v334_v7 = vld [vmem:[%s8253_s6 + $0x28] sm:$0xff]  ;;  %v346_v8 = vpack.c.bf16 %v332_v5, %v331_v3 }
  0x75   : > { %319 = vst.msk [vmem:[#allocation2 + $0x48] sm:$0xf0] %vm314_vm1, %v7965_v0  ;;  %320 = vst.msk [vmem:[#allocation2 + $0x58] sm:$0xf0] %vm314_vm1, %v7965_v0  ;;  %v347_v9 = vpack.c.bf16 %v334_v7, %v333_v6  ;;  %v335_v10 = vld [vmem:[%s8253_s6 + $0x30] sm:$0xff]  ;;  %v336_v11 = vld [vmem:[%s8253_s6 + $0x38] sm:$0xff] }
  0x76   : > { %321 = vst.msk [vmem:[#allocation2 + $0x68] sm:$0xf0] %vm314_vm1, %v7965_v0  ;;  %322 = vst.msk [vmem:[#allocation2 + $0x78] sm:$0xf0] %vm314_vm1, %v7965_v0  ;;  %v337_v12 = vld [vmem:[%s8253_s6 + $0x40] sm:$0xff]  ;;  %v361_v13 = vrot.slane %v345_v4, 4  ;;  %v348_v14 = vpack.c.bf16 %v336_v11, %v335_v10 }
  0x77   : > { %323 = vst.msk [vmem:[#allocation2 + $0x88] sm:$0xf0] %vm314_vm1, %v7965_v0  ;;  %324 = vst.msk [vmem:[#allocation2 + $0x98] sm:$0xf0] %vm314_vm1, %v7965_v0  ;;  %v338_v15 = vld [vmem:[%s8253_s6 + $0x48] sm:$0xff]  ;;  %v339_v16 = vld [vmem:[%s8253_s6 + $0x50] sm:$0xff] }
  0x78   : > { %325 = vst.msk [vmem:[#allocation2 + $0xa8] sm:$0xf0] %vm314_vm1, %v7965_v0  ;;  %326 = vst.msk [vmem:[#allocation2 + $0xb8] sm:$0xf0] %vm314_vm1, %v7965_v0  ;;  %v340_v17 = vld [vmem:[%s8253_s6 + $0x58] sm:$0xff]  ;;  %v362_v18 = vrot.slane %v346_v8, 4  ;;  %v349_v20 = vpack.c.bf16 %v338_v15, %v337_v12 }
  0x79   : > { %v363_v19 = vrot.slane %v347_v9, 4  ;;  %v350_v21 = vpack.c.bf16 %v340_v17, %v339_v16  ;;  %v341_v22 = vld [vmem:[%s8253_s6 + $0x60] sm:$0xff]  ;;  %v342_v23 = vld [vmem:[%s8253_s6 + $0x68] sm:$0xff]  ;;  %v343_v24 = vld [vmem:[%s8253_s6 + $0x70] sm:$0xff]  ;;  %378 = vst.msk [vmem:[#allocation2 + $0x20] sm:$0xf0] %vm314_vm1, %v361_v13 }
  0x7a   : > { %379 = vst.msk [vmem:[#allocation2 + $0x28] sm:$0xf] %vm301_vm0, %v361_v13  ;;  %v364_v25 = vrot.slane %v348_v14, 4  ;;  %v351_v26 = vpack.c.bf16 %v342_v23, %v341_v22  ;;  %v344_v27 = vld [vmem:[%s8253_s6 + $0x78] sm:$0xff]  ;;  %381 = vst.msk [vmem:[#allocation2 + $0x38] sm:$0xf] %vm301_vm0, %v362_v18 }
  0x7b   : > { %380 = vst.msk [vmem:[#allocation2 + $0x30] sm:$0xf0] %vm314_vm1, %v362_v18  ;;  %382 = vst.msk [vmem:[#allocation2 + $0x40] sm:$0xf0] %vm314_vm1, %v363_v19  ;;  %v365_v28 = vrot.slane %v349_v20, 4  ;;  %v366_v29 = vrot.slane %v350_v21, 4  ;;  %v352_v30 = vpack.c.bf16 %v344_v27, %v343_v24 }
  0x7c   : > { %383 = vst.msk [vmem:[#allocation2 + $0x48] sm:$0xf] %vm301_vm0, %v363_v19  ;;  %385 = vst.msk [vmem:[#allocation2 + $0x58] sm:$0xf] %vm301_vm0, %v364_v25  ;;  %v367_v31 = vrot.slane %v351_v26, 4  ;;  %p6767_p1 = scmp.ne.s32.totalorder %s7940_s21, 0 }
  0x7d   : > { %384 = vst.msk [vmem:[#allocation2 + $0x50] sm:$0xf0] %vm314_vm1, %v364_v25  ;;  %386 = vst.msk [vmem:[#allocation2 + $0x60] sm:$0xf0] %vm314_vm1, %v365_v28  ;;  %v368_v32 = vrot.slane %v352_v30, 4  ;;  %v7966_v33 = vmov (!%p6767_p1), 0  }
  0x7e   : > { %387 = vst.msk [vmem:[#allocation2 + $0x68] sm:$0xf] %vm301_vm0, %v365_v28  ;;  %389 = vst.msk [vmem:[#allocation2 + $0x78] sm:$0xf] %vm301_vm0, %v366_v29  ;;  %397 = sbr.rel (%p6767_p1) target bundleno = 133 (0x85), region = 56 }
  0x7f   : > { %388 = vst.msk [vmem:[#allocation2 + $0x70] sm:$0xf0] %vm314_vm1, %v366_v29  ;;  %390 = vst.msk [vmem:[#allocation2 + $0x80] sm:$0xf0] %vm314_vm1, %v367_v31 }
  0x80   : > { %391 = vst.msk [vmem:[#allocation2 + $0x88] sm:$0xf] %vm301_vm0, %v367_v31  ;;  %393 = vst.msk [vmem:[#allocation2 + $0x98] sm:$0xf] %vm301_vm0, %v368_v32 }
  0x81   : > { %392 = vst.msk [vmem:[#allocation2 + $0x90] sm:$0xf0] %vm314_vm1, %v368_v32  ;;  %398 = vst.msk [vmem:[#allocation2] sm:$0xf0] (!%p6767_p1), %vm314_vm1, %v7966_v33 }
  0x82   : > { %399 = vst.msk [vmem:[#allocation2 + $0x8] sm:$0xf] (!%p6767_p1), %vm301_vm0, %v7966_v33  ;;  %401 = vst.msk [vmem:[#allocation2 + $0x18] sm:$0xf] (!%p6767_p1), %vm301_vm0, %v7966_v33 }
  0x83   : > { %400 = vst.msk [vmem:[#allocation2 + $0x10] sm:$0xf0] (!%p6767_p1), %vm314_vm1, %v7966_v33 }
  0x85 PF: > { %p6768_p4 = scmp.le.s32.totalorder %s7940_s21, 0 }
  0x86   : > { %s6769_s26 = sadd.s32 (!%p6768_p4), 4294967294, %s8192_s29 }
  0x87   : > { %405 = sbr.rel (%p6768_p4) target bundleno = 145 (0x91), region = 60  ;;  %s6770_s14 = sshll.u32 (!%p6768_p4), %s6769_s26, 4 }
  0x88   : > { %s408_s7 = scalar_lea.vmem (!%p6768_p4), %s248_s12, %s6770_s14 [#allocation6] }
  0x89   : > { %v409_v34 = vld [vmem:[%s408_s7] sm:$0xff] (!%p6768_p4)  ;;  %v410_v35 = vld [vmem:[%s408_s7 + $0x8] sm:$0xff] (!%p6768_p4)  ;;  %v411_v36 = vld [vmem:[%s408_s7 + $0x10] sm:$0xff] (!%p6768_p4) }
  0x8a   : > { %v413_v37 = vpack.c.bf16 (!%p6768_p4), %v410_v35, %v409_v34  ;;  %v412_v38 = vld [vmem:[%s408_s7 + $0x18] sm:$0xff] (!%p6768_p4) }
  0x8b   : > { %v414_v39 = vpack.c.bf16 (!%p6768_p4), %v412_v38, %v411_v36 }
  0x8c   : > { %v417_v40 = vrot.slane (!%p6768_p4), %v413_v37, 4 }
  0x8d   : > { %v418_v41 = vrot.slane (!%p6768_p4), %v414_v39, 4 }
  0x8e   : > { %421 = vst.msk [vmem:[#allocation2] sm:$0xf0] %vm314_vm1, %v417_v40 }
  0x8f   : > { %422 = vst.msk [vmem:[#allocation2 + $0x8] sm:$0xf] %vm301_vm0, %v417_v40  ;;  %424 = vst.msk [vmem:[#allocation2 + $0x18] sm:$0xf] %vm301_vm0, %v418_v41 }
  0x90   : > { %423 = vst.msk [vmem:[#allocation2 + $0x10] sm:$0xf0] %vm314_vm1, %v418_v41 }
  0x91 PF: > { %p6771_p5 = scmp.ne.s32.totalorder %s7940_s21, 1 }
  0x92   : > { %v7967_v42 = vmov (!%p6771_p5), 0  }
  0x93   : > { %428 = sbr.rel (%p6771_p5) target bundleno = 154 (0x9a), region = 64  ;;  %430 = vst.msk [vmem:[#allocation2 + $0xa0] sm:$0xf0] (!%p6771_p5), %vm314_vm1, %v7967_v42  ;;  %432 = vst.msk [vmem:[#allocation2 + $0xb0] sm:$0xf0] (!%p6771_p5), %vm314_vm1, %v7967_v42 }
  0x94   : > { %431 = vst.msk [vmem:[#allocation2 + $0xa8] sm:$0xf] (!%p6771_p5), %vm301_vm0, %v7967_v42  ;;  %433 = vst.msk [vmem:[#allocation2 + $0xb8] sm:$0xf] (!%p6771_p5), %vm301_vm0, %v7967_v42 }
  0x9a PF: > { %p6772_p10 = scmp.ge.s32.totalorder %s7940_s21, 1 }
  0x9b   : > { %v6775_v43 = vld [vmem:[%s8253_s6 + $0x80] sm:$0xff] (!%p6772_p10)  ;;  %v6776_v44 = vld [vmem:[%s8253_s6 + $0x88] sm:$0xff] (!%p6772_p10)  ;;  %v6777_v45 = vld [vmem:[%s8253_s6 + $0x90] sm:$0xff] (!%p6772_p10) }
  0x9c   : > { %437 = sbr.rel (%p6772_p10) target bundleno = 163 (0xa3), region = 68  ;;  %v445_v46 = vpack.c.bf16 (!%p6772_p10), %v6776_v44, %v6775_v43  ;;  %v6778_v47 = vld [vmem:[%s8253_s6 + $0x98] sm:$0xff] (!%p6772_p10) }
  0x9d   : > { %v446_v48 = vpack.c.bf16 (!%p6772_p10), %v6778_v47, %v6777_v45 }
  0x9e   : > { %v449_v49 = vrot.slane (!%p6772_p10), %v445_v46, 4 }
  0x9f   : > { %v450_v50 = vrot.slane (!%p6772_p10), %v446_v48, 4 }
  0xa0   : > { %454 = vst.msk [vmem:[#allocation2 + $0xa0] sm:$0xf0] (!%p6772_p10), %vm314_vm1, %v449_v49 }
  0xa1   : > { %455 = vst.msk [vmem:[#allocation2 + $0xa8] sm:$0xf] (!%p6772_p10), %vm301_vm0, %v449_v49  ;;  %457 = vst.msk [vmem:[#allocation2 + $0xb8] sm:$0xf] (!%p6772_p10), %vm301_vm0, %v450_v50 }
  0xa2   : > { %456 = vst.msk [vmem:[#allocation2 + $0xb0] sm:$0xf0] (!%p6772_p10), %vm314_vm1, %v450_v50 }
  0xa3 PF: > { %v7773_v51 = vld [vmem:[#allocation8] sm:$0xff]   ;;  %v459_v53 = vld [vmem:[#allocation2 + $0x8] sm:$0xf]  ;;  %vm478_vm2 = vsmask.f32 4352  ;;  %vm657_vm3 = vcmask 130048  }
  0xa4   : > { %v458_v52 = vld [vmem:[#allocation2] sm:$0xf8]  ;;  %7166 = vmatprep.subr.bf16.mxu0 %v7773_v51  ;;  %v488_v56 = vshrl.u32 %v459_v53, 16  ;;  %v491_v57 = vshll.u32 %v459_v53, 16  ;;  %v7774_v58 = vld [vmem:[#allocation8 + $0x8] sm:$0xff]   ;;  %v8325_v32 = vld [vmem:[#allocation8 + $0x10] sm:$0xff]  }
  0xa5   : > { %v480_v54 = vshrl.u32 %v458_v52, 16  ;;  %v483_v55 = vshll.u32 %v458_v52, 16  ;;  %7167 = vmatpush3.bf16.msra.mxu0 %v7773_v51  ;;  %v460_v59 = vld [vmem:[#allocation2 + $0x10] sm:$0xf8]  ;;  %v461_v1 = vld [vmem:[#allocation2 + $0x18] sm:$0xf] }
  0xa6   : > { %v490_v62 = vrot.slane %v488_v56, 3  ;;  %v493_v63 = vrot.slane %v491_v57, 4  ;;  %7188 = vmatprep.subr.bf16.mxu0 %v7774_v58  ;;  %v497_v2 = vshrl.u32 %v460_v59, 16  ;;  %v500_v3 = vshll.u32 %v460_v59, 16  ;;  %v462_v6 = vld [vmem:[#allocation2 + $0x20] sm:$0xf8] }
  0xa7   : > { %v482_v60 = vrot.slane %v480_v54, 3  ;;  %v485_v61 = vrot.slane %v483_v55, 4  ;;  %v505_v4 = vshrl.u32 %v461_v1, 16  ;;  %v508_v5 = vshll.u32 %v461_v1, 16  ;;  %v463_v9 = vld [vmem:[#allocation2 + $0x28] sm:$0xf] }
  0xa8   : > { %v494_v8 = vor.u32 %v493_v63, %v490_v62  ;;  %v514_v10 = vshrl.u32 %v462_v6, 16  ;;  %v517_v11 = vshll.u32 %v462_v6, 16  ;;  %v464_v12 = vld [vmem:[#allocation2 + $0x30] sm:$0xf8]  ;;  %v499_v13 = vrot.slane %v497_v2, 3 }
  0xa9   : > { %v486_v7 = vor.u32 %v485_v61, %v482_v60  ;;  %v502_v14 = vrot.slane %v500_v3, 4  ;;  %v507_v15 = vrot.slane %v505_v4, 3  ;;  %v510_v16 = vrot.slane %v508_v5, 4  ;;  %v465_v17 = vld [vmem:[#allocation2 + $0x38] sm:$0xf] }
  0xaa   : > { %v516_v19 = vrot.slane %v514_v10, 3  ;;  %v519_v20 = vrot.slane %v517_v11, 4  ;;  %v522_v21 = vshrl.u32 %v463_v9, 16  ;;  %v525_v24 = vshll.u32 %v463_v9, 16  ;;  %v466_v26 = vld [vmem:[#allocation2 + $0x40] sm:$0xf8] }
  0xab   : > { %v495_v18 = vsel %vm478_vm2, %v486_v7, %v494_v8  ;;  %v503_v22 = vor.u32 %v502_v14, %v499_v13  ;;  %v511_v23 = vor.u32 %v510_v16, %v507_v15  ;;  %v531_v25 = vshrl.u32 %v464_v12, 16  ;;  %v467_v31 = vld [vmem:[#allocation2 + $0x48] sm:$0xf]  ;;  %v468_v37 = vld [vmem:[#allocation2 + $0x50] sm:$0xf8] }
  0xac   : > { %7168 = vmatprep.mubr.msk.bf16.mxu0 %vm657_vm3, %v495_v18  ;;  %v520_v27 = vor.u32 %v519_v20, %v516_v19  ;;  %v524_v28 = vrot.slane %v522_v21, 3  ;;  %v534_v29 = vshll.u32 %v464_v12, 16  ;;  %v539_v30 = vshrl.u32 %v465_v17, 16  ;;  %v469_v46 = vld [vmem:[#allocation2 + $0x58] sm:$0xf] }
  0xad   : > { %v512_v33 = vsel %vm478_vm2, %v503_v22, %v511_v23  ;;  %v527_v34 = vrot.slane %v525_v24, 4  ;;  %v533_v35 = vrot.slane %v531_v25, 3  ;;  %v542_v36 = vshll.u32 %v465_v17, 16  ;;  %v470_v51 = vld [vmem:[#allocation2 + $0x60] sm:$0xf8] }
  0xae   : > { %7169 = vmatmul.mubr.msk.bf16.vlgmr.msra.gmra.mrb[0].mxu0 %vm657_vm3, %v512_v33  ;;  %v536_v38 = vrot.slane %v534_v29, 4  ;;  %v541_v39 = vrot.slane %v539_v30, 3  ;;  %v548_v40 = vshrl.u32 %v466_v26, 16  ;;  %v551_v41 = vshll.u32 %v466_v26, 16  ;;  %v471_v56 = vld [vmem:[#allocation2 + $0x68] sm:$0xf] }
  0xaf   : > { %7189 = vmatpush3.bf16.msra.mxu0 %v7774_v58  ;;  %v528_v42 = vor.u32 %v527_v34, %v524_v28  ;;  %v544_v43 = vrot.slane %v542_v36, 4  ;;  %v556_v44 = vshrl.u32 %v467_v31, 16  ;;  %v559_v45 = vshll.u32 %v467_v31, 16  ;;  %v472_v2 = vld [vmem:[#allocation2 + $0x70] sm:$0xf8] }
  0xb0   : > { %v537_v47 = vor.u32 %v536_v38, %v533_v35  ;;  %v550_v48 = vrot.slane %v548_v40, 3  ;;  %v553_v49 = vrot.slane %v551_v41, 4  ;;  %v565_v50 = vshrl.u32 %v468_v37, 16  ;;  %7210 = vmatprep.subr.bf16.mxu0 %v8325_v32  ;;  %v473_v3 = vld [vmem:[#allocation2 + $0x78] sm:$0xf] }
  0xb1   : > { %v529_v52 = vsel %vm478_vm2, %v520_v27, %v528_v42  ;;  %v545_v53 = vor.u32 %v544_v43, %v541_v39  ;;  %v558_v54 = vrot.slane %v556_v44, 3  ;;  %v561_v55 = vrot.slane %v559_v45, 4  ;;  %v474_v8 = vld [vmem:[#allocation2 + $0x80] sm:$0xf8]  ;;  %v475_v21 = vld [vmem:[#allocation2 + $0x88] sm:$0xf] }
  0xb2   : > { %7172 = vmatprep.mubr.msk.bf16.mxu0 %vm657_vm3, %v529_v52  ;;  %v554_v57 = vor.u32 %v553_v49, %v550_v48  ;;  %v567_v58 = vrot.slane %v565_v50, 3  ;;  %v568_v59 = vshll.u32 %v468_v37, 16  ;;  %v573_v60 = vshrl.u32 %v469_v46, 16  ;;  %v476_v35 = vld [vmem:[#allocation2 + $0x90] sm:$0xf8] }
  0xb3   : > { %v546_v61 = vsel %vm478_vm2, %v537_v47, %v545_v53  ;;  %v562_v62 = vor.u32 %v561_v55, %v558_v54  ;;  %v576_v63 = vshll.u32 %v469_v46, 16  ;;  %v582_v1 = vshrl.u32 %v470_v51, 16  ;;  %v477_v40 = vld [vmem:[#allocation2 + $0x98] sm:$0xf] }
  0xb4   : > { %v570_v4 = vrot.slane %v568_v59, 4  ;;  %v575_v5 = vrot.slane %v573_v60, 3  ;;  %v585_v6 = vshll.u32 %v470_v51, 16  ;;  %v590_v7 = vshrl.u32 %v471_v56, 16 }
  0xb5   : > { %v563_v9 = vsel %vm478_vm2, %v554_v57, %v562_v62  ;;  %v578_v10 = vrot.slane %v576_v63, 4  ;;  %v584_v11 = vrot.slane %v582_v1, 3  ;;  %v593_v12 = vshll.u32 %v471_v56, 16  ;;  %v822_v56 = vld [vmem:[#allocation2] sm:$0xf0] }
  0xb6   : > { %7173 = vmatmul.mubr.msk.bf16.gmra.mrb[4].mxu0 %vm657_vm3, %v546_v61  ;;  %v571_v13 = vor.u32 %v570_v4, %v567_v58  ;;  %v587_v14 = vrot.slane %v585_v6, 4  ;;  %v592_v15 = vrot.slane %v590_v7, 3  ;;  %v599_v16 = vshrl.u32 %v472_v2, 16  ;;  %v823_v57 = vld [vmem:[#allocation2 + $0x8] sm:$0xf] }
  0xb7   : > { %7176 = vmatprep.mubr.msk.bf16.mxu0 %vm657_vm3, %v563_v9  ;;  %v579_v17 = vor.u32 %v578_v10, %v575_v5  ;;  %v595_v18 = vrot.slane %v593_v12, 4  ;;  %v602_v19 = vshll.u32 %v472_v2, 16  ;;  %v607_v20 = vshrl.u32 %v473_v3, 16  ;;  %v824_v1 = vld [vmem:[#allocation2 + $0x10] sm:$0xf0] }
  0xb8   : > { %v588_v22 = vor.u32 %v587_v14, %v584_v11  ;;  %v610_v23 = vshll.u32 %v473_v3, 16  ;;  %v616_v24 = vshrl.u32 %v474_v8, 16  ;;  %v601_v26 = vrot.slane %v599_v16, 3  ;;  %v825_v2 = vld [vmem:[#allocation2 + $0x18] sm:$0xf] }
  0xb9   : > { %v596_v25 = vor.u32 %v595_v18, %v592_v15  ;;  %v604_v27 = vrot.slane %v602_v19, 4  ;;  %v619_v28 = vshll.u32 %v474_v8, 16  ;;  %v624_v29 = vshrl.u32 %v475_v21, 16  ;;  %v826_v3 = vld [vmem:[#allocation2 + $0x20] sm:$0xf0] }
  0xba   : > { %v580_v30 = vsel %vm478_vm2, %v571_v13, %v579_v17  ;;  %v609_v31 = vrot.slane %v607_v20, 3  ;;  %v612_v33 = vrot.slane %v610_v23, 4  ;;  %v627_v34 = vshll.u32 %v475_v21, 16  ;;  %v827_v4 = vld [vmem:[#allocation2 + $0x28] sm:$0xf]  ;;  %v8350_v13 = vld [vmem:[#allocation8 + $0x18] sm:$0xff]  }
  0xbb   : > { %v597_v36 = vsel %vm478_vm2, %v588_v22, %v596_v25  ;;  %v618_v37 = vrot.slane %v616_v24, 3  ;;  %v621_v38 = vrot.slane %v619_v28, 4  ;;  %v626_v39 = vrot.slane %v624_v29, 3  ;;  %v828_v11 = vld [vmem:[#allocation2 + $0x30] sm:$0xf0] }
  0xbc   : > { %v629_v41 = vrot.slane %v627_v34, 4  ;;  %v605_v42 = vor.u32 %v604_v27, %v601_v26  ;;  %v633_v43 = vshrl.u32 %v476_v35, 16  ;;  %v613_v44 = vor.u32 %v612_v33, %v609_v31  ;;  %v829_v12 = vld [vmem:[#allocation2 + $0x38] sm:$0xf]  ;;  %v830_v14 = vld [vmem:[#allocation2 + $0x40] sm:$0xf0] }
  0xbd   : > { %v636_v45 = vshll.u32 %v476_v35, 16  ;;  %v641_v46 = vshrl.u32 %v477_v40, 16  ;;  %v644_v47 = vshll.u32 %v477_v40, 16  ;;  %v622_v48 = vor.u32 %v621_v38, %v618_v37  ;;  %v831_v15 = vld [vmem:[#allocation2 + $0x48] sm:$0xf] }
  0xbe   : > { %7177 = vmatmul.mubr.msk.bf16.gmra.mrb[8].mxu0 %vm657_vm3, %v580_v30  ;;  %v630_v49 = vor.u32 %v629_v41, %v626_v39  ;;  %v635_v50 = vrot.slane %v633_v43, 3  ;;  %v614_v51 = vsel %vm478_vm2, %v605_v42, %v613_v44  ;;  %v863_v60 = vrot.slane %v822_v56, 4  ;;  %v832_v22 = vld [vmem:[#allocation2 + $0x50] sm:$0xf0]  ;;  %v833_v23 = vld [vmem:[#allocation2 + $0x58] sm:$0xf] }
  0xbf   : > { %7180 = vmatprep.mubr.msk.bf16.mxu0 %vm657_vm3, %v597_v36  ;;  %v638_v52 = vrot.slane %v636_v45, 4  ;;  %v643_v53 = vrot.slane %v641_v46, 3  ;;  %v646_v54 = vrot.slane %v644_v47, 4  ;;  %v864_v61 = vrot.slane %v823_v57, 4  ;;  %v834_v24 = vld [vmem:[#allocation2 + $0x60] sm:$0xf0] }
  0xc0   : > { %v631_v55 = vsel %vm478_vm2, %v622_v48, %v630_v49  ;;  %vm862_vm4 = vcmask 1043456   ;;  %v866_v5 = vrot.slane %v824_v1, 4  ;;  %v867_v6 = vrot.slane %v825_v2, 4  ;;  %v835_v25 = vld [vmem:[#allocation2 + $0x68] sm:$0xf] }
  0xc1   : > { %v639_v58 = vor.u32 %v638_v52, %v635_v50  ;;  %v647_v59 = vor.u32 %v646_v54, %v643_v53  ;;  %v865_v63 = vsel %vm862_vm4, %v863_v60, %v864_v61  ;;  %v869_v7 = vrot.slane %v826_v3, 4  ;;  %v836_v31 = vld [vmem:[#allocation2 + $0x70] sm:$0xf0]  ;;  %v837_v33 = vld [vmem:[#allocation2 + $0x78] sm:$0xf] }
  0xc2   : > { %v870_v8 = vrot.slane %v827_v4, 4  ;;  %v868_v9 = vsel %vm862_vm4, %v866_v5, %v867_v6  ;;  %v872_v16 = vrot.slane %v828_v11, 4  ;;  %v873_v17 = vrot.slane %v829_v12, 4  ;;  %v1105_v34 = vld [vmem:[#allocation2] sm:$0xf0] }
  0xc3   : > { %v648_v62 = vsel %vm478_vm2, %v639_v58, %v647_v59  ;;  %v875_v18 = vrot.slane %v830_v14, 4  ;;  %v876_v19 = vrot.slane %v831_v15, 4  ;;  %v879_v26 = vrot.slane %v833_v23, 4  ;;  %v838_v35 = vld [vmem:[#allocation2 + $0x80] sm:$0xf0] }
  0xc4   : > { %v871_v10 = vsel %vm862_vm4, %v869_v7, %v870_v8  ;;  %v874_v20 = vsel %vm862_vm4, %v872_v16, %v873_v17  ;;  %v881_v27 = vrot.slane %v834_v24, 4  ;;  %v882_v28 = vrot.slane %v835_v25, 4  ;;  %v839_v36 = vld [vmem:[#allocation2 + $0x88] sm:$0xf]  ;;  %v840_v46 = vld [vmem:[#allocation2 + $0x90] sm:$0xf0] }
  0xc5   : > { %v877_v21 = vsel %vm862_vm4, %v875_v18, %v876_v19  ;;  %v1106_v37 = vld [vmem:[#allocation2 + $0x8] sm:$0x1f]  ;;  %v884_v38 = vrot.slane %v836_v31, 4  ;;  %v885_v39 = vrot.slane %v837_v33, 4  ;;  %v1127_v40 = vshrl.u32 %v1105_v34, 16 }
  0xc6   : > { %7181 = vmatmul.mubr.msk.bf16.gmra.mrb[12].mxu0 %vm657_vm3, %v614_v51  ;;  %v883_v30 = vsel %vm862_vm4, %v881_v27, %v882_v28  ;;  %v1130_v41 = vshll.u32 %v1105_v34, 16  ;;  %v887_v42 = vrot.slane %v838_v35, 4  ;;  %v888_v43 = vrot.slane %v839_v36, 4  ;;  %v1107_v50 = vld [vmem:[#allocation2 + $0x10] sm:$0xf0] }
  0xc7   : > { %7184 = vmatprep.mubr.msk.bf16.mxu0 %vm657_vm3, %v631_v55  ;;  %v1135_v44 = vshrl.u32 %v1106_v37, 16  ;;  %v1138_v45 = vshll.u32 %v1106_v37, 16  ;;  %v886_v47 = vsel %vm862_vm4, %v884_v38, %v885_v39  ;;  %v1129_v48 = vrot.slane %v1127_v40, 4  ;;  %v1108_v51 = vld [vmem:[#allocation2 + $0x18] sm:$0x1f] }
  0xc8   : > { %v1132_v49 = vrot.slane %v1130_v41, 5  ;;  %v889_v52 = vsel %vm862_vm4, %v887_v42, %v888_v43  ;;  %v841_v53 = vld [vmem:[#allocation2 + $0x98] sm:$0xf]  ;;  %v1109_v56 = vld [vmem:[#allocation2 + $0x20] sm:$0xf0]  ;;  %v1144_v58 = vshrl.u32 %v1107_v50, 16 }
  0xc9   : > { %v1137_v54 = vrot.slane %v1135_v44, 4  ;;  %v1140_v55 = vrot.slane %v1138_v45, 5  ;;  %v1110_v57 = vld [vmem:[#allocation2 + $0x28] sm:$0x1f]  ;;  %v1147_v59 = vshll.u32 %v1107_v50, 16  ;;  %v1152_v60 = vshrl.u32 %v1108_v51, 16 }
  0xca   : > { %v1155_v61 = vshll.u32 %v1108_v51, 16  ;;  %v1133_v1 = vor.u32 %v1132_v49, %v1129_v48  ;;  %v1161_v2 = vshrl.u32 %v1109_v56, 16  ;;  %v1164_v4 = vshll.u32 %v1109_v56, 16  ;;  %v1111_v14 = vld [vmem:[#allocation2 + $0x30] sm:$0xf0] }
  0xcb   : > { %v1141_v3 = vor.u32 %v1140_v55, %v1137_v54  ;;  %v1169_v5 = vshrl.u32 %v1110_v57, 16  ;;  %v1172_v6 = vshll.u32 %v1110_v57, 16  ;;  %vm1125_vm5 = vsmask.f32 3328  ;;  %v1112_v15 = vld [vmem:[#allocation2 + $0x38] sm:$0x1f] }
  0xcc   : > { %v1146_v7 = vrot.slane %v1144_v58, 4  ;;  %v1149_v8 = vrot.slane %v1147_v59, 5  ;;  %v1163_v12 = vrot.slane %v1161_v2, 4  ;;  %v1166_v17 = vrot.slane %v1164_v4, 5  ;;  %v1115_v37 = vld [vmem:[#allocation2 + $0x50] sm:$0xf0] }
  0xcd   : > { %v1142_v16 = vsel %vm1125_vm5, %v1133_v1, %v1141_v3  ;;  %v1171_v18 = vrot.slane %v1169_v5, 4  ;;  %v1174_v19 = vrot.slane %v1172_v6, 5  ;;  %v1178_v24 = vshrl.u32 %v1111_v14, 16  ;;  %v1116_v42 = vld [vmem:[#allocation2 + $0x58] sm:$0x1f] }
  0xce   : > { %7185 = vmatmul.mubr.msk.bf16.gmra.mrb[16].mxu0 %vm657_vm3, %v648_v62  ;;  %v890_v62 = vrot.slane %v840_v46, 4  ;;  %v1181_v25 = vshll.u32 %v1111_v14, 16  ;;  %v1117_v46 = vld [vmem:[#allocation2 + $0x60] sm:$0xf0]  ;;  %v1212_v48 = vshrl.u32 %v1115_v37, 16  ;;  %v1215_v49 = vshll.u32 %v1115_v37, 16 }
  0xcf   : > { %7190 = vmatprep.mubr.msk.bf16.mxu0 %vm657_vm3, %v865_v63  ;;  %v891_v63 = vrot.slane %v841_v53, 4  ;;  %v1180_v35 = vrot.slane %v1178_v24, 4  ;;  %v1118_v50 = vld [vmem:[#allocation2 + $0x68] sm:$0x1f]  ;;  %v1220_v51 = vshrl.u32 %v1116_v42, 16  ;;  %v1229_v56 = vshrl.u32 %v1117_v46, 16 }
  0xd0   : > { %v1183_v36 = vrot.slane %v1181_v25, 5  ;;  %v1232_v58 = vshll.u32 %v1117_v46, 16  ;;  %v1237_v59 = vshrl.u32 %v1118_v50, 16  ;;  %v1120_v4 = vld [vmem:[#allocation2 + $0x78] sm:$0x1f]  ;;  %vm801_vm6 = vcmask 261120  }
  0xd1   : > { %v892_v11 = vsel %vm862_vm4, %v890_v62, %v891_v63  ;;  %v1217_v62 = vrot.slane %v1215_v49, 5  ;;  %v1222_v63 = vrot.slane %v1220_v51, 4  ;;  %v1231_v3 = vrot.slane %v1229_v56, 4  ;;  %v1510_v37 = vld [vmem:[#allocation2 + $0x18] sm:$0xf] }
  0xd2   : > { %v1184_v53 = vor.u32 %v1183_v36, %v1180_v35  ;;  %v1234_v6 = vrot.slane %v1232_v58, 5  ;;  %v1509_v36 = vld [vmem:[#allocation2 + $0x10] sm:$0xf8]  ;;  %v1538_v49 = vshrl.u32 %v1510_v37, 16  ;;  %v1511_v51 = vld [vmem:[#allocation2 + $0x20] sm:$0xf8] }
  0xd3   : > { %v1512_v56 = vld [vmem:[#allocation2 + $0x28] sm:$0xf]  ;;  %vm3758_vm7 = vcmask 257024   ;;  %vm3769_vm8 = vcmask 261124  }
  0xd4   : > { %3759 = vst.msk [vmem:[#allocation3] sm:$0xf] %vm3758_vm7, %v7965_v0  ;;  %3760 = vst.msk [vmem:[#allocation3 + $0x10] sm:$0xf] %vm3758_vm7, %v7965_v0 }
  0xd5   : > { %3761 = vst.msk [vmem:[#allocation3 + $0x20] sm:$0xf] %vm3758_vm7, %v7965_v0  ;;  %3762 = vst.msk [vmem:[#allocation3 + $0x30] sm:$0xf] %vm3758_vm7, %v7965_v0 }
  0xd6   : > { %7191 = vmatmul.mubr.msk.bf16.vlgmr.msra.gmra.mrb[20].mxu0 %vm657_vm3, %v868_v9  ;;  %v1154_v9 = vrot.slane %v1152_v60, 4  ;;  %v1240_v60 = vshll.u32 %v1118_v50, 16  ;;  %v1541_v50 = vshll.u32 %v1510_v37, 16  ;;  %3763 = vst.msk [vmem:[#allocation3 + $0x40] sm:$0xf] %vm3758_vm7, %v7965_v0 }
  0xd7   : > { %7211 = vmatpush3.bf16.msra.mxu0 %v8325_v32  ;;  %7194 = vmatprep.mubr.msk.bf16.mxu0 %vm657_vm3, %v871_v10  ;;  %v878_v32 = vrot.slane %v832_v22, 4  ;;  %v1157_v10 = vrot.slane %v1155_v61, 5  ;;  %v1150_v22 = vor.u32 %v1149_v8, %v1146_v7  ;;  %v1214_v61 = vrot.slane %v1212_v48, 4  ;;  %3764 = vst.msk [vmem:[#allocation3 + $0x50] sm:$0xf] %vm3758_vm7, %v7965_v0 }
  0xd8   : > { %7232 = vmatprep.subr.bf16.mxu0 %v8350_v13  ;;  %v1239_v7 = vrot.slane %v1237_v59, 4  ;;  %v1242_v8 = vrot.slane %v1240_v60, 5  ;;  %v1533_v48 = vshll.u32 %v1509_v36, 16  ;;  %v1513_v59 = vld [vmem:[#allocation2 + $0x30] sm:$0xf8] }
  0xd9   : > { %v880_v29 = vsel %vm862_vm4, %v878_v32, %v879_v26  ;;  %v1158_v23 = vor.u32 %v1157_v10, %v1154_v9  ;;  %v1186_v32 = vshrl.u32 %v1112_v15, 16  ;;  %v1189_v26 = vshll.u32 %v1112_v15, 16  ;;  %v1121_v9 = vld [vmem:[#allocation2 + $0x80] sm:$0xf0]  ;;  %v1122_v10 = vld [vmem:[#allocation2 + $0x88] sm:$0x1f] }
  0xda   : > { %3765 = vst.msk [vmem:[#allocation3 + $0x60] sm:$0xf] %vm3758_vm7, %v7965_v0  ;;  %3766 = vst.msk [vmem:[#allocation3 + $0x70] sm:$0xf] %vm3758_vm7, %v7965_v0 }
  0xdb   : > { %v1159_v34 = vsel %vm1125_vm5, %v1150_v22, %v1158_v23  ;;  %v1188_v38 = vrot.slane %v1186_v32, 4  ;;  %v1191_v39 = vrot.slane %v1189_v26, 5  ;;  %v1271_v22 = vshrl.u32 %v1122_v10, 16  ;;  %v1123_v26 = vld [vmem:[#allocation2 + $0x90] sm:$0xf0] }
  0xdc   : > { %v1274_v23 = vshll.u32 %v1122_v10, 16  ;;  %3767 = vst.msk [vmem:[#allocation3 + $0x80] sm:$0xf] %vm3758_vm7, %v7965_v0  ;;  %3768 = vst.msk [vmem:[#allocation3 + $0x90] sm:$0xf] %vm3758_vm7, %v7965_v0 }
  0xdd   : > { %v1192_v54 = vor.u32 %v1191_v39, %v1188_v38  ;;  %v1280_v38 = vshrl.u32 %v1123_v26, 16  ;;  %v1283_v39 = vshll.u32 %v1123_v26, 16  ;;  %v1518_v26 = vld [vmem:[#allocation2 + $0x58] sm:$0xf]  ;;  %3770 = vst.msk [vmem:[#allocation3 + $0x8] sm:$0xf0] %vm3769_vm8, %v7965_v0 }
  0xde   : > { %7195 = vmatmul.mubr.msk.bf16.gmra.mrb[24].mxu0 %vm657_vm3, %v874_v20  ;;  %v1113_v20 = vld [vmem:[#allocation2 + $0x40] sm:$0xf0]  ;;  %v1276_v35 = vrot.slane %v1274_v23, 5  ;;  %3771 = vst.msk [vmem:[#allocation3 + $0x18] sm:$0xf0] %vm3769_vm8, %v7965_v0 }
  0xdf   : > { %7198 = vmatprep.mubr.msk.bf16.mxu0 %vm657_vm3, %v877_v21  ;;  %v1114_v21 = vld [vmem:[#allocation2 + $0x48] sm:$0x1f]  ;;  %v1195_v27 = vshrl.u32 %v1113_v20, 16  ;;  %v1198_v28 = vshll.u32 %v1113_v20, 16  ;;  %v1193_v2 = vsel %vm1125_vm5, %v1184_v53, %v1192_v54  ;;  %v1235_v20 = vor.u32 %v1234_v6, %v1231_v3  ;;  %3772 = vst.msk [vmem:[#allocation3 + $0x28] sm:$0xf0] %vm3769_vm8, %v7965_v0 }
  0xe0   : > { %v1203_v31 = vshrl.u32 %v1114_v21, 16  ;;  %v1206_v33 = vshll.u32 %v1114_v21, 16  ;;  %v1243_v21 = vor.u32 %v1242_v8, %v1239_v7  ;;  %v1285_v53 = vrot.slane %v1283_v39, 5  ;;  %3773 = vst.msk [vmem:[#allocation3 + $0x38] sm:$0xf0] %vm3769_vm8, %v7965_v0 }
  0xe1   : > { %v1197_v40 = vrot.slane %v1195_v27, 4  ;;  %v1200_v41 = vrot.slane %v1198_v28, 5  ;;  %v1550_v3 = vshll.u32 %v1511_v51, 16  ;;  %v1564_v7 = vshrl.u32 %v1513_v59, 16  ;;  %3774 = vst.msk [vmem:[#allocation3 + $0x48] sm:$0xf0] %vm3769_vm8, %v7965_v0 }
  0xe2   : > { %v1205_v44 = vrot.slane %v1203_v31, 4  ;;  %v1208_v45 = vrot.slane %v1206_v33, 5  ;;  %v1124_v31 = vld [vmem:[#allocation2 + $0x98] sm:$0x1f]  ;;  %v1244_v33 = vsel %vm1125_vm5, %v1235_v20, %v1243_v21  ;;  %v1567_v8 = vshll.u32 %v1513_v59, 16 }
  0xe3   : > { %v1201_v55 = vor.u32 %v1200_v41, %v1197_v40  ;;  %v1288_v40 = vshrl.u32 %v1124_v31, 16  ;;  %v1291_v41 = vshll.u32 %v1124_v31, 16  ;;  %v1516_v20 = vld [vmem:[#allocation2 + $0x48] sm:$0xf]  ;;  %v1566_v21 = vrot.slane %v1564_v7, 3 }
  0xe4   : > { %v1209_v57 = vor.u32 %v1208_v45, %v1205_v44  ;;  %v1530_v45 = vshrl.u32 %v1509_v36, 16  ;;  %v1589_v31 = vshrl.u32 %v1516_v20, 16  ;;  %v1609_v39 = vshll.u32 %v1518_v26, 16  ;;  %3775 = vst.msk [vmem:[#allocation3 + $0x58] sm:$0xf0] %vm3769_vm8, %v7965_v0 }
  0xe5   : > { %v1290_v54 = vrot.slane %v1288_v40, 4  ;;  %v1519_v40 = vld [vmem:[#allocation2 + $0x60] sm:$0xf8]  ;;  %3776 = vst.msk [vmem:[#allocation3 + $0x68] sm:$0xf0] %vm3769_vm8, %v7965_v0 }
  0xe6   : > { %7199 = vmatmul.mubr.msk.bf16.gmra.mrb[28].mxu0 %vm657_vm3, %v880_v29  ;;  %v1167_v29 = vor.u32 %v1166_v17, %v1163_v12  ;;  %v1210_v5 = vsel %vm1125_vm5, %v1201_v55, %v1209_v57  ;;  %v1257_v17 = vshll.u32 %v1120_v4, 16  ;;  %v1293_v55 = vrot.slane %v1291_v41, 5  ;;  %3777 = vst.msk [vmem:[#allocation3 + $0x78] sm:$0xf0] %vm3769_vm8, %v7965_v0  ;;  %3778 = vst.msk [vmem:[#allocation3 + $0x88] sm:$0xf0] %vm3769_vm8, %v7965_v0 }
  0xe7   : > { %7202 = vmatprep.mubr.msk.bf16.mxu0 %vm657_vm3, %v883_v30  ;;  %v1175_v30 = vor.u32 %v1174_v19, %v1171_v18  ;;  %v1263_v18 = vshrl.u32 %v1121_v9, 16  ;;  %v1266_v19 = vshll.u32 %v1121_v9, 16  ;;  %v1532_v58 = vrot.slane %v1530_v45, 3  ;;  %3779 = vst.msk [vmem:[#allocation3 + $0x98] sm:$0xf0] %vm3769_vm8, %v7965_v0 }
  0xe8   : > { %v1259_v28 = vrot.slane %v1257_v17, 5  ;;  %v1294_v6 = vor.u32 %v1293_v55, %v1290_v54  ;;  %v1591_v45 = vrot.slane %v1589_v31, 3  ;;  %v1521_v54 = vld [vmem:[#allocation2 + $0x70] sm:$0xf8]  ;;  %v8398_v55 = vld [vmem:[#allocation8 + $0x28] sm:$0xff]  }
  0xe9   : > { %v1176_v43 = vsel %vm1125_vm5, %v1167_v29, %v1175_v30  ;;  %v1265_v29 = vrot.slane %v1263_v18, 4  ;;  %v1268_v30 = vrot.slane %v1266_v19, 5  ;;  %v1515_v19 = vld [vmem:[#allocation2 + $0x40] sm:$0xf8] }
  0xeb   : > { %v1269_v44 = vor.u32 %v1268_v30, %v1265_v29  ;;  %v1581_v29 = vshrl.u32 %v1515_v19, 16  ;;  %v1584_v30 = vshll.u32 %v1515_v19, 16  ;;  %v1524_v19 = vld [vmem:[#allocation2 + $0x88] sm:$0xf] }
  0xec   : > { %v1657_v31 = vshrl.u32 %v1524_v19, 16 }
  0xee   : > { %7203 = vmatmul.mubr.msk.bf16.gmra.mrb[32].mxu0 %vm657_vm3, %v886_v47  ;;  %v8374_v47 = vld [vmem:[#allocation8 + $0x20] sm:$0xff]  }
  0xef   : > { %7206 = vmatprep.mubr.msk.bf16.mxu0 %vm657_vm3, %v889_v52  ;;  %v1223_v52 = vshll.u32 %v1116_v42, 16 }
  0xf1   : > { %v1225_v1 = vrot.slane %v1223_v52, 5  ;;  %v1282_v52 = vrot.slane %v1280_v38, 4  ;;  %v1606_v38 = vshrl.u32 %v1518_v26, 16 }
  0xf3   : > { %v1226_v12 = vor.u32 %v1225_v1, %v1222_v63  ;;  %v1543_v63 = vrot.slane %v1541_v50, 4  ;;  %v1514_v1 = vld [vmem:[#allocation2 + $0x38] sm:$0xf] }
  0xf4   : > { %v1572_v9 = vshrl.u32 %v1514_v1, 16  ;;  %v1575_v10 = vshll.u32 %v1514_v1, 16  ;;  %v1635_v1 = vshll.u32 %v1521_v54, 16 }
  0xf6   : > { %7207 = vmatmul.mubr.msk.bf16.gmra.mrb[36].mxu0 %vm657_vm3, %v892_v11  ;;  %v1218_v11 = vor.u32 %v1217_v62, %v1214_v61  ;;  %v1535_v61 = vrot.slane %v1533_v48, 4  ;;  %v1540_v62 = vrot.slane %v1538_v49, 3  ;;  %v1574_v23 = vrot.slane %v1572_v9, 3  ;;  %v7781_v49 = vld [vmem:[#allocation8 + $0x38] sm:$0xff]   ;;  %v2997_v9 = vld [vmem:[#allocation2 + $0x20] sm:$0xf0] }
  0xf7   : > { %7212 = vmatprep.mubr.msk.bf16.mxu0 %vm657_vm3, %v1142_v16  ;;  %v1254_v16 = vshrl.u32 %v1120_v4, 16  ;;  %v1558_v4 = vshll.u32 %v1512_v56, 16  ;;  %7320 = vmatprep.subr.bf16.mxu1 %v7781_v49 }
  0xf8   : > { %v1227_v24 = vsel %vm1125_vm5, %v1218_v11, %v1226_v12  ;;  %v1536_v11 = vor.u32 %v1535_v61, %v1532_v58  ;;  %v1544_v12 = vor.u32 %v1543_v63, %v1540_v62  ;;  %7321 = vmatpush3.bf16.msra.mxu1 %v7781_v49  ;;  %v1632_v63 = vshrl.u32 %v1521_v54, 16 }
  0xf9   : > { %v1256_v27 = vrot.slane %v1254_v16, 4  ;;  %v1560_v17 = vrot.slane %v1558_v4, 4  ;;  %v1659_v49 = vrot.slane %v1657_v31, 3  ;;  %v3012_v31 = vld [vmem:[#allocation2 + $0x98] sm:$0xf] }
  0xfe   : > { %7213 = vmatmul.mubr.msk.bf16.vlgmr.msra.gmra.mrb[40].mxu0 %vm657_vm3, %v1159_v34  ;;  %v1273_v34 = vrot.slane %v1271_v22, 4  ;;  %v1569_v22 = vrot.slane %v1567_v8, 4 }
  0xff   : > { %7233 = vmatpush3.bf16.msra.mxu0 %v8350_v13  ;;  %7216 = vmatprep.mubr.msk.bf16.mxu0 %vm657_vm3, %v1176_v43  ;;  %v1119_v13 = vld [vmem:[#allocation2 + $0x70] sm:$0xf0]  ;;  %v1260_v43 = vor.u32 %v1259_v28, %v1256_v27 }
 0x100   : > { %7254 = vmatprep.subr.bf16.mxu0 %v8374_v47  ;;  %v1246_v14 = vshrl.u32 %v1119_v13, 16  ;;  %v1249_v15 = vshll.u32 %v1119_v13, 16  ;;  %v1277_v46 = vor.u32 %v1276_v35, %v1273_v34  ;;  %v1555_v13 = vshrl.u32 %v1512_v56, 16 }
 0x101   : > { %v1570_v35 = vor.u32 %v1569_v22, %v1566_v21  ;;  %v1611_v56 = vrot.slane %v1609_v39, 4  ;;  %v3001_v39 = vld [vmem:[#allocation2 + $0x40] sm:$0xf0] }
 0x102   : > { %v1248_v25 = vrot.slane %v1246_v14, 4  ;;  %v1251_v32 = vrot.slane %v1249_v15, 5  ;;  %v1278_v60 = vsel %vm1125_vm5, %v1269_v44, %v1277_v46  ;;  %v1552_v15 = vrot.slane %v1550_v3, 4 }
 0x103   : > { %v1557_v16 = vrot.slane %v1555_v13, 3  ;;  %v1586_v44 = vrot.slane %v1584_v30, 4 }
 0x104   : > { %v1252_v42 = vor.u32 %v1251_v32, %v1248_v25  ;;  %v1517_v25 = vld [vmem:[#allocation2 + $0x50] sm:$0xf8]  ;;  %v1545_v32 = vsel %vm478_vm2, %v1536_v11, %v1544_v12  ;;  %v2998_v11 = vld [vmem:[#allocation2 + $0x28] sm:$0xf]  ;;  %v1634_v12 = vrot.slane %v1632_v63, 3 }
 0x105   : > { %v1561_v28 = vor.u32 %v1560_v17, %v1557_v16  ;;  %v1598_v34 = vshrl.u32 %v1517_v25, 16  ;;  %v1601_v37 = vshll.u32 %v1517_v25, 16  ;;  %v3000_v16 = vld [vmem:[#allocation2 + $0x38] sm:$0xf]  ;;  %v3038_v25 = vrot.slane %v2998_v11, 4 }
 0x106   : > { %7217 = vmatmul.mubr.msk.bf16.gmra.mrb[44].mxu0 %vm657_vm3, %v1193_v2  ;;  %v1261_v57 = vsel %vm1125_vm5, %v1252_v42, %v1260_v43  ;;  %v1547_v2 = vshrl.u32 %v1511_v51, 16  ;;  %v1583_v42 = vrot.slane %v1581_v29, 3  ;;  %v1520_v43 = vld [vmem:[#allocation2 + $0x68] sm:$0xf]  ;;  %v3041_v29 = vrot.slane %v3000_v16, 4 }
 0x107   : > { %7220 = vmatprep.mubr.msk.bf16.mxu0 %vm657_vm3, %v1210_v5  ;;  %v1286_v5 = vor.u32 %v1285_v53, %v1282_v52  ;;  %v1600_v48 = vrot.slane %v1598_v34, 3  ;;  %v1603_v51 = vrot.slane %v1601_v37, 4  ;;  %v1608_v52 = vrot.slane %v1606_v38, 3  ;;  %v3007_v11 = vld [vmem:[#allocation2 + $0x70] sm:$0xf0] }
 0x108   : > { %v1549_v14 = vrot.slane %v1547_v2, 3  ;;  %v1615_v53 = vshrl.u32 %v1519_v40, 16  ;;  %v1623_v58 = vshrl.u32 %v1520_v43, 16  ;;  %v1626_v59 = vshll.u32 %v1520_v43, 16 }
 0x109   : > { %v1295_v18 = vsel %vm1125_vm5, %v1286_v5, %v1294_v6  ;;  %v1587_v61 = vor.u32 %v1586_v44, %v1583_v42  ;;  %v1604_v2 = vor.u32 %v1603_v51, %v1600_v48  ;;  %v1612_v5 = vor.u32 %v1611_v56, %v1608_v52  ;;  %v3002_v42 = vld [vmem:[#allocation2 + $0x48] sm:$0xf]  ;;  %v1527_v56 = vld [vmem:[#allocation2 + $0xa0] sm:$0xf8] }
 0x10a   : > { %v1553_v27 = vor.u32 %v1552_v15, %v1549_v14  ;;  %v1617_v3 = vrot.slane %v1615_v53, 3  ;;  %v1625_v7 = vrot.slane %v1623_v58, 3  ;;  %v1628_v8 = vrot.slane %v1626_v59, 4  ;;  %v2999_v15 = vld [vmem:[#allocation2 + $0x30] sm:$0xf0] }
 0x10b   : > { %v1637_v14 = vrot.slane %v1635_v1, 4  ;;  %v1613_v21 = vsel %vm478_vm2, %v1604_v2, %v1612_v5  ;;  %v3043_v51 = vrot.slane %v3001_v39, 4  ;;  %v3005_v5 = vld [vmem:[#allocation2 + $0x60] sm:$0xf0] }
 0x10c   : > { %v1562_v41 = vsel %vm478_vm2, %v1553_v27, %v1561_v28  ;;  %v1526_v27 = vld [vmem:[#allocation2 + $0x98] sm:$0xf]  ;;  %v3040_v28 = vrot.slane %v2999_v15, 4 }
 0x10d   : > { %v1638_v30 = vor.u32 %v1637_v14, %v1634_v12  ;;  %v3008_v12 = vld [vmem:[#allocation2 + $0x78] sm:$0xf]  ;;  %v3049_v14 = vrot.slane %v3005_v5, 4 }
 0x10e   : > { %7221 = vmatmul.mubr.msk.bf16.gmra.mrb[48].mxu0 %vm657_vm3, %v1227_v24  ;;  %v1577_v24 = vrot.slane %v1575_v10, 4  ;;  %v1523_v10 = vld [vmem:[#allocation2 + $0x80] sm:$0xf8]  ;;  %v3042_v38 = vsel %vm862_vm4, %v3040_v28, %v3041_v29 }
 0x10f   : > { %7224 = vmatprep.mubr.msk.bf16.mxu0 %vm657_vm3, %v1244_v33  ;;  %v1592_v33 = vshll.u32 %v1516_v20, 16  ;;  %v3037_v20 = vrot.slane %v2997_v9, 4  ;;  %v1652_v26 = vshll.u32 %v1523_v10, 16 }
 0x110   : > { %v1578_v36 = vor.u32 %v1577_v24, %v1574_v23  ;;  %v1629_v23 = vor.u32 %v1628_v8, %v1625_v7  ;;  %v1525_v24 = vld [vmem:[#allocation2 + $0x90] sm:$0xf8]  ;;  %v3006_v8 = vld [vmem:[#allocation2 + $0x68] sm:$0xf] }
 0x111   : > { %v1594_v46 = vrot.slane %v1592_v33, 4  ;;  %v1660_v33 = vshll.u32 %v1524_v19, 16  ;;  %v3039_v34 = vsel %vm862_vm4, %v3037_v20, %v3038_v25  ;;  %v1669_v37 = vshll.u32 %v1525_v24, 16  ;;  %v1912_v25 = vld [vmem:[#allocation2 + $0x18] sm:$0xf] }
 0x112   : > { %v1579_v50 = vsel %vm478_vm2, %v1570_v35, %v1578_v36  ;;  %v1666_v36 = vshrl.u32 %v1525_v24, 16  ;;  %7322 = vmatprep.mubr.msk.bf16.mxu1 %vm657_vm3, %v3039_v34  ;;  %v1654_v44 = vrot.slane %v1652_v26, 4  ;;  %v3052_v20 = vrot.slane %v3007_v11, 4  ;;  %v1911_v24 = vld [vmem:[#allocation2 + $0x10] sm:$0xf0] }
 0x113   : > { %v1595_v62 = vor.u32 %v1594_v46, %v1591_v45  ;;  %7323 = vmatmul.mubr.msk.bf16.vlgmr.msra.gmra.mrb[0].mxu1 %vm657_vm3, %v3042_v38  ;;  %v3003_v45 = vld [vmem:[#allocation2 + $0x50] sm:$0xf0]  ;;  %v3004_v46 = vld [vmem:[#allocation2 + $0x58] sm:$0xf]  ;;  %v1671_v54 = vrot.slane %v1669_v37, 4  ;;  %v1952_v34 = vrot.slane %v1912_v25, 4 }
 0x114   : > { %v1668_v53 = vrot.slane %v1666_v36, 3  ;;  %v3009_v26 = vld [vmem:[#allocation2 + $0x80] sm:$0xf0]  ;;  %v3059_v38 = vrot.slane %v3012_v31, 4  ;;  %v2193_v25 = vld [vmem:[#allocation2 + $0x10] sm:$0xf0] }
 0x115   : > { %v2217_v31 = vshll.u32 %v2193_v25, 16 }
 0x116   : > { %7225 = vmatmul.mubr.msk.bf16.gmra.mrb[52].mxu0 %vm657_vm3, %v1261_v57  ;;  %v1618_v57 = vshll.u32 %v1519_v40, 16  ;;  %v1674_v40 = vshrl.u32 %v1526_v27, 16  ;;  %v1672_v9 = vor.u32 %v1671_v54, %v1668_v53 }
 0x117   : > { %7228 = vmatprep.mubr.msk.bf16.mxu0 %vm657_vm3, %v1278_v60  ;;  %v1522_v60 = vld [vmem:[#allocation2 + $0x78] sm:$0xf] }
 0x118   : > { %v1640_v13 = vshrl.u32 %v1522_v60, 16  ;;  %v1643_v4 = vshll.u32 %v1522_v60, 16  ;;  %v1620_v6 = vrot.slane %v1618_v57, 4  ;;  %v3044_v57 = vrot.slane %v3002_v42, 4  ;;  %v1528_v60 = vld [vmem:[#allocation2 + $0xa8] sm:$0xf] }
 0x119   : > { %v1676_v58 = vrot.slane %v1674_v40, 3  ;;  %v1694_v7 = vshll.u32 %v1528_v60, 16  ;;  %v1913_v42 = vld [vmem:[#allocation2 + $0x20] sm:$0xf0] }
 0x11a   : > { %v1642_v17 = vrot.slane %v1640_v13, 3  ;;  %v1621_v22 = vor.u32 %v1620_v6, %v1617_v3  ;;  %v3045_v1 = vsel %vm862_vm4, %v3043_v51, %v3044_v57  ;;  %v1683_v3 = vshrl.u32 %v1527_v56, 16  ;;  %v3016_v51 = vld [vmem:[#allocation2 + $0xb8] sm:$0xf] }
 0x11b   : > { %v1686_v13 = vshll.u32 %v1527_v56, 16  ;;  %7326 = vmatprep.mubr.msk.bf16.mxu1 %vm657_vm3, %v3045_v1  ;;  %v1691_v6 = vshrl.u32 %v1528_v60, 16  ;;  %v1696_v19 = vrot.slane %v1694_v7, 4  ;;  %v3065_v60 = vrot.slane %v3016_v51, 4  ;;  %v1917_v1 = vld [vmem:[#allocation2 + $0x40] sm:$0xf0] }
 0x11c   : > { %v1630_v48 = vsel %vm478_vm2, %v1621_v22, %v1629_v23  ;;  %v1685_v16 = vrot.slane %v1683_v3, 3  ;;  %v8440_v3 = vld [vmem:[#allocation8 + $0x30] sm:$0xff]  }
 0x11e   : > { %7229 = vmatmul.mubr.msk.bf16.gmra.mrb[56].mxu0 %vm657_vm3, %v1295_v18  ;;  %v1645_v18 = vrot.slane %v1643_v4, 4 }
 0x11f   : > { %7234 = vmatprep.mubr.msk.bf16.mxu0 %vm657_vm3, %v1545_v32  ;;  %v1649_v32 = vshrl.u32 %v1523_v10, 16 }
 0x120   : > { %v1646_v35 = vor.u32 %v1645_v18, %v1642_v17  ;;  %v3050_v17 = vrot.slane %v3006_v8, 4  ;;  %v1693_v18 = vrot.slane %v1691_v6, 3  ;;  %v1960_v6 = vrot.slane %v1917_v1, 4 }
 0x121   : > { %v1651_v43 = vrot.slane %v1649_v32, 3 }
 0x122   : > { %v1647_v52 = vsel %vm478_vm2, %v1638_v30, %v1646_v35  ;;  %v3051_v23 = vsel %vm862_vm4, %v3049_v14, %v3050_v17  ;;  %v1697_v29 = vor.u32 %v1696_v19, %v1693_v18  ;;  %v3011_v30 = vld [vmem:[#allocation2 + $0x90] sm:$0xf0]  ;;  %v3055_v35 = vrot.slane %v3009_v26, 4  ;;  %v1922_v14 = vld [vmem:[#allocation2 + $0x68] sm:$0xf] }
 0x123   : > { %v1655_v63 = vor.u32 %v1654_v44, %v1651_v43  ;;  %v3058_v37 = vrot.slane %v3011_v30, 4  ;;  %v1914_v43 = vld [vmem:[#allocation2 + $0x28] sm:$0xf]  ;;  %v3013_v44 = vld [vmem:[#allocation2 + $0xa0] sm:$0xf0]  ;;  %v2214_v30 = vshrl.u32 %v2193_v25, 16 }
 0x124   : > { %v1955_v53 = vrot.slane %v1914_v43, 4  ;;  %v3061_v54 = vrot.slane %v3013_v44, 4  ;;  %v2219_v43 = vrot.slane %v2217_v31, 5  ;;  %v2206_v31 = vld [vmem:[#allocation2 + $0x78] sm:$0x1f] }
 0x126   : > { %7235 = vmatmul.mubr.msk.bf16.vlgmr.msra.gmra.mrb[60].mxu0 %vm657_vm3, %v1562_v41  ;;  %v1677_v41 = vshll.u32 %v1526_v27, 16  ;;  %v3010_v27 = vld [vmem:[#allocation2 + $0x88] sm:$0xf] }
 0x127   : > { %7255 = vmatpush3.bf16.msra.mxu0 %v8374_v47  ;;  %7238 = vmatprep.mubr.msk.bf16.mxu0 %vm657_vm3, %v1579_v50  ;;  %v1596_v47 = vsel %vm478_vm2, %v1587_v61, %v1595_v62  ;;  %v1662_v50 = vrot.slane %v1660_v33, 4  ;;  %v3046_v61 = vrot.slane %v3003_v45, 4  ;;  %v3047_v62 = vrot.slane %v3004_v46, 4  ;;  %v1915_v45 = vld [vmem:[#allocation2 + $0x30] sm:$0xf0] }
 0x128   : > { %7276 = vmatprep.subr.bf16.mxu0 %v8398_v55  ;;  %v1679_v59 = vrot.slane %v1677_v41, 4  ;;  %v1951_v33 = vrot.slane %v1911_v24, 4  ;;  %v3056_v36 = vrot.slane %v3010_v27, 4  ;;  %v1916_v46 = vld [vmem:[#allocation2 + $0x38] sm:$0xf]  ;;  %v1957_v56 = vrot.slane %v1915_v45, 4 }
 0x129   : > { %v1663_v2 = vor.u32 %v1662_v50, %v1659_v49  ;;  %v3048_v4 = vsel %vm862_vm4, %v3046_v61, %v3047_v62  ;;  %v3014_v49 = vld [vmem:[#allocation2 + $0xa8] sm:$0xf]  ;;  %v3015_v50 = vld [vmem:[#allocation2 + $0xb0] sm:$0xf0]  ;;  %v1958_v57 = vrot.slane %v1916_v46, 4 }
 0x12a   : > { %v1680_v10 = vor.u32 %v1679_v59, %v1676_v58  ;;  %7327 = vmatmul.mubr.msk.bf16.gmra.mrb[4].mxu1 %vm657_vm3, %v3048_v4  ;;  %v3057_v40 = vsel %vm862_vm4, %v3055_v35, %v3056_v36  ;;  %v1953_v41 = vsel %vm862_vm4, %v1951_v33, %v1952_v34  ;;  %v3062_v58 = vrot.slane %v3014_v49, 4  ;;  %v1920_v4 = vld [vmem:[#allocation2 + $0x58] sm:$0xf]  ;;  %v1929_v35 = vld [vmem:[#allocation2 + $0xa0] sm:$0xf0] }
 0x12b   : > { %v1664_v15 = vsel %vm478_vm2, %v1655_v63, %v1663_v2  ;;  %7330 = vmatprep.mubr.msk.bf16.mxu1 %vm657_vm3, %v3051_v23  ;;  %v3064_v59 = vrot.slane %v3015_v50, 4  ;;  %v1959_v63 = vsel %vm862_vm4, %v1957_v56, %v1958_v57  ;;  %v1918_v2 = vld [vmem:[#allocation2 + $0x48] sm:$0xf]  ;;  %v1927_v23 = vld [vmem:[#allocation2 + $0x90] sm:$0xf0] }
 0x12c   : > { %v1681_v22 = vsel %vm478_vm2, %v1672_v9, %v1680_v10  ;;  %v3063_v61 = vsel %vm862_vm4, %v3061_v54, %v3062_v58  ;;  %v1961_v7 = vrot.slane %v1918_v2, 4  ;;  %v1964_v9 = vrot.slane %v1920_v4, 4  ;;  %v1928_v24 = vld [vmem:[#allocation2 + $0x98] sm:$0xf]  ;;  %v1930_v36 = vld [vmem:[#allocation2 + $0xa8] sm:$0xf] }
 0x12d   : > { %v3066_v5 = vsel %vm862_vm4, %v3064_v59, %v3065_v60  ;;  %v2198_v46 = vld [vmem:[#allocation2 + $0x38] sm:$0x1f]  ;;  %v1979_v49 = vrot.slane %v1930_v36, 4 }
 0x12e   : > { %7239 = vmatmul.mubr.msk.bf16.gmra.mrb[64].mxu0 %vm657_vm3, %v1596_v47  ;;  %v1688_v47 = vrot.slane %v1686_v13, 4  ;;  %v1919_v13 = vld [vmem:[#allocation2 + $0x50] sm:$0xf0]  ;;  %v1962_v10 = vsel %vm862_vm4, %v1960_v6, %v1961_v7  ;;  %v2256_v57 = vshrl.u32 %v2198_v46, 16  ;;  %v2259_v58 = vshll.u32 %v2198_v46, 16 }
 0x12f   : > { %7242 = vmatprep.mubr.msk.bf16.mxu0 %vm657_vm3, %v1613_v21  ;;  %v3053_v21 = vrot.slane %v3008_v12, 4  ;;  %v1963_v8 = vrot.slane %v1919_v13, 4  ;;  %v1921_v12 = vld [vmem:[#allocation2 + $0x60] sm:$0xf0]  ;;  %v2324_v46 = vshrl.u32 %v2206_v31, 16 }
 0x130   : > { %v1689_v28 = vor.u32 %v1688_v47, %v1685_v16  ;;  %v1924_v16 = vld [vmem:[#allocation2 + $0x78] sm:$0xf]  ;;  %v1967_v47 = vrot.slane %v1922_v14, 4  ;;  %v2199_v13 = vld [vmem:[#allocation2 + $0x40] sm:$0xf0]  ;;  %v2258_v6 = vrot.slane %v2256_v57, 4 }
 0x131   : > { %v3054_v32 = vsel %vm862_vm4, %v3052_v20, %v3053_v21  ;;  %v1965_v11 = vsel %vm862_vm4, %v1963_v8, %v1964_v9  ;;  %v1970_v18 = vrot.slane %v1924_v16, 4  ;;  %v1925_v20 = vld [vmem:[#allocation2 + $0x80] sm:$0xf0]  ;;  %v2261_v7 = vrot.slane %v2259_v58, 5  ;;  %v2200_v8 = vld [vmem:[#allocation2 + $0x48] sm:$0x1f] }
 0x132   : > { %7331 = vmatmul.mubr.msk.bf16.gmra.mrb[8].mxu1 %vm657_vm3, %v3054_v32  ;;  %v1698_v39 = vsel %vm478_vm2, %v1689_v28, %v1697_v29  ;;  %v2194_v32 = vld [vmem:[#allocation2 + $0x18] sm:$0x1f]  ;;  %v1972_v26 = vrot.slane %v1925_v20, 4  ;;  %v1975_v28 = vrot.slane %v1927_v23, 4  ;;  %v1976_v29 = vrot.slane %v1928_v24, 4 }
 0x133   : > { %7334 = vmatprep.mubr.msk.bf16.mxu1 %vm657_vm3, %v3057_v40  ;;  %v2222_v33 = vshrl.u32 %v2194_v32, 16  ;;  %v2225_v34 = vshll.u32 %v2194_v32, 16  ;;  %v2196_v40 = vld [vmem:[#allocation2 + $0x28] sm:$0x1f]  ;;  %v2202_v14 = vld [vmem:[#allocation2 + $0x58] sm:$0x1f] }
 0x134   : > { %v2276_v16 = vshll.u32 %v2200_v8, 16  ;;  %v2207_v57 = vld [vmem:[#allocation2 + $0x80] sm:$0xf0] }
 0x135   : > { %v2224_v44 = vrot.slane %v2222_v33, 4  ;;  %v2227_v45 = vrot.slane %v2225_v34, 5 }
 0x136   : > { %7243 = vmatmul.mubr.msk.bf16.gmra.mrb[68].mxu0 %vm657_vm3, %v1630_v48  ;;  %v3060_v48 = vsel %vm862_vm4, %v3058_v37, %v3059_v38  ;;  %v1977_v38 = vsel %vm862_vm4, %v1975_v28, %v1976_v29  ;;  %v2278_v32 = vrot.slane %v2276_v16, 5  ;;  %v2204_v29 = vld [vmem:[#allocation2 + $0x68] sm:$0x1f] }
 0x137   : > { %7246 = vmatprep.mubr.msk.bf16.mxu0 %vm657_vm3, %v1647_v52  ;;  %v1954_v52 = vrot.slane %v1913_v42, 4  ;;  %v2216_v42 = vrot.slane %v2214_v30, 4  ;;  %v2228_v60 = vor.u32 %v2227_v45, %v2224_v44  ;;  %v2205_v30 = vld [vmem:[#allocation2 + $0x70] sm:$0xf0] }
 0x138   : > { %v2316_v44 = vshrl.u32 %v2205_v30, 16  ;;  %v2319_v45 = vshll.u32 %v2205_v30, 16 }
 0x139   : > { %v1956_v62 = vsel %vm862_vm4, %v1954_v52, %v1955_v53  ;;  %v2239_v52 = vshrl.u32 %v2196_v40, 16  ;;  %v2242_v53 = vshll.u32 %v2196_v40, 16  ;;  %v2220_v59 = vor.u32 %v2219_v43, %v2216_v42 }
 0x13a   : > { %7335 = vmatmul.mubr.msk.bf16.gmra.mrb[12].mxu1 %vm657_vm3, %v3060_v48  ;;  %v1978_v48 = vrot.slane %v1929_v35, 4  ;;  %v2307_v42 = vshrl.u32 %v2204_v29, 16  ;;  %v2310_v43 = vshll.u32 %v2204_v29, 16  ;;  %v2318_v58 = vrot.slane %v2316_v44, 4 }
 0x13b   : > { %7338 = vmatprep.mubr.msk.bf16.mxu1 %vm657_vm3, %v3063_v61  ;;  %v2241_v1 = vrot.slane %v2239_v52, 4  ;;  %v2244_v2 = vrot.slane %v2242_v53, 5  ;;  %v2229_v9 = vsel %vm1125_vm5, %v2220_v59, %v2228_v60  ;;  %v2321_v59 = vrot.slane %v2319_v45, 5 }
 0x13c   : > { %v1980_v61 = vsel %vm862_vm4, %v1978_v48, %v1979_v49  ;;  %v2327_v48 = vshll.u32 %v2206_v31, 16 }
 0x13e   : > { %7247 = vmatmul.mubr.msk.bf16.gmra.mrb[72].mxu0 %vm657_vm3, %v1664_v15  ;;  %v1923_v15 = vld [vmem:[#allocation2 + $0x70] sm:$0xf0]  ;;  %v2329_v60 = vrot.slane %v2327_v48, 5 }
 0x13f   : > { %7250 = vmatprep.mubr.msk.bf16.mxu0 %vm657_vm3, %v1681_v22  ;;  %v1969_v17 = vrot.slane %v1923_v15, 4  ;;  %v1926_v22 = vld [vmem:[#allocation2 + $0x88] sm:$0xf]  ;;  %v2273_v15 = vshrl.u32 %v2200_v8, 16  ;;  %v2322_v8 = vor.u32 %v2321_v59, %v2318_v58 }
 0x140   : > { %v1973_v27 = vrot.slane %v1926_v22, 4  ;;  %v2293_v22 = vshll.u32 %v2202_v14, 16 }
 0x141   : > { %v1971_v21 = vsel %vm862_vm4, %v1969_v17, %v1970_v18  ;;  %v2262_v18 = vor.u32 %v2261_v7, %v2258_v6  ;;  %v2275_v25 = vrot.slane %v2273_v15, 4 }
 0x142   : > { %7339 = vmatmul.mubr.msk.bf16.gmra.mrb[16].mxu1 %vm657_vm3, %v3066_v5  ;;  %v1974_v37 = vsel %vm862_vm4, %v1972_v26, %v1973_v27  ;;  %v2203_v26 = vld [vmem:[#allocation2 + $0x60] sm:$0xf0]  ;;  %v2295_v36 = vrot.slane %v2293_v22, 5 }
 0x143   : > { %v2279_v40 = vor.u32 %v2278_v32, %v2275_v25  ;;  %v2596_v25 = vld [vmem:[#allocation2 + $0x28] sm:$0xf] }
 0x146   : > { %7251 = vmatmul.mubr.msk.bf16.gmra.mrb[76].mxu0 %vm657_vm3, %v1698_v39  ;;  %v2195_v39 = vld [vmem:[#allocation2 + $0x20] sm:$0xf0] }
 0x147   : > { %7256 = vmatprep.mubr.msk.bf16.mxu0 %vm657_vm3, %v1953_v41  ;;  %v2197_v41 = vld [vmem:[#allocation2 + $0x30] sm:$0xf0]  ;;  %v2231_v50 = vshrl.u32 %v2195_v39, 16  ;;  %v2234_v51 = vshll.u32 %v2195_v39, 16  ;;  %v2299_v39 = vshrl.u32 %v2203_v26, 16 }
 0x148   : > { %v2248_v54 = vshrl.u32 %v2197_v41, 16  ;;  %v2251_v56 = vshll.u32 %v2197_v41, 16  ;;  %v2302_v41 = vshll.u32 %v2203_v26, 16 }
 0x14a   : > { %v2250_v4 = vrot.slane %v2248_v54, 4  ;;  %v2253_v5 = vrot.slane %v2251_v56, 5  ;;  %v2304_v53 = vrot.slane %v2302_v41, 5  ;;  %v2309_v54 = vrot.slane %v2307_v42, 4 }
 0x14b   : > { %v2312_v56 = vrot.slane %v2310_v43, 5  ;;  %v2627_v41 = vshll.u32 %v2596_v25, 16 }
 0x14c   : > { %v2254_v17 = vor.u32 %v2253_v5, %v2250_v4 }
 0x14d   : > { %v2313_v7 = vor.u32 %v2312_v56, %v2309_v54  ;;  %v2629_v59 = vrot.slane %v2627_v41, 4 }
 0x14e   : > { %7257 = vmatmul.mubr.msk.bf16.vlgmr.msra.gmra.mrb[80].mxu0 %vm657_vm3, %v1956_v62  ;;  %v2233_v62 = vrot.slane %v2231_v50, 4  ;;  %v2263_v28 = vsel %vm1125_vm5, %v2254_v17, %v2262_v18 }
 0x14f   : > { %7277 = vmatpush3.bf16.msra.mxu0 %v8398_v55  ;;  %7260 = vmatprep.mubr.msk.bf16.mxu0 %vm657_vm3, %v1959_v63  ;;  %v1966_v55 = vrot.slane %v1921_v12, 4  ;;  %v2236_v63 = vrot.slane %v2234_v51, 5  ;;  %v2201_v12 = vld [vmem:[#allocation2 + $0x50] sm:$0xf0]  ;;  %v2301_v51 = vrot.slane %v2299_v39, 4 }
 0x150   : > { %7298 = vmatprep.subr.bf16.mxu0 %v8440_v3  ;;  %v2285_v20 = vshll.u32 %v2201_v12, 16 }
 0x151   : > { %v1968_v19 = vsel %vm862_vm4, %v1966_v55, %v1967_v47  ;;  %v2237_v55 = vor.u32 %v2236_v63, %v2233_v62  ;;  %v2245_v47 = vor.u32 %v2244_v2, %v2241_v1  ;;  %v2333_v63 = vshrl.u32 %v2207_v57, 16  ;;  %v2209_v2 = vld [vmem:[#allocation2 + $0x90] sm:$0xf0] }
 0x152   : > { %v2287_v34 = vrot.slane %v2285_v20, 5  ;;  %v2336_v1 = vshll.u32 %v2207_v57, 16  ;;  %v2305_v6 = vor.u32 %v2304_v53, %v2301_v51  ;;  %v2212_v20 = vld [vmem:[#allocation2 + $0xa8] sm:$0x1f]  ;;  %v2598_v53 = vld [vmem:[#allocation2 + $0x38] sm:$0xf] }
 0x153   : > { %v2246_v27 = vsel %vm1125_vm5, %v2237_v55, %v2245_v47  ;;  %v2335_v16 = vrot.slane %v2333_v63, 4  ;;  %v2211_v47 = vld [vmem:[#allocation2 + $0xa0] sm:$0xf0] }
 0x154   : > { %v2338_v55 = vrot.slane %v2336_v1, 5  ;;  %v2314_v22 = vsel %vm1125_vm5, %v2305_v6, %v2313_v7  ;;  %v2367_v31 = vshrl.u32 %v2211_v47, 16  ;;  %v2599_v63 = vld [vmem:[#allocation2 + $0x40] sm:$0xf8]  ;;  %v2600_v1 = vld [vmem:[#allocation2 + $0x48] sm:$0xf] }
 0x156   : > { %7261 = vmatmul.mubr.msk.bf16.gmra.mrb[84].mxu0 %vm657_vm3, %v1962_v10  ;;  %v2265_v10 = vshrl.u32 %v2199_v13, 16  ;;  %v2339_v30 = vor.u32 %v2338_v55, %v2335_v16  ;;  %v2369_v45 = vrot.slane %v2367_v31, 4  ;;  %v2601_v16 = vld [vmem:[#allocation2 + $0x50] sm:$0xf8] }
 0x157   : > { %7264 = vmatprep.mubr.msk.bf16.mxu0 %vm657_vm3, %v1965_v11  ;;  %v2268_v11 = vshll.u32 %v2199_v13, 16  ;;  %v2210_v13 = vld [vmem:[#allocation2 + $0x98] sm:$0x1f]  ;;  %v2670_v31 = vshll.u32 %v2601_v16, 16 }
 0x158   : > { %v2267_v23 = vrot.slane %v2265_v10, 4  ;;  %v2350_v10 = vshrl.u32 %v2209_v2, 16 }
 0x159   : > { %v2270_v24 = vrot.slane %v2268_v11, 5  ;;  %v2353_v11 = vshll.u32 %v2209_v2, 16  ;;  %v2641_v2 = vshrl.u32 %v2598_v53, 16 }
 0x15a   : > { %v2352_v26 = vrot.slane %v2350_v10, 4  ;;  %v2658_v10 = vshrl.u32 %v2600_v1, 16 }
 0x15e   : > { %7265 = vmatmul.mubr.msk.bf16.gmra.mrb[88].mxu0 %vm657_vm3, %v1968_v19  ;;  %v2282_v19 = vshrl.u32 %v2201_v12, 16  ;;  %v2358_v12 = vshrl.u32 %v2210_v13, 16 }
 0x15f   : > { %7268 = vmatprep.mubr.msk.bf16.mxu0 %vm657_vm3, %v1971_v21  ;;  %v2290_v21 = vshrl.u32 %v2202_v14, 16  ;;  %v2361_v14 = vshll.u32 %v2210_v13, 16  ;;  %v2644_v13 = vshll.u32 %v2598_v53, 16 }
 0x160   : > { %v2284_v33 = vrot.slane %v2282_v19, 4 }
 0x161   : > { %v2292_v35 = vrot.slane %v2290_v21, 4  ;;  %v2363_v29 = vrot.slane %v2361_v14, 5 }
 0x162   : > { %v2288_v49 = vor.u32 %v2287_v34, %v2284_v33  ;;  %v2370_v34 = vshll.u32 %v2211_v47, 16  ;;  %v2643_v47 = vrot.slane %v2641_v2, 3 }
 0x163   : > { %v2296_v50 = vor.u32 %v2295_v36, %v2292_v35  ;;  %v2375_v35 = vshrl.u32 %v2212_v20, 16  ;;  %v2378_v36 = vshll.u32 %v2212_v20, 16 }
 0x165   : > { %v2297_v62 = vsel %vm1125_vm5, %v2288_v49, %v2296_v50  ;;  %v2372_v50 = vrot.slane %v2370_v34, 5  ;;  %v2377_v51 = vrot.slane %v2375_v35, 4 }
 0x166   : > { %7269 = vmatmul.mubr.msk.bf16.gmra.mrb[92].mxu0 %vm657_vm3, %v1974_v37  ;;  %v8466_v37 = vld [vmem:[#allocation8 + $0x40] sm:$0xff]  }
 0x167   : > { %7272 = vmatprep.mubr.msk.bf16.mxu0 %vm657_vm3, %v1977_v38  ;;  %v2271_v38 = vor.u32 %v2270_v24, %v2267_v23  ;;  %v2595_v24 = vld [vmem:[#allocation2 + $0x20] sm:$0xf8] }
 0x168   : > { %v2619_v39 = vshll.u32 %v2595_v24, 16 }
 0x169   : > { %v2280_v52 = vsel %vm1125_vm5, %v2271_v38, %v2279_v40  ;;  %v2616_v38 = vshrl.u32 %v2595_v24, 16  ;;  %v2624_v40 = vshrl.u32 %v2596_v25, 16 }
 0x16a   : > { %v2621_v57 = vrot.slane %v2619_v39, 4 }
 0x16b   : > { %v2618_v56 = vrot.slane %v2616_v38, 3  ;;  %v2626_v58 = vrot.slane %v2624_v40, 3 }
 0x16d   : > { %v2622_v6 = vor.u32 %v2621_v57, %v2618_v56  ;;  %v2630_v7 = vor.u32 %v2629_v59, %v2626_v58  ;;  %v2606_v59 = vld [vmem:[#allocation2 + $0x78] sm:$0xf] }
 0x16e   : > { %7273 = vmatmul.mubr.msk.bf16.gmra.mrb[96].mxu0 %vm657_vm3, %v1980_v61  ;;  %v2208_v61 = vld [vmem:[#allocation2 + $0x88] sm:$0x1f] }
 0x16f   : > { %7278 = vmatprep.mubr.msk.bf16.mxu0 %vm657_vm3, %v2229_v9  ;;  %v2341_v4 = vshrl.u32 %v2208_v61, 16  ;;  %v2344_v5 = vshll.u32 %v2208_v61, 16 }
 0x171   : > { %v2343_v18 = vrot.slane %v2341_v4, 4  ;;  %v2346_v19 = vrot.slane %v2344_v5, 5  ;;  %v2373_v4 = vor.u32 %v2372_v50, %v2369_v45  ;;  %v2605_v50 = vld [vmem:[#allocation2 + $0x70] sm:$0xf8] }
 0x173   : > { %v2347_v33 = vor.u32 %v2346_v19, %v2343_v18  ;;  %v2602_v18 = vld [vmem:[#allocation2 + $0x58] sm:$0xf] }
 0x174   : > { %v2678_v34 = vshll.u32 %v2602_v18, 16 }
 0x175   : > { %v2348_v49 = vsel %vm1125_vm5, %v2339_v30, %v2347_v33  ;;  %v2675_v33 = vshrl.u32 %v2602_v18, 16 }
 0x176   : > { %7279 = vmatmul.mubr.msk.bf16.vlgmr.msra.gmra.mrb[100].mxu0 %vm657_vm3, %v2246_v27  ;;  %v2355_v27 = vrot.slane %v2353_v11, 5  ;;  %v2661_v11 = vshll.u32 %v2600_v1, 16  ;;  %v2704_v1 = vshll.u32 %v2605_v50, 16 }
 0x177   : > { %7299 = vmatpush3.bf16.msra.mxu0 %v8440_v3  ;;  %7282 = vmatprep.mubr.msk.bf16.mxu0 %vm657_vm3, %v2263_v28  ;;  %v2326_v3 = vrot.slane %v2324_v46, 4  ;;  %v2360_v28 = vrot.slane %v2358_v12, 4  ;;  %v2597_v46 = vld [vmem:[#allocation2 + $0x30] sm:$0xf8] }
 0x178   : > { %7342 = vmatprep.subr.bf16.mxu0 %v8466_v37  ;;  %v2356_v42 = vor.u32 %v2355_v27, %v2352_v26  ;;  %v2633_v61 = vshrl.u32 %v2597_v46, 16  ;;  %v2660_v26 = vrot.slane %v2658_v10, 3  ;;  %v2663_v27 = vrot.slane %v2661_v11, 4 }
 0x179   : > { %v2330_v9 = vor.u32 %v2329_v60, %v2326_v3  ;;  %v2364_v43 = vor.u32 %v2363_v29, %v2360_v28  ;;  %v2667_v29 = vshrl.u32 %v2601_v16, 16  ;;  %v2610_v16 = vld [vmem:[#allocation2 + $0x98] sm:$0xf] }
 0x17a   : > { %v2635_v14 = vrot.slane %v2633_v61, 3  ;;  %v2664_v41 = vor.u32 %v2663_v27, %v2660_v26  ;;  %v2612_v26 = vld [vmem:[#allocation2 + $0xa8] sm:$0xf]  ;;  %v2743_v27 = vshrl.u32 %v2610_v16, 16 }
 0x17b   : > { %v2331_v23 = vsel %vm1125_vm5, %v2322_v8, %v2330_v9  ;;  %v2365_v60 = vsel %vm1125_vm5, %v2356_v42, %v2364_v43  ;;  %v2650_v8 = vshrl.u32 %v2599_v63, 16  ;;  %v2653_v9 = vshll.u32 %v2599_v63, 16 }
 0x17c   : > { %v2669_v43 = vrot.slane %v2667_v29, 3  ;;  %v2701_v63 = vshrl.u32 %v2605_v50, 16 }
 0x17d   : > { %v2652_v25 = vrot.slane %v2650_v8, 3 }
 0x17e   : > { %7283 = vmatmul.mubr.msk.bf16.gmra.mrb[104].mxu0 %vm657_vm3, %v2280_v52  ;;  %v2380_v52 = vrot.slane %v2378_v36, 5 }
 0x17f   : > { %7286 = vmatprep.mubr.msk.bf16.mxu0 %vm657_vm3, %v2297_v62  ;;  %v2636_v62 = vshll.u32 %v2597_v46, 16  ;;  %v2672_v46 = vrot.slane %v2670_v31, 4 }
 0x180   : > { %v2381_v5 = vor.u32 %v2380_v52, %v2377_v51 }
 0x181   : > { %v7170_v15 = vpop.f32.mrb[0].mxu0  ;;  %v2673_v61 = vor.u32 %v2672_v46, %v2669_v43 }
 0x182   : > { %804 = vst.msk [vmem:[#allocation4 + $0x10] sm:$0xff] %vm801_vm6, %v7170_v15  ;;  %v722_v17 = vpop.f32.mrb[1].mxu0  ;;  %v2638_v15 = vrot.slane %v2636_v62, 4  ;;  %v2382_v20 = vsel %vm1125_vm5, %v2373_v4, %v2381_v5  ;;  %v2709_v4 = vshrl.u32 %v2606_v59, 16  ;;  %v2712_v5 = vshll.u32 %v2606_v59, 16 }
 0x183   : > { %802 = vst.msk [vmem:[#allocation4] sm:$0xff] %vm801_vm6, %v722_v17  ;;  %v7171_v21 = vpop.f32.mrb[2].mxu0  ;;  %v2646_v17 = vrot.slane %v2644_v13, 4  ;;  %v3279_v59 = vld [vmem:[#allocation2 + $0x20] sm:$0xf0] }
 0x184   : > { %805 = vst.msk [vmem:[#allocation4 + $0x18] sm:$0xff] %vm801_vm6, %v7171_v21  ;;  %v725_v32 = vpop.f32.mrb[3].mxu0  ;;  %v2631_v21 = vsel %vm478_vm2, %v2622_v6, %v2630_v7  ;;  %v2639_v28 = vor.u32 %v2638_v15, %v2635_v14  ;;  %v2703_v14 = vrot.slane %v2701_v63, 3  ;;  %v2609_v15 = vld [vmem:[#allocation2 + $0x90] sm:$0xf8]  ;;  %v2714_v18 = vrot.slane %v2712_v5, 4 }
 0x185   : > { %803 = vst.msk [vmem:[#allocation4 + $0x8] sm:$0xff] %vm801_vm6, %v725_v32  ;;  %v2655_v32 = vrot.slane %v2653_v9, 4  ;;  %v2647_v30 = vor.u32 %v2646_v17, %v2643_v47  ;;  %v2706_v47 = vrot.slane %v2704_v1, 4  ;;  %v2711_v17 = vrot.slane %v2709_v4, 3 }
 0x186   : > { %7287 = vmatmul.mubr.msk.bf16.gmra.mrb[108].mxu0 %vm657_vm3, %v2314_v22  ;;  %v2603_v22 = vld [vmem:[#allocation2 + $0x60] sm:$0xf8] }
 0x187   : > { %7290 = vmatprep.mubr.msk.bf16.mxu0 %vm657_vm3, %v2331_v23  ;;  %v2604_v23 = vld [vmem:[#allocation2 + $0x68] sm:$0xf]  ;;  %v2684_v35 = vshrl.u32 %v2603_v22, 16  ;;  %v2687_v36 = vshll.u32 %v2603_v22, 16  ;;  %v2656_v40 = vor.u32 %v2655_v32, %v2652_v25  ;;  %v2648_v45 = vsel %vm478_vm2, %v2639_v28, %v2647_v30 }
 0x188   : > { %v2692_v38 = vshrl.u32 %v2604_v23, 16  ;;  %v2695_v39 = vshll.u32 %v2604_v23, 16  ;;  %v2735_v25 = vshrl.u32 %v2609_v15, 16  ;;  %v2738_v32 = vshll.u32 %v2609_v15, 16 }
 0x189   : > { %v7174_v44 = vpop.f32.mrb[4].mxu0  ;;  %v2686_v52 = vrot.slane %v2684_v35, 3  ;;  %v2689_v53 = vrot.slane %v2687_v36, 4  ;;  %v2665_v58 = vsel %vm478_vm2, %v2656_v40, %v2664_v41  ;;  %v2746_v28 = vshll.u32 %v2610_v16, 16  ;;  %v1047_v41 = vld [vmem:[#allocation4 + $0x10] sm:$0xff] }
 0x18a   : > { %808 = vst.msk [vmem:[#allocation4 + $0x30] sm:$0xff] %vm801_vm6, %v7174_v44  ;;  %v738_v48 = vpop.f32.mrb[5].mxu0  ;;  %v2697_v56 = vrot.slane %v2695_v39, 4  ;;  %v2707_v30 = vor.u32 %v2706_v47, %v2703_v14  ;;  %v2715_v31 = vor.u32 %v2714_v18, %v2711_v17  ;;  %v2760_v36 = vshrl.u32 %v2612_v26, 16  ;;  %v2613_v39 = vld [vmem:[#allocation2 + $0xb0] sm:$0xf8] }
 0x18b   : > { %806 = vst.msk [vmem:[#allocation4 + $0x20] sm:$0xff] %vm801_vm6, %v738_v48  ;;  %v7175_v54 = vpop.f32.mrb[6].mxu0  ;;  %v2677_v48 = vrot.slane %v2675_v33, 3  ;;  %v2690_v2 = vor.u32 %v2689_v53, %v2686_v52  ;;  %v2740_v43 = vrot.slane %v2738_v32, 4  ;;  %v2748_v50 = vrot.slane %v2746_v28, 4 }
 0x18c   : > { %809 = vst.msk [vmem:[#allocation4 + $0x38] sm:$0xff] %vm801_vm6, %v7175_v54  ;;  %v741_v3 = vpop.f32.mrb[7].mxu0  ;;  %v2694_v54 = vrot.slane %v2692_v38, 3  ;;  %v2763_v38 = vshll.u32 %v2612_v26, 16  ;;  %v2762_v63 = vrot.slane %v2760_v36, 3  ;;  %v2772_v4 = vshll.u32 %v2613_v39, 16 }
 0x18d   : > { %807 = vst.msk [vmem:[#allocation4 + $0x28] sm:$0xff] %vm801_vm6, %v741_v3  ;;  %v2607_v3 = vld [vmem:[#allocation2 + $0x80] sm:$0xf8]  ;;  %v3281_v18 = vld [vmem:[#allocation2 + $0x30] sm:$0xf0] }
 0x18e   : > { %7291 = vmatmul.mubr.msk.bf16.gmra.mrb[112].mxu0 %vm657_vm3, %v2348_v49  ;;  %v2680_v49 = vrot.slane %v2678_v34, 4  ;;  %v2698_v13 = vor.u32 %v2697_v56, %v2694_v54  ;;  %v2718_v6 = vshrl.u32 %v2607_v3, 16  ;;  %v2721_v7 = vshll.u32 %v2607_v3, 16  ;;  %v1048_v54 = vld [vmem:[#allocation4 + $0x18] sm:$0xff]  ;;  %v3283_v36 = vld [vmem:[#allocation2 + $0x40] sm:$0xf0] }
 0x18f   : > { %7294 = vmatprep.mubr.msk.bf16.mxu0 %vm657_vm3, %v2365_v60  ;;  %v2608_v60 = vld [vmem:[#allocation2 + $0x88] sm:$0xf]  ;;  %v2716_v56 = vsel %vm478_vm2, %v2707_v30, %v2715_v31  ;;  %v2765_v1 = vrot.slane %v2763_v38, 4  ;;  %v2774_v47 = vrot.slane %v2772_v4, 4 }
 0x190   : > { %v2681_v62 = vor.u32 %v2680_v49, %v2677_v48  ;;  %v2726_v8 = vshrl.u32 %v2608_v60, 16  ;;  %v2729_v9 = vshll.u32 %v2608_v60, 16  ;;  %v2723_v22 = vrot.slane %v2721_v7, 4  ;;  %v1045_v48 = vld [vmem:[#allocation4] sm:$0xff] }
 0x191   : > { %v7178_v12 = vpop.f32.mrb[8].mxu0  ;;  %v2745_v49 = vrot.slane %v2743_v27, 3  ;;  %v2766_v15 = vor.u32 %v2765_v1, %v2762_v63  ;;  %v3286_v63 = vld [vmem:[#allocation2 + $0x58] sm:$0x1f] }
 0x192   : > { %812 = vst.msk [vmem:[#allocation4 + $0x50] sm:$0xff] %vm801_vm6, %v7178_v12  ;;  %v754_v55 = vpop.f32.mrb[9].mxu0  ;;  %v2682_v12 = vsel %vm478_vm2, %v2673_v61, %v2681_v62  ;;  %v2728_v23 = vrot.slane %v2726_v8, 3  ;;  %v1046_v61 = vld [vmem:[#allocation4 + $0x8] sm:$0xff] }
 0x193   : > { %810 = vst.msk [vmem:[#allocation4 + $0x40] sm:$0xff] %vm801_vm6, %v754_v55  ;;  %v7179_v19 = vpop.f32.mrb[10].mxu0  ;;  %v2699_v55 = vsel %vm478_vm2, %v2690_v2, %v2698_v13  ;;  %v3280_v2 = vld [vmem:[#allocation2 + $0x28] sm:$0x1f]  ;;  %v2749_v7 = vor.u32 %v2748_v50, %v2745_v49  ;;  %v1052_v27 = vld [vmem:[#allocation4 + $0x38] sm:$0xff]  ;;  %v3334_v49 = vshrl.u32 %v3283_v36, 16 }
 0x194   : > { %813 = vst.msk [vmem:[#allocation4 + $0x58] sm:$0xff] %vm801_vm6, %v7179_v19  ;;  %v757_v24 = vpop.f32.mrb[11].mxu0  ;;  %v2611_v19 = vld [vmem:[#allocation2 + $0xa0] sm:$0xf8]  ;;  %v3337_v50 = vshll.u32 %v3283_v36, 16 }
 0x195   : > { %811 = vst.msk [vmem:[#allocation4 + $0x48] sm:$0xff] %vm801_vm6, %v757_v24  ;;  %v2731_v24 = vrot.slane %v2729_v9, 4  ;;  %v2752_v29 = vshrl.u32 %v2611_v19, 16  ;;  %v2755_v33 = vshll.u32 %v2611_v19, 16  ;;  %v3300_v9 = vshrl.u32 %v3279_v59, 16 }
 0x196   : > { %7295 = vmatmul.mubr.msk.bf16.gmra.mrb[116].mxu0 %vm657_vm3, %v2382_v20 }
 0x197   : > { %7300 = vmatprep.mubr.msk.bf16.mxu0 %vm657_vm3, %v2631_v21  ;;  %v2720_v21 = vrot.slane %v2718_v6, 3  ;;  %v2732_v35 = vor.u32 %v2731_v24, %v2728_v23  ;;  %v3302_v24 = vrot.slane %v3300_v9, 4 }
 0x199   : > { %v7182_v42 = vpop.f32.mrb[12].mxu0  ;;  %v2724_v34 = vor.u32 %v2723_v22, %v2720_v21  ;;  %v1049_v21 = vld [vmem:[#allocation4 + $0x20] sm:$0xff] }
 0x19a   : > { %816 = vst.msk [vmem:[#allocation4 + $0x70] sm:$0xff] %vm801_vm6, %v7182_v42  ;;  %v770_v44 = vpop.f32.mrb[13].mxu0  ;;  %v2737_v42 = vrot.slane %v2735_v25, 3  ;;  %v3282_v25 = vld [vmem:[#allocation2 + $0x38] sm:$0x1f] }
 0x19b   : > { %814 = vst.msk [vmem:[#allocation4 + $0x60] sm:$0xff] %vm801_vm6, %v770_v44  ;;  %v7183_v51 = vpop.f32.mrb[14].mxu0  ;;  %v2614_v44 = vld [vmem:[#allocation2 + $0xb8] sm:$0xf]  ;;  %v2733_v62 = vsel %vm478_vm2, %v2724_v34, %v2732_v35  ;;  %v1050_v34 = vld [vmem:[#allocation4 + $0x28] sm:$0xff] }
 0x19c   : > { %817 = vst.msk [vmem:[#allocation4 + $0x78] sm:$0xff] %vm801_vm6, %v7183_v51  ;;  %v773_v57 = vpop.f32.mrb[15].mxu0  ;;  %v2754_v51 = vrot.slane %v2752_v29, 3  ;;  %v2777_v5 = vshrl.u32 %v2614_v44, 16  ;;  %v2741_v6 = vor.u32 %v2740_v43, %v2737_v42  ;;  %v2780_v8 = vshll.u32 %v2614_v44, 16 }
 0x19d   : > { %815 = vst.msk [vmem:[#allocation4 + $0x68] sm:$0xff] %vm801_vm6, %v773_v57  ;;  %v2757_v57 = vrot.slane %v2755_v33, 4  ;;  %v3284_v42 = vld [vmem:[#allocation2 + $0x48] sm:$0x1f] }
 0x19e   : > { %7301 = vmatmul.mubr.msk.bf16.vlgmr.msra.gmra.mrb[120].mxu0 %vm657_vm3, %v2648_v45  ;;  %v2779_v17 = vrot.slane %v2777_v5, 3  ;;  %v2750_v22 = vsel %vm478_vm2, %v2741_v6, %v2749_v7  ;;  %v2782_v23 = vrot.slane %v2780_v8, 4  ;;  %v3336_v6 = vrot.slane %v3334_v49, 4  ;;  %v3287_v7 = vld [vmem:[#allocation2 + $0x60] sm:$0xf0] }
 0x19f   : > { %7343 = vmatpush3.bf16.msra.mxu0 %v8466_v37  ;;  %7304 = vmatprep.mubr.msk.bf16.mxu0 %vm657_vm3, %v2665_v58  ;;  %v2769_v58 = vshrl.u32 %v2613_v39, 16  ;;  %v2758_v14 = vor.u32 %v2757_v57, %v2754_v51  ;;  %v3317_v39 = vshrl.u32 %v3281_v18, 16  ;;  %v3342_v51 = vshrl.u32 %v3284_v42, 16 }
 0x1a0   : > { %v2783_v44 = vor.u32 %v2782_v23, %v2779_v17  ;;  %v3362_v17 = vshll.u32 %v3286_v63, 16 }
 0x1a1   : > { %v7186_v10 = vpop.f32.mrb[16].mxu0  ;;  %v2771_v16 = vrot.slane %v2769_v58, 3  ;;  %v2767_v35 = vsel %vm478_vm2, %v2758_v14, %v2766_v15 }
 0x1a2   : > { %820 = vst.msk [vmem:[#allocation4 + $0x90] sm:$0xff] %vm801_vm6, %v7186_v10  ;;  %v786_v11 = vpop.f32.mrb[17].mxu0  ;;  %v3303_v10 = vshll.u32 %v3279_v59, 16 }
 0x1a3   : > { %818 = vst.msk [vmem:[#allocation4 + $0x80] sm:$0xff] %vm801_vm6, %v786_v11  ;;  %v7187_v37 = vpop.f32.mrb[18].mxu0  ;;  %v3308_v11 = vshrl.u32 %v3280_v2, 16  ;;  %v2775_v43 = vor.u32 %v2774_v47, %v2771_v16  ;;  %v3288_v47 = vld [vmem:[#allocation2 + $0x68] sm:$0x1f] }
 0x1a4   : > { %821 = vst.msk [vmem:[#allocation4 + $0x98] sm:$0xff] %vm801_vm6, %v7187_v37  ;;  %v789_v20 = vpop.f32.mrb[19].mxu0  ;;  %v3305_v28 = vrot.slane %v3303_v10, 5  ;;  %v1054_v10 = vld [vmem:[#allocation4 + $0x48] sm:$0xff] }
 0x1a5   : > { %819 = vst.msk [vmem:[#allocation4 + $0x88] sm:$0xff] %vm801_vm6, %v789_v20  ;;  %v3310_v29 = vrot.slane %v3308_v11, 4  ;;  %v3339_v11 = vrot.slane %v3337_v50, 5  ;;  %v1058_v49 = vld [vmem:[#allocation4 + $0x68] sm:$0xff] }
 0x1a6   : > { %7305 = vmatmul.mubr.msk.bf16.gmra.mrb[124].mxu0 %vm657_vm3, %v2682_v12  ;;  %v3311_v12 = vshll.u32 %v3280_v2, 16 }
 0x1a7   : > { %7308 = vmatprep.mubr.msk.bf16.mxu0 %vm657_vm3, %v2699_v55  ;;  %v1051_v55 = vld [vmem:[#allocation4 + $0x30] sm:$0xff] }
 0x1a8   : > { %v3313_v30 = vrot.slane %v3311_v12, 5  ;;  %v3344_v12 = vrot.slane %v3342_v51, 4 }
 0x1a9   : > { %v7192_v40 = vpop.f32.mrb[20].mxu0 }
 0x1aa   : > { %v1067_v45 = vadd.f32 %v7192_v40, %v1047_v41  ;;  %v966_v46 = vpop.f32.mrb[21].mxu0  ;;  %v3320_v40 = vshll.u32 %v3281_v18, 16  ;;  %v3325_v41 = vshrl.u32 %v3282_v25, 16  ;;  %v3368_v18 = vshrl.u32 %v3287_v7, 16 }
 0x1ab   : > { %v1065_v52 = vadd.f32 %v1045_v48, %v966_v46  ;;  %v7193_v53 = vpop.f32.mrb[22].mxu0  ;;  %v3314_v46 = vor.u32 %v3313_v30, %v3310_v29  ;;  %v3328_v48 = vshll.u32 %v3282_v25, 16  ;;  %v3379_v25 = vshll.u32 %v3288_v47, 16 }
 0x1ac   : > { %1087 = vst.msk [vmem:[#allocation4 + $0x10] sm:$0xff] %vm801_vm6, %v1067_v45  ;;  %v1068_v3 = vadd.f32 %v7193_v53, %v1048_v54  ;;  %v969_v60 = vpop.f32.mrb[23].mxu0  ;;  %v3306_v45 = vor.u32 %v3305_v28, %v3302_v24  ;;  %v1055_v54 = vld [vmem:[#allocation4 + $0x50] sm:$0xff]  ;;  %v3322_v57 = vrot.slane %v3320_v40, 5  ;;  %v3327_v58 = vrot.slane %v3325_v41, 4  ;;  %v1060_v41 = vld [vmem:[#allocation4 + $0x78] sm:$0xff] }
 0x1ad   : > { %1085 = vst.msk [vmem:[#allocation4] sm:$0xff] %vm801_vm6, %v1065_v52  ;;  %v1066_v13 = vadd.f32 %v1046_v61, %v969_v60  ;;  %v3345_v52 = vshll.u32 %v3284_v42, 16  ;;  %v1053_v60 = vld [vmem:[#allocation4 + $0x40] sm:$0xff]  ;;  %v2784_v61 = vsel %vm478_vm2, %v2775_v43, %v2783_v44  ;;  %v3330_v5 = vrot.slane %v3328_v48, 5 }
 0x1ae   : > { %1088 = vst.msk [vmem:[#allocation4 + $0x18] sm:$0xff] %vm801_vm6, %v1068_v3  ;;  %7309 = vmatmul.mubr.msk.bf16.gmra.mrb[128].mxu0 %vm657_vm3, %v2716_v56  ;;  %v3319_v56 = vrot.slane %v3317_v39, 4  ;;  %v3315_v4 = vsel %vm1125_vm5, %v3306_v45, %v3314_v46  ;;  %v3376_v24 = vshrl.u32 %v3288_v47, 16  ;;  %v3370_v36 = vrot.slane %v3368_v18, 4  ;;  %v3291_v45 = vld [vmem:[#allocation2 + $0x80] sm:$0xf0] }
 0x1af   : > { %1086 = vst.msk [vmem:[#allocation4 + $0x8] sm:$0xff] %vm801_vm6, %v1066_v13  ;;  %7312 = vmatprep.mubr.msk.bf16.mxu0 %vm657_vm3, %v2733_v62  ;;  %v3285_v62 = vld [vmem:[#allocation2 + $0x50] sm:$0xf0]  ;;  %v1056_v13 = vld [vmem:[#allocation4 + $0x58] sm:$0xff]  ;;  %v3347_v14 = vrot.slane %v3345_v52, 5  ;;  %v3381_v52 = vrot.slane %v3379_v25, 5 }
 0x1b0   : > { %v3351_v16 = vshrl.u32 %v3285_v62, 16  ;;  %v3378_v51 = vrot.slane %v3376_v24, 4  ;;  %v1064_v47 = vld [vmem:[#allocation4 + $0x98] sm:$0xff]  ;;  %v3295_v24 = vld [vmem:[#allocation2 + $0xa0] sm:$0xf0] }
 0x1b1   : > { %v7196_v37 = vpop.f32.mrb[24].mxu0  ;;  %v3348_v23 = vor.u32 %v3347_v14, %v3344_v12 }
 0x1b2   : > { %v1071_v19 = vadd.f32 %v7196_v37, %v1051_v55  ;;  %v982_v20 = vpop.f32.mrb[25].mxu0  ;;  %v3354_v37 = vshll.u32 %v3285_v62, 16  ;;  %v3359_v55 = vshrl.u32 %v3286_v63, 16  ;;  %v3353_v28 = vrot.slane %v3351_v16, 4  ;;  %v3294_v16 = vld [vmem:[#allocation2 + $0x98] sm:$0x1f] }
 0x1b3   : > { %v1069_v32 = vadd.f32 %v1049_v21, %v982_v20  ;;  %v7197_v26 = vpop.f32.mrb[26].mxu0  ;;  %v3331_v20 = vor.u32 %v3330_v5, %v3327_v58  ;;  %v3371_v21 = vshll.u32 %v3287_v7, 16  ;;  %v1063_v5 = vld [vmem:[#allocation4 + $0x90] sm:$0xff] }
 0x1b4   : > { %1091 = vst.msk [vmem:[#allocation4 + $0x30] sm:$0xff] %vm801_vm6, %v1071_v19  ;;  %v1072_v31 = vadd.f32 %v7197_v26, %v1052_v27  ;;  %v985_v33 = vpop.f32.mrb[27].mxu0  ;;  %v3323_v19 = vor.u32 %v3322_v57, %v3319_v56  ;;  %v1059_v27 = vld [vmem:[#allocation4 + $0x70] sm:$0xff]  ;;  %v3356_v29 = vrot.slane %v3354_v37, 5  ;;  %v3361_v30 = vrot.slane %v3359_v55, 4 }
 0x1b5   : > { %1089 = vst.msk [vmem:[#allocation4 + $0x20] sm:$0xff] %vm801_vm6, %v1069_v32  ;;  %v1070_v38 = vadd.f32 %v1050_v34, %v985_v33  ;;  %v3289_v32 = vld [vmem:[#allocation2 + $0x70] sm:$0xf0]  ;;  %v1057_v34 = vld [vmem:[#allocation4 + $0x60] sm:$0xff]  ;;  %v3373_v43 = vrot.slane %v3371_v21, 5 }
 0x1b6   : > { %1092 = vst.msk [vmem:[#allocation4 + $0x38] sm:$0xff] %vm801_vm6, %v1072_v31  ;;  %7313 = vmatmul.mubr.msk.bf16.gmra.mrb[132].mxu0 %vm657_vm3, %v2750_v22  ;;  %v3340_v22 = vor.u32 %v3339_v11, %v3336_v6  ;;  %v3332_v42 = vsel %vm1125_vm5, %v3323_v19, %v3331_v20  ;;  %v3385_v44 = vshrl.u32 %v3289_v32, 16  ;;  %v3388_v56 = vshll.u32 %v3289_v32, 16  ;;  %v1061_v11 = vld [vmem:[#allocation4 + $0x80] sm:$0xff] }
 0x1b7   : > { %1090 = vst.msk [vmem:[#allocation4 + $0x28] sm:$0xff] %vm801_vm6, %v1070_v38  ;;  %7316 = vmatprep.mubr.msk.bf16.mxu0 %vm657_vm3, %v2767_v35  ;;  %v3364_v35 = vrot.slane %v3362_v17, 5  ;;  %v3290_v38 = vld [vmem:[#allocation2 + $0x78] sm:$0x1f]  ;;  %v3357_v58 = vor.u32 %v3356_v29, %v3353_v28  ;;  %v3427_v29 = vshrl.u32 %v3294_v16, 16 }
 0x1b8   : > { %v3349_v50 = vsel %vm1125_vm5, %v3340_v22, %v3348_v23  ;;  %v3393_v57 = vshrl.u32 %v3290_v38, 16  ;;  %v3390_v6 = vrot.slane %v3388_v56, 5  ;;  %v1062_v22 = vld [vmem:[#allocation4 + $0x88] sm:$0xff] }
 0x1b9   : > { %v7200_v53 = vpop.f32.mrb[28].mxu0 }
 0x1ba   : > { %v1075_v59 = vadd.f32 %v7200_v53, %v1055_v54  ;;  %v998_v3 = vpop.f32.mrb[29].mxu0  ;;  %v3292_v53 = vld [vmem:[#allocation2 + $0x88] sm:$0x1f]  ;;  %v3395_v7 = vrot.slane %v3393_v57, 4 }
 0x1bb   : > { %v1073_v1 = vadd.f32 %v1053_v60, %v998_v3  ;;  %v7201_v2 = vpop.f32.mrb[30].mxu0  ;;  %v3396_v3 = vshll.u32 %v3290_v38, 16  ;;  %v3402_v60 = vshrl.u32 %v3291_v45, 16  ;;  %v3410_v62 = vshrl.u32 %v3292_v53, 16 }
 0x1bc   : > { %1095 = vst.msk [vmem:[#allocation4 + $0x50] sm:$0xff] %vm801_vm6, %v1075_v59  ;;  %v1076_v8 = vadd.f32 %v7201_v2, %v1056_v13  ;;  %v1001_v9 = vpop.f32.mrb[31].mxu0  ;;  %v3365_v59 = vor.u32 %v3364_v35, %v3361_v30  ;;  %v3413_v63 = vshll.u32 %v3292_v53, 16  ;;  %v3382_v2 = vor.u32 %v3381_v52, %v3378_v51  ;;  %v1451_v53 = vld [vmem:[#allocation4 + $0x18] sm:$0xff] }
 0x1bd   : > { %1093 = vst.msk [vmem:[#allocation4 + $0x40] sm:$0xff] %vm801_vm6, %v1073_v1  ;;  %v1074_v15 = vadd.f32 %v1054_v10, %v1001_v9  ;;  %v3374_v1 = vor.u32 %v3373_v43, %v3370_v36  ;;  %v3387_v13 = vrot.slane %v3385_v44, 4  ;;  %v3398_v14 = vrot.slane %v3396_v3, 5 }
 0x1be   : > { %1096 = vst.msk [vmem:[#allocation4 + $0x58] sm:$0xff] %vm801_vm6, %v1076_v8  ;;  %7317 = vmatmul.mubr.msk.bf16.gmra.mrb[136].mxu0 %vm657_vm3, %v2784_v61  ;;  %v3405_v61 = vshll.u32 %v3291_v45, 16  ;;  %v3293_v8 = vld [vmem:[#allocation2 + $0x90] sm:$0xf0]  ;;  %v3366_v12 = vsel %vm1125_vm5, %v3357_v58, %v3365_v59  ;;  %v3412_v18 = vrot.slane %v3410_v62, 4  ;;  %v3415_v19 = vrot.slane %v3413_v63, 5 }
 0x1bf   : > { %1094 = vst.msk [vmem:[#allocation4 + $0x48] sm:$0xff] %vm801_vm6, %v1074_v15  ;;  %7344 = vmatprep.mubr.msk.bf16.mxu0 %vm657_vm3, %v3315_v4  ;;  %v3404_v15 = vrot.slane %v3402_v60, 4  ;;  %v3383_v23 = vsel %vm1125_vm5, %v3374_v1, %v3382_v2  ;;  %v3419_v32 = vshrl.u32 %v3293_v8, 16  ;;  %v3391_v28 = vor.u32 %v3390_v6, %v3387_v13  ;;  %v3298_v58 = vld [vmem:[#allocation2 + $0xb8] sm:$0x1f]  ;;  %v1449_v60 = vld [vmem:[#allocation4 + $0x8] sm:$0xff] }
 0x1c0   : > { %v3407_v17 = vrot.slane %v3405_v61, 5  ;;  %v3430_v30 = vshll.u32 %v3294_v16, 16  ;;  %v3436_v35 = vshrl.u32 %v3295_v24, 16  ;;  %v3439_v36 = vshll.u32 %v3295_v24, 16 }
 0x1c1   : > { %v7204_v26 = vpop.f32.mrb[32].mxu0  ;;  %v3461_v6 = vshrl.u32 %v3298_v58, 16 }
 0x1c2   : > { %v1079_v31 = vadd.f32 %v7204_v26, %v1059_v27  ;;  %v1014_v33 = vpop.f32.mrb[33].mxu0  ;;  %v3422_v26 = vshll.u32 %v3293_v8, 16  ;;  %v3296_v27 = vld [vmem:[#allocation2 + $0xa8] sm:$0x1f]  ;;  %v3438_v57 = vrot.slane %v3436_v35, 4  ;;  %v3441_v61 = vrot.slane %v3439_v36, 5 }
 0x1c3   : > { %v1077_v39 = vadd.f32 %v1057_v34, %v1014_v33  ;;  %v7205_v40 = vpop.f32.mrb[34].mxu0  ;;  %v3408_v33 = vor.u32 %v3407_v17, %v3404_v15  ;;  %v3416_v34 = vor.u32 %v3415_v19, %v3412_v18  ;;  %v3444_v38 = vshrl.u32 %v3296_v27, 16  ;;  %v1452_v15 = vld [vmem:[#allocation4 + $0x20] sm:$0xff]  ;;  %v1455_v17 = vld [vmem:[#allocation4 + $0x38] sm:$0xff] }
 0x1c4   : > { %1099 = vst.msk [vmem:[#allocation4 + $0x70] sm:$0xff] %vm801_vm6, %v1079_v31  ;;  %v1080_v46 = vadd.f32 %v7205_v40, %v1060_v41  ;;  %v1017_v48 = vpop.f32.mrb[35].mxu0  ;;  %v3399_v31 = vor.u32 %v3398_v14, %v3395_v7  ;;  %v1450_v41 = vld [vmem:[#allocation4 + $0x10] sm:$0xff]  ;;  %v3424_v43 = vrot.slane %v3422_v26, 5  ;;  %v3464_v7 = vshll.u32 %v3298_v58, 16 }
 0x1c5   : > { %1097 = vst.msk [vmem:[#allocation4 + $0x60] sm:$0xff] %vm801_vm6, %v1077_v39  ;;  %v1078_v54 = vadd.f32 %v1058_v49, %v1017_v48  ;;  %v3447_v39 = vshll.u32 %v3296_v27, 16  ;;  %v3429_v48 = vrot.slane %v3427_v29, 4  ;;  %v3432_v49 = vrot.slane %v3430_v30, 5  ;;  %v1459_v35 = vld [vmem:[#allocation4 + $0x58] sm:$0xff] }
 0x1c6   : > { %1100 = vst.msk [vmem:[#allocation4 + $0x78] sm:$0xff] %vm801_vm6, %v1080_v46  ;;  %7345 = vmatmul.mubr.msk.bf16.vlgmr.msra.gmra.mrb[140].mxu0 %vm657_vm3, %v3332_v42  ;;  %v3421_v42 = vrot.slane %v3419_v32, 4  ;;  %v1448_v46 = vld [vmem:[#allocation4] sm:$0xff]  ;;  %v3417_v56 = vsel %vm1125_vm5, %v3408_v33, %v3416_v34  ;;  %v3446_v62 = vrot.slane %v3444_v38, 4  ;;  %v3442_v8 = vor.u32 %v3441_v61, %v3438_v57 }
 0x1c7   : > { %1098 = vst.msk [vmem:[#allocation4 + $0x68] sm:$0xff] %vm801_vm6, %v1078_v54  ;;  %7348 = vmatprep.mubr.msk.bf16.mxu0 %vm657_vm3, %v3349_v50  ;;  %v3297_v50 = vld [vmem:[#allocation2 + $0xb0] sm:$0xf0]  ;;  %v3400_v54 = vsel %vm1125_vm5, %v3391_v28, %v3399_v31  ;;  %v3449_v63 = vrot.slane %v3447_v39, 5  ;;  %v3433_v13 = vor.u32 %v3432_v49, %v3429_v48  ;;  %v3463_v19 = vrot.slane %v3461_v6, 4  ;;  %v1456_v31 = vld [vmem:[#allocation4 + $0x40] sm:$0xff] }
 0x1c8   : > { %v3425_v2 = vor.u32 %v3424_v43, %v3421_v42  ;;  %v1458_v28 = vld [vmem:[#allocation4 + $0x50] sm:$0xff] }
 0x1c9   : > { %v7208_v4 = vpop.f32.mrb[36].mxu0 }
 0x1ca   : > { %v1083_v9 = vadd.f32 %v7208_v4, %v1063_v5  ;;  %v1030_v10 = vpop.f32.mrb[37].mxu0  ;;  %v3453_v4 = vshrl.u32 %v3297_v50, 16  ;;  %v3456_v5 = vshll.u32 %v3297_v50, 16  ;;  %v3434_v16 = vsel %vm1125_vm5, %v3425_v2, %v3433_v13 }
 0x1cb   : > { %v1081_v37 = vadd.f32 %v1061_v11, %v1030_v10  ;;  %v7209_v55 = vpop.f32.mrb[38].mxu0  ;;  %v1454_v11 = vld [vmem:[#allocation4 + $0x30] sm:$0xff] }
 0x1cc   : > { %1103 = vst.msk [vmem:[#allocation4 + $0x90] sm:$0xff] %vm801_vm6, %v1083_v9  ;;  %v1084_v20 = vadd.f32 %v7209_v55, %v1064_v47  ;;  %v1033_v21 = vpop.f32.mrb[39].mxu0  ;;  %v3450_v9 = vor.u32 %v3449_v63, %v3446_v62  ;;  %v3458_v18 = vrot.slane %v3456_v5, 5  ;;  %v1462_v43 = vld [vmem:[#allocation4 + $0x70] sm:$0xff] }
 0x1cd   : > { %1101 = vst.msk [vmem:[#allocation4 + $0x80] sm:$0xff] %vm801_vm6, %v1081_v37  ;;  %v1082_v25 = vadd.f32 %v1062_v22, %v1033_v21  ;;  %v3455_v37 = vrot.slane %v3453_v4, 4  ;;  %v1463_v50 = vld [vmem:[#allocation4 + $0x78] sm:$0xff] }
 0x1ce   : > { %1104 = vst.msk [vmem:[#allocation4 + $0x98] sm:$0xff] %vm801_vm6, %v1084_v20  ;;  %7349 = vmatmul.mubr.msk.bf16.gmra.mrb[144].mxu0 %vm657_vm3, %v3366_v12  ;;  %v3466_v20 = vrot.slane %v3464_v7, 5  ;;  %v3451_v24 = vsel %vm1125_vm5, %v3442_v8, %v3450_v9 }
 0x1cf   : > { %1102 = vst.msk [vmem:[#allocation4 + $0x88] sm:$0xff] %vm801_vm6, %v1082_v25  ;;  %7352 = vmatprep.mubr.msk.bf16.mxu0 %vm657_vm3, %v3383_v23  ;;  %v1453_v23 = vld [vmem:[#allocation4 + $0x28] sm:$0xff]  ;;  %v3459_v32 = vor.u32 %v3458_v18, %v3455_v37 }
 0x1d0   : > { %v3467_v26 = vor.u32 %v3466_v20, %v3463_v19 }
 0x1d1   : > { %v7214_v40 = vpop.f32.mrb[40].mxu0 }
 0x1d2   : > { %v1470_v44 = vadd.f32 %v7214_v40, %v1450_v41  ;;  %v1369_v45 = vpop.f32.mrb[41].mxu0  ;;  %v3468_v36 = vsel %vm1125_vm5, %v3459_v32, %v3467_v26  ;;  %v1457_v40 = vld [vmem:[#allocation4 + $0x48] sm:$0xff] }
 0x1d3   : > { %v1468_v51 = vadd.f32 %v1448_v46, %v1369_v45  ;;  %v7215_v52 = vpop.f32.mrb[42].mxu0  ;;  %v1460_v46 = vld [vmem:[#allocation4 + $0x60] sm:$0xff]  ;;  %v1466_v57 = vld [vmem:[#allocation4 + $0x90] sm:$0xff] }
 0x1d4   : > { %1490 = vst.msk [vmem:[#allocation4 + $0x10] sm:$0xff] %vm801_vm6, %v1470_v44  ;;  %v1471_v59 = vadd.f32 %v7215_v52, %v1451_v53  ;;  %v1372_v3 = vpop.f32.mrb[43].mxu0  ;;  %v1461_v53 = vld [vmem:[#allocation4 + $0x68] sm:$0xff] }
 0x1d5   : > { %1488 = vst.msk [vmem:[#allocation4] sm:$0xff] %vm801_vm6, %v1468_v51  ;;  %v1469_v1 = vadd.f32 %v1449_v60, %v1372_v3  ;;  %v1464_v3 = vld [vmem:[#allocation4 + $0x80] sm:$0xff]  ;;  %v1467_v62 = vld [vmem:[#allocation4 + $0x98] sm:$0xff] }
 0x1d6   : > { %1491 = vst.msk [vmem:[#allocation4 + $0x18] sm:$0xff] %vm801_vm6, %v1471_v59  ;;  %7353 = vmatmul.mubr.msk.bf16.gmra.mrb[148].mxu0 %vm657_vm3, %v3400_v54  ;;  %v1465_v2 = vld [vmem:[#allocation4 + $0x88] sm:$0xff] }
 0x1d7   : > { %1489 = vst.msk [vmem:[#allocation4 + $0x8] sm:$0xff] %vm801_vm6, %v1469_v1  ;;  %7356 = vmatprep.mubr.msk.bf16.mxu0 %vm657_vm3, %v3417_v56 }
 0x1d9   : > { %v7218_v10 = vpop.f32.mrb[44].mxu0 }
 0x1da   : > { %v1474_v12 = vadd.f32 %v7218_v10, %v1454_v11  ;;  %v1385_v14 = vpop.f32.mrb[45].mxu0 }
 0x1db   : > { %v1472_v55 = vadd.f32 %v1452_v15, %v1385_v14  ;;  %v7219_v47 = vpop.f32.mrb[46].mxu0  ;;  %v1853_v5 = vld [vmem:[#allocation4 + $0x10] sm:$0xff] }
 0x1dc   : > { %1494 = vst.msk [vmem:[#allocation4 + $0x30] sm:$0xff] %vm801_vm6, %v1474_v12  ;;  %v1475_v21 = vadd.f32 %v7219_v47, %v1455_v17  ;;  %v1388_v22 = vpop.f32.mrb[47].mxu0  ;;  %v1851_v8 = vld [vmem:[#allocation4] sm:$0xff] }
 0x1dd   : > { %1492 = vst.msk [vmem:[#allocation4 + $0x20] sm:$0xff] %vm801_vm6, %v1472_v55  ;;  %v1473_v25 = vadd.f32 %v1453_v23, %v1388_v22  ;;  %v1854_v11 = vld [vmem:[#allocation4 + $0x18] sm:$0xff] }
 0x1de   : > { %1495 = vst.msk [vmem:[#allocation4 + $0x38] sm:$0xff] %vm801_vm6, %v1475_v21  ;;  %7357 = vmatmul.mubr.msk.bf16.gmra.mrb[152].mxu0 %vm657_vm3, %v3434_v16  ;;  %v1852_v15 = vld [vmem:[#allocation4 + $0x8] sm:$0xff] }
 0x1df   : > { %1493 = vst.msk [vmem:[#allocation4 + $0x28] sm:$0xff] %vm801_vm6, %v1473_v25  ;;  %7360 = vmatprep.mubr.msk.bf16.mxu0 %vm657_vm3, %v3451_v24 }
 0x1e1   : > { %v7222_v27 = vpop.f32.mrb[48].mxu0 }
 0x1e2   : > { %v1478_v29 = vadd.f32 %v7222_v27, %v1458_v28  ;;  %v1401_v30 = vpop.f32.mrb[49].mxu0 }
 0x1e3   : > { %v1476_v33 = vadd.f32 %v1456_v31, %v1401_v30  ;;  %v7223_v34 = vpop.f32.mrb[50].mxu0  ;;  %v1857_v55 = vld [vmem:[#allocation4 + $0x30] sm:$0xff] }
 0x1e4   : > { %1498 = vst.msk [vmem:[#allocation4 + $0x50] sm:$0xff] %vm801_vm6, %v1478_v29  ;;  %v1479_v38 = vadd.f32 %v7223_v34, %v1459_v35  ;;  %v1404_v39 = vpop.f32.mrb[51].mxu0  ;;  %v1855_v18 = vld [vmem:[#allocation4 + $0x20] sm:$0xff] }
 0x1e5   : > { %1496 = vst.msk [vmem:[#allocation4 + $0x40] sm:$0xff] %vm801_vm6, %v1476_v33  ;;  %v1477_v41 = vadd.f32 %v1457_v40, %v1404_v39  ;;  %v1858_v21 = vld [vmem:[#allocation4 + $0x38] sm:$0xff] }
 0x1e6   : > { %1499 = vst.msk [vmem:[#allocation4 + $0x58] sm:$0xff] %vm801_vm6, %v1479_v38  ;;  %7361 = vmatmul.mubr.msk.bf16.gmra.mrb[156].mxu0 %vm657_vm3, %v3468_v36  ;;  %v8591_v22 = vpop.f32.mrb[0].mxu1  ;;  %v1856_v25 = vld [vmem:[#allocation4 + $0x28] sm:$0xff] }
 0x1e7   : > { %1497 = vst.msk [vmem:[#allocation4 + $0x48] sm:$0xff] %vm801_vm6, %v1477_v41  ;;  %v8594_v32 = vpop.f32.mrb[1].mxu1 }
 0x1e8   : > { %v8597_v27 = vpop.f32.mrb[2].mxu1 }
 0x1e9   : > { %v7226_v42 = vpop.f32.mrb[52].mxu0  ;;  %v8600_v28 = vpop.f32.mrb[3].mxu1 }
 0x1ea   : > { %v1482_v44 = vadd.f32 %v7226_v42, %v1462_v43  ;;  %v1417_v45 = vpop.f32.mrb[53].mxu0 }
 0x1eb   : > { %v1480_v48 = vadd.f32 %v1460_v46, %v1417_v45  ;;  %v7227_v49 = vpop.f32.mrb[54].mxu0  ;;  %v1861_v30 = vld [vmem:[#allocation4 + $0x50] sm:$0xff] }
 0x1ec   : > { %1502 = vst.msk [vmem:[#allocation4 + $0x70] sm:$0xff] %vm801_vm6, %v1482_v44  ;;  %v1483_v51 = vadd.f32 %v7227_v49, %v1463_v50  ;;  %v1420_v52 = vpop.f32.mrb[55].mxu0  ;;  %v1859_v34 = vld [vmem:[#allocation4 + $0x40] sm:$0xff] }
 0x1ed   : > { %1500 = vst.msk [vmem:[#allocation4 + $0x60] sm:$0xff] %vm801_vm6, %v1480_v48  ;;  %v1481_v54 = vadd.f32 %v1461_v53, %v1420_v52  ;;  %v1862_v38 = vld [vmem:[#allocation4 + $0x58] sm:$0xff] }
 0x1ee   : > { %1503 = vst.msk [vmem:[#allocation4 + $0x78] sm:$0xff] %vm801_vm6, %v1483_v51  ;;  %v1860_v42 = vld [vmem:[#allocation4 + $0x48] sm:$0xff] }
 0x1ef   : > { %1501 = vst.msk [vmem:[#allocation4 + $0x68] sm:$0xff] %vm801_vm6, %v1481_v54 }
 0x1f1   : > { %v7230_v56 = vpop.f32.mrb[56].mxu0 }
 0x1f2   : > { %v1486_v58 = vadd.f32 %v7230_v56, %v1466_v57  ;;  %v1433_v59 = vpop.f32.mrb[57].mxu0 }
 0x1f3   : > { %v1484_v60 = vadd.f32 %v1464_v3, %v1433_v59  ;;  %v7231_v61 = vpop.f32.mrb[58].mxu0  ;;  %v1865_v49 = vld [vmem:[#allocation4 + $0x70] sm:$0xff] }
 0x1f4   : > { %1506 = vst.msk [vmem:[#allocation4 + $0x90] sm:$0xff] %vm801_vm6, %v1486_v58  ;;  %v1487_v63 = vadd.f32 %v7231_v61, %v1467_v62  ;;  %v1436_v1 = vpop.f32.mrb[59].mxu0  ;;  %v1863_v52 = vld [vmem:[#allocation4 + $0x60] sm:$0xff] }
 0x1f5   : > { %1504 = vst.msk [vmem:[#allocation4 + $0x80] sm:$0xff] %vm801_vm6, %v1484_v60  ;;  %v1485_v13 = vadd.f32 %v1465_v2, %v1436_v1  ;;  %v1866_v56 = vld [vmem:[#allocation4 + $0x78] sm:$0xff] }
 0x1f6   : > { %1507 = vst.msk [vmem:[#allocation4 + $0x98] sm:$0xff] %vm801_vm6, %v1487_v63  ;;  %v1864_v3 = vld [vmem:[#allocation4 + $0x68] sm:$0xff] }
 0x1f7   : > { %1505 = vst.msk [vmem:[#allocation4 + $0x88] sm:$0xff] %vm801_vm6, %v1485_v13 }
 0x1f9   : > { %v7236_v4 = vpop.f32.mrb[60].mxu0 }
 0x1fa   : > { %v1873_v6 = vadd.f32 %v7236_v4, %v1853_v5  ;;  %v1772_v7 = vpop.f32.mrb[61].mxu0 }
 0x1fb   : > { %v1871_v9 = vadd.f32 %v1851_v8, %v1772_v7  ;;  %v7237_v10 = vpop.f32.mrb[62].mxu0  ;;  %v1869_v2 = vld [vmem:[#allocation4 + $0x90] sm:$0xff] }
 0x1fc   : > { %1893 = vst.msk [vmem:[#allocation4 + $0x10] sm:$0xff] %vm801_vm6, %v1873_v6  ;;  %v1874_v12 = vadd.f32 %v7237_v10, %v1854_v11  ;;  %v1775_v14 = vpop.f32.mrb[63].mxu0  ;;  %v1867_v5 = vld [vmem:[#allocation4 + $0x80] sm:$0xff] }
 0x1fd   : > { %1891 = vst.msk [vmem:[#allocation4] sm:$0xff] %vm801_vm6, %v1871_v9  ;;  %v1872_v16 = vadd.f32 %v1852_v15, %v1775_v14  ;;  %v8603_v39 = vpop.f32.mrb[4].mxu1  ;;  %v1870_v8 = vld [vmem:[#allocation4 + $0x98] sm:$0xff] }
 0x1fe   : > { %1894 = vst.msk [vmem:[#allocation4 + $0x18] sm:$0xff] %vm801_vm6, %v1874_v12  ;;  %v8606_v43 = vpop.f32.mrb[5].mxu1  ;;  %v1868_v12 = vld [vmem:[#allocation4 + $0x88] sm:$0xff] }
 0x1ff   : > { %1892 = vst.msk [vmem:[#allocation4 + $0x8] sm:$0xff] %vm801_vm6, %v1872_v16  ;;  %v8609_v45 = vpop.f32.mrb[6].mxu1 }
 0x200   : > { %v8612_v46 = vpop.f32.mrb[7].mxu1 }
 0x201   : > { %v7240_v37 = vpop.f32.mrb[64].mxu0 }
 0x202   : > { %v1877_v47 = vadd.f32 %v7240_v37, %v1857_v55  ;;  %v1788_v17 = vpop.f32.mrb[65].mxu0 }
 0x203   : > { %v1875_v19 = vadd.f32 %v1855_v18, %v1788_v17  ;;  %v7241_v20 = vpop.f32.mrb[66].mxu0 }
 0x204   : > { %1897 = vst.msk [vmem:[#allocation4 + $0x30] sm:$0xff] %vm801_vm6, %v1877_v47  ;;  %v1878_v23 = vadd.f32 %v7241_v20, %v1858_v21  ;;  %v1791_v24 = vpop.f32.mrb[67].mxu0  ;;  %v2135_v47 = vld [vmem:[#allocation4 + $0x10] sm:$0xff] }
 0x205   : > { %1895 = vst.msk [vmem:[#allocation4 + $0x20] sm:$0xff] %vm801_vm6, %v1875_v19  ;;  %v1876_v26 = vadd.f32 %v1856_v25, %v1791_v24  ;;  %v8615_v57 = vpop.f32.mrb[8].mxu1  ;;  %v2133_v19 = vld [vmem:[#allocation4] sm:$0xff] }
 0x206   : > { %1898 = vst.msk [vmem:[#allocation4 + $0x38] sm:$0xff] %vm801_vm6, %v1878_v23  ;;  %v8618_v60 = vpop.f32.mrb[9].mxu1  ;;  %v2136_v23 = vld [vmem:[#allocation4 + $0x18] sm:$0xff] }
 0x207   : > { %1896 = vst.msk [vmem:[#allocation4 + $0x28] sm:$0xff] %vm801_vm6, %v1876_v26  ;;  %v8621_v62 = vpop.f32.mrb[10].mxu1 }
 0x208   : > { %v8624_v63 = vpop.f32.mrb[11].mxu1 }
 0x209   : > { %v7244_v29 = vpop.f32.mrb[68].mxu0 }
 0x20a   : > { %v1881_v31 = vadd.f32 %v7244_v29, %v1861_v30  ;;  %v1804_v33 = vpop.f32.mrb[69].mxu0  ;;  %v2134_v29 = vld [vmem:[#allocation4 + $0x8] sm:$0xff] }
 0x20b   : > { %v1879_v35 = vadd.f32 %v1859_v34, %v1804_v33  ;;  %v7245_v36 = vpop.f32.mrb[70].mxu0 }
 0x20c   : > { %1901 = vst.msk [vmem:[#allocation4 + $0x50] sm:$0xff] %vm801_vm6, %v1881_v31  ;;  %v1882_v40 = vadd.f32 %v7245_v36, %v1862_v38  ;;  %v1807_v41 = vpop.f32.mrb[71].mxu0  ;;  %v2139_v36 = vld [vmem:[#allocation4 + $0x30] sm:$0xff] }
 0x20d   : > { %1899 = vst.msk [vmem:[#allocation4 + $0x40] sm:$0xff] %vm801_vm6, %v1879_v35  ;;  %v1880_v44 = vadd.f32 %v1860_v42, %v1807_v41  ;;  %v8627_v9 = vpop.f32.mrb[12].mxu1  ;;  %v2137_v41 = vld [vmem:[#allocation4 + $0x20] sm:$0xff] }
 0x20e   : > { %1902 = vst.msk [vmem:[#allocation4 + $0x58] sm:$0xff] %vm801_vm6, %v1882_v40  ;;  %v8630_v14 = vpop.f32.mrb[13].mxu1 }
 0x20f   : > { %1900 = vst.msk [vmem:[#allocation4 + $0x48] sm:$0xff] %vm801_vm6, %v1880_v44  ;;  %v8633_v16 = vpop.f32.mrb[14].mxu1 }
 0x210   : > { %v8636_v37 = vpop.f32.mrb[15].mxu1 }
 0x211   : > { %v7248_v48 = vpop.f32.mrb[72].mxu0 }
 0x212   : > { %v1885_v50 = vadd.f32 %v7248_v48, %v1865_v49  ;;  %v1820_v51 = vpop.f32.mrb[73].mxu0  ;;  %v2140_v48 = vld [vmem:[#allocation4 + $0x38] sm:$0xff] }
 0x213   : > { %v1883_v53 = vadd.f32 %v1863_v52, %v1820_v51  ;;  %v7249_v54 = vpop.f32.mrb[74].mxu0  ;;  %v2138_v51 = vld [vmem:[#allocation4 + $0x28] sm:$0xff] }
 0x214   : > { %1905 = vst.msk [vmem:[#allocation4 + $0x70] sm:$0xff] %vm801_vm6, %v1885_v50  ;;  %v1886_v58 = vadd.f32 %v7249_v54, %v1866_v56  ;;  %v1823_v59 = vpop.f32.mrb[75].mxu0  ;;  %v2143_v54 = vld [vmem:[#allocation4 + $0x50] sm:$0xff] }
 0x215   : > { %1903 = vst.msk [vmem:[#allocation4 + $0x60] sm:$0xff] %vm801_vm6, %v1883_v53  ;;  %v1884_v61 = vadd.f32 %v1864_v3, %v1823_v59  ;;  %v8639_v24 = vpop.f32.mrb[16].mxu1  ;;  %v2141_v59 = vld [vmem:[#allocation4 + $0x40] sm:$0xff]  ;;  %v2144_v0 = vld [vmem:[#allocation4 + $0x58] sm:$0xff] }
 0x216   : > { %1906 = vst.msk [vmem:[#allocation4 + $0x78] sm:$0xff] %vm801_vm6, %v1886_v58  ;;  %v8642_v30 = vpop.f32.mrb[17].mxu1 }
 0x217   : > { %1904 = vst.msk [vmem:[#allocation4 + $0x68] sm:$0xff] %vm801_vm6, %v1884_v61  ;;  %v8645_v33 = vpop.f32.mrb[18].mxu1 }
 0x218   : > { %v8648_v34 = vpop.f32.mrb[19].mxu1 }
 0x219   : > { %v7252_v1 = vpop.f32.mrb[76].mxu0 }
 0x21a   : > { %v1889_v13 = vadd.f32 %v7252_v1, %v1869_v2  ;;  %v1836_v4 = vpop.f32.mrb[77].mxu0 }
 0x21b   : > { %v1887_v6 = vadd.f32 %v1867_v5, %v1836_v4  ;;  %v7253_v7 = vpop.f32.mrb[78].mxu0 }
 0x21c   : > { %1909 = vst.msk [vmem:[#allocation4 + $0x90] sm:$0xff] %vm801_vm6, %v1889_v13  ;;  %v1890_v10 = vadd.f32 %v7253_v7, %v1870_v8  ;;  %v1839_v11 = vpop.f32.mrb[79].mxu0  ;;  %v2142_v13 = vld [vmem:[#allocation4 + $0x48] sm:$0xff] }
 0x21d   : > { %1907 = vst.msk [vmem:[#allocation4 + $0x80] sm:$0xff] %vm801_vm6, %v1887_v6  ;;  %v1888_v15 = vadd.f32 %v1868_v12, %v1839_v11  ;;  %v2147_v6 = vld [vmem:[#allocation4 + $0x70] sm:$0xff] }
 0x21e   : > { %1910 = vst.msk [vmem:[#allocation4 + $0x98] sm:$0xff] %vm801_vm6, %v1890_v10  ;;  %v2145_v10 = vld [vmem:[#allocation4 + $0x60] sm:$0xff] }
 0x21f   : > { %1908 = vst.msk [vmem:[#allocation4 + $0x88] sm:$0xff] %vm801_vm6, %v1888_v15  ;;  %v2148_v15 = vld [vmem:[#allocation4 + $0x78] sm:$0xff] }
 0x221   : > { %v7258_v55 = vpop.f32.mrb[80].mxu0 }
 0x222   : > { %v2155_v17 = vadd.f32 %v7258_v55, %v2135_v47  ;;  %v2054_v18 = vpop.f32.mrb[81].mxu0 }
 0x223   : > { %v2153_v20 = vadd.f32 %v2133_v19, %v2054_v18  ;;  %v7259_v21 = vpop.f32.mrb[82].mxu0 }
 0x224   : > { %2175 = vst.msk [vmem:[#allocation4 + $0x10] sm:$0xff] %vm801_vm6, %v2155_v17  ;;  %v2156_v25 = vadd.f32 %v7259_v21, %v2136_v23  ;;  %v2057_v26 = vpop.f32.mrb[83].mxu0  ;;  %v2146_v17 = vld [vmem:[#allocation4 + $0x68] sm:$0xff] }
 0x225   : > { %2173 = vst.msk [vmem:[#allocation4] sm:$0xff] %vm801_vm6, %v2153_v20  ;;  %v2154_v31 = vadd.f32 %v2134_v29, %v2057_v26  ;;  %v2151_v20 = vld [vmem:[#allocation4 + $0x90] sm:$0xff] }
 0x226   : > { %2176 = vst.msk [vmem:[#allocation4 + $0x18] sm:$0xff] %vm801_vm6, %v2156_v25  ;;  %v2149_v25 = vld [vmem:[#allocation4 + $0x80] sm:$0xff] }
 0x227   : > { %2174 = vst.msk [vmem:[#allocation4 + $0x8] sm:$0xff] %vm801_vm6, %v2154_v31  ;;  %v2152_v31 = vld [vmem:[#allocation4 + $0x98] sm:$0xff] }
 0x229   : > { %v7262_v35 = vpop.f32.mrb[84].mxu0 }
 0x22a   : > { %v2159_v38 = vadd.f32 %v7262_v35, %v2139_v36  ;;  %v2070_v40 = vpop.f32.mrb[85].mxu0 }
 0x22b   : > { %v2157_v42 = vadd.f32 %v2137_v41, %v2070_v40  ;;  %v7263_v44 = vpop.f32.mrb[86].mxu0 }
 0x22c   : > { %2179 = vst.msk [vmem:[#allocation4 + $0x30] sm:$0xff] %vm801_vm6, %v2159_v38  ;;  %v2160_v49 = vadd.f32 %v7263_v44, %v2140_v48  ;;  %v2073_v50 = vpop.f32.mrb[87].mxu0  ;;  %v2150_v38 = vld [vmem:[#allocation4 + $0x88] sm:$0xff] }
 0x22d   : > { %2177 = vst.msk [vmem:[#allocation4 + $0x20] sm:$0xff] %vm801_vm6, %v2157_v42  ;;  %v2158_v52 = vadd.f32 %v2138_v51, %v2073_v50  ;;  %v2537_v42 = vld [vmem:[#allocation4 + $0x10] sm:$0xff] }
 0x22e   : > { %2180 = vst.msk [vmem:[#allocation4 + $0x38] sm:$0xff] %vm801_vm6, %v2160_v49  ;;  %v2535_v49 = vld [vmem:[#allocation4] sm:$0xff] }
 0x22f   : > { %2178 = vst.msk [vmem:[#allocation4 + $0x28] sm:$0xff] %vm801_vm6, %v2158_v52  ;;  %v2538_v52 = vld [vmem:[#allocation4 + $0x18] sm:$0xff] }
 0x231   : > { %v7266_v53 = vpop.f32.mrb[88].mxu0 }
 0x232   : > { %v2163_v56 = vadd.f32 %v7266_v53, %v2143_v54  ;;  %v2086_v58 = vpop.f32.mrb[89].mxu0 }
 0x233   : > { %v2161_v3 = vadd.f32 %v2141_v59, %v2086_v58  ;;  %v7267_v61 = vpop.f32.mrb[90].mxu0 }
 0x234   : > { %2183 = vst.msk [vmem:[#allocation4 + $0x50] sm:$0xff] %vm801_vm6, %v2163_v56  ;;  %v2164_v1 = vadd.f32 %v7267_v61, %v2144_v0  ;;  %v2089_v2 = vpop.f32.mrb[91].mxu0  ;;  %v2536_v56 = vld [vmem:[#allocation4 + $0x8] sm:$0xff] }
 0x235   : > { %2181 = vst.msk [vmem:[#allocation4 + $0x40] sm:$0xff] %vm801_vm6, %v2161_v3  ;;  %v2162_v4 = vadd.f32 %v2142_v13, %v2089_v2  ;;  %v2541_v3 = vld [vmem:[#allocation4 + $0x30] sm:$0xff] }
 0x236   : > { %2184 = vst.msk [vmem:[#allocation4 + $0x58] sm:$0xff] %vm801_vm6, %v2164_v1  ;;  %v2539_v1 = vld [vmem:[#allocation4 + $0x20] sm:$0xff] }
 0x237   : > { %2182 = vst.msk [vmem:[#allocation4 + $0x48] sm:$0xff] %vm801_vm6, %v2162_v4  ;;  %v2542_v4 = vld [vmem:[#allocation4 + $0x38] sm:$0xff] }
 0x239   : > { %v7270_v5 = vpop.f32.mrb[92].mxu0 }
 0x23a   : > { %v2167_v7 = vadd.f32 %v7270_v5, %v2147_v6  ;;  %v2102_v8 = vpop.f32.mrb[93].mxu0 }
 0x23b   : > { %v2165_v11 = vadd.f32 %v2145_v10, %v2102_v8  ;;  %v7271_v12 = vpop.f32.mrb[94].mxu0 }
 0x23c   : > { %2187 = vst.msk [vmem:[#allocation4 + $0x70] sm:$0xff] %vm801_vm6, %v2167_v7  ;;  %v2168_v55 = vadd.f32 %v7271_v12, %v2148_v15  ;;  %v2105_v47 = vpop.f32.mrb[95].mxu0  ;;  %v2540_v7 = vld [vmem:[#allocation4 + $0x28] sm:$0xff] }
 0x23d   : > { %2185 = vst.msk [vmem:[#allocation4 + $0x60] sm:$0xff] %vm801_vm6, %v2165_v11  ;;  %v2166_v18 = vadd.f32 %v2146_v17, %v2105_v47  ;;  %v2545_v11 = vld [vmem:[#allocation4 + $0x50] sm:$0xff] }
 0x23e   : > { %2188 = vst.msk [vmem:[#allocation4 + $0x78] sm:$0xff] %vm801_vm6, %v2168_v55  ;;  %v2543_v55 = vld [vmem:[#allocation4 + $0x40] sm:$0xff] }
 0x23f   : > { %2186 = vst.msk [vmem:[#allocation4 + $0x68] sm:$0xff] %vm801_vm6, %v2166_v18  ;;  %v2546_v18 = vld [vmem:[#allocation4 + $0x58] sm:$0xff] }
 0x241   : > { %v7274_v19 = vpop.f32.mrb[96].mxu0 }
 0x242   : > { %v2171_v21 = vadd.f32 %v7274_v19, %v2151_v20  ;;  %v2118_v23 = vpop.f32.mrb[97].mxu0 }
 0x243   : > { %v2169_v26 = vadd.f32 %v2149_v25, %v2118_v23  ;;  %v7275_v29 = vpop.f32.mrb[98].mxu0 }
 0x244   : > { %2191 = vst.msk [vmem:[#allocation4 + $0x90] sm:$0xff] %vm801_vm6, %v2171_v21  ;;  %v2172_v35 = vadd.f32 %v7275_v29, %v2152_v31  ;;  %v2121_v36 = vpop.f32.mrb[99].mxu0  ;;  %v2544_v21 = vld [vmem:[#allocation4 + $0x48] sm:$0xff] }
 0x245   : > { %2189 = vst.msk [vmem:[#allocation4 + $0x80] sm:$0xff] %vm801_vm6, %v2169_v26  ;;  %v2170_v40 = vadd.f32 %v2150_v38, %v2121_v36  ;;  %v2549_v26 = vld [vmem:[#allocation4 + $0x70] sm:$0xff] }
 0x246   : > { %2192 = vst.msk [vmem:[#allocation4 + $0x98] sm:$0xff] %vm801_vm6, %v2172_v35  ;;  %v2547_v35 = vld [vmem:[#allocation4 + $0x60] sm:$0xff] }
 0x247   : > { %2190 = vst.msk [vmem:[#allocation4 + $0x88] sm:$0xff] %vm801_vm6, %v2170_v40  ;;  %v2550_v40 = vld [vmem:[#allocation4 + $0x78] sm:$0xff] }
 0x249   : > { %v7280_v41 = vpop.f32.mrb[100].mxu0 }
 0x24a   : > { %v2557_v44 = vadd.f32 %v7280_v41, %v2537_v42  ;;  %v2456_v48 = vpop.f32.mrb[101].mxu0 }
 0x24b   : > { %v2555_v50 = vadd.f32 %v2535_v49, %v2456_v48  ;;  %v7281_v51 = vpop.f32.mrb[102].mxu0 }
 0x24c   : > { %2577 = vst.msk [vmem:[#allocation4 + $0x10] sm:$0xff] %vm801_vm6, %v2557_v44  ;;  %v2558_v53 = vadd.f32 %v7281_v51, %v2538_v52  ;;  %v2459_v54 = vpop.f32.mrb[103].mxu0  ;;  %v2548_v44 = vld [vmem:[#allocation4 + $0x68] sm:$0xff] }
 0x24d   : > { %2575 = vst.msk [vmem:[#allocation4] sm:$0xff] %vm801_vm6, %v2555_v50  ;;  %v2556_v58 = vadd.f32 %v2536_v56, %v2459_v54  ;;  %v2553_v50 = vld [vmem:[#allocation4 + $0x90] sm:$0xff] }
 0x24e   : > { %2578 = vst.msk [vmem:[#allocation4 + $0x18] sm:$0xff] %vm801_vm6, %v2558_v53  ;;  %v2551_v53 = vld [vmem:[#allocation4 + $0x80] sm:$0xff] }
 0x24f   : > { %2576 = vst.msk [vmem:[#allocation4 + $0x8] sm:$0xff] %vm801_vm6, %v2556_v58  ;;  %v2554_v58 = vld [vmem:[#allocation4 + $0x98] sm:$0xff] }
 0x251   : > { %v7284_v59 = vpop.f32.mrb[104].mxu0 }
 0x252   : > { %v2561_v61 = vadd.f32 %v7284_v59, %v2541_v3  ;;  %v2472_v0 = vpop.f32.mrb[105].mxu0 }
 0x253   : > { %v2559_v2 = vadd.f32 %v2539_v1, %v2472_v0  ;;  %v7285_v13 = vpop.f32.mrb[106].mxu0 }
 0x254   : > { %2581 = vst.msk [vmem:[#allocation4 + $0x30] sm:$0xff] %vm801_vm6, %v2561_v61  ;;  %v2562_v5 = vadd.f32 %v7285_v13, %v2542_v4  ;;  %v2475_v6 = vpop.f32.mrb[107].mxu0  ;;  %v2552_v61 = vld [vmem:[#allocation4 + $0x88] sm:$0xff] }
 0x255   : > { %2579 = vst.msk [vmem:[#allocation4 + $0x20] sm:$0xff] %vm801_vm6, %v2559_v2  ;;  %v2560_v8 = vadd.f32 %v2540_v7, %v2475_v6  ;;  %v2939_v2 = vld [vmem:[#allocation4 + $0x10] sm:$0xff] }
 0x256   : > { %2582 = vst.msk [vmem:[#allocation4 + $0x38] sm:$0xff] %vm801_vm6, %v2562_v5  ;;  %v2937_v5 = vld [vmem:[#allocation4] sm:$0xff] }
 0x257   : > { %2580 = vst.msk [vmem:[#allocation4 + $0x28] sm:$0xff] %vm801_vm6, %v2560_v8  ;;  %v2940_v8 = vld [vmem:[#allocation4 + $0x18] sm:$0xff] }
 0x259   : > { %v7288_v10 = vpop.f32.mrb[108].mxu0 }
 0x25a   : > { %v2565_v12 = vadd.f32 %v7288_v10, %v2545_v11  ;;  %v2488_v15 = vpop.f32.mrb[109].mxu0 }
 0x25b   : > { %v2563_v47 = vadd.f32 %v2543_v55, %v2488_v15  ;;  %v7289_v17 = vpop.f32.mrb[110].mxu0 }
 0x25c   : > { %2585 = vst.msk [vmem:[#allocation4 + $0x50] sm:$0xff] %vm801_vm6, %v2565_v12  ;;  %v2566_v19 = vadd.f32 %v7289_v17, %v2546_v18  ;;  %v2491_v20 = vpop.f32.mrb[111].mxu0  ;;  %v2938_v12 = vld [vmem:[#allocation4 + $0x8] sm:$0xff] }
 0x25d   : > { %2583 = vst.msk [vmem:[#allocation4 + $0x40] sm:$0xff] %vm801_vm6, %v2563_v47  ;;  %v2564_v23 = vadd.f32 %v2544_v21, %v2491_v20  ;;  %v2943_v47 = vld [vmem:[#allocation4 + $0x30] sm:$0xff] }
 0x25e   : > { %2586 = vst.msk [vmem:[#allocation4 + $0x58] sm:$0xff] %vm801_vm6, %v2566_v19  ;;  %v2941_v19 = vld [vmem:[#allocation4 + $0x20] sm:$0xff] }
 0x25f   : > { %2584 = vst.msk [vmem:[#allocation4 + $0x48] sm:$0xff] %vm801_vm6, %v2564_v23  ;;  %v2944_v23 = vld [vmem:[#allocation4 + $0x38] sm:$0xff] }
 0x261   : > { %v7292_v25 = vpop.f32.mrb[112].mxu0 }
 0x262   : > { %v2569_v29 = vadd.f32 %v7292_v25, %v2549_v26  ;;  %v2504_v31 = vpop.f32.mrb[113].mxu0 }
 0x263   : > { %v2567_v36 = vadd.f32 %v2547_v35, %v2504_v31  ;;  %v7293_v38 = vpop.f32.mrb[114].mxu0  ;;  %v2942_v35 = vld [vmem:[#allocation4 + $0x28] sm:$0xff] }
 0x264   : > { %2589 = vst.msk [vmem:[#allocation4 + $0x70] sm:$0xff] %vm801_vm6, %v2569_v29  ;;  %v2570_v41 = vadd.f32 %v7293_v38, %v2550_v40  ;;  %v2507_v42 = vpop.f32.mrb[115].mxu0 }
 0x265   : > { %2587 = vst.msk [vmem:[#allocation4 + $0x60] sm:$0xff] %vm801_vm6, %v2567_v36  ;;  %v2568_v48 = vadd.f32 %v2548_v44, %v2507_v42 }
 0x266   : > { %2590 = vst.msk [vmem:[#allocation4 + $0x78] sm:$0xff] %vm801_vm6, %v2570_v41 }
 0x267   : > { %2588 = vst.msk [vmem:[#allocation4 + $0x68] sm:$0xff] %vm801_vm6, %v2568_v48 }
 0x269   : > { %v7296_v49 = vpop.f32.mrb[116].mxu0 }
 0x26a   : > { %v2573_v51 = vadd.f32 %v7296_v49, %v2553_v50  ;;  %v2520_v52 = vpop.f32.mrb[117].mxu0 }
 0x26b   : > { %v2571_v54 = vadd.f32 %v2551_v53, %v2520_v52  ;;  %v7297_v56 = vpop.f32.mrb[118].mxu0 }
 0x26c   : > { %2593 = vst.msk [vmem:[#allocation4 + $0x90] sm:$0xff] %vm801_vm6, %v2573_v51  ;;  %v2574_v59 = vadd.f32 %v7297_v56, %v2554_v58  ;;  %v2523_v3 = vpop.f32.mrb[119].mxu0  ;;  %v2945_v51 = vld [vmem:[#allocation4 + $0x40] sm:$0xff] }
 0x26d   : > { %2591 = vst.msk [vmem:[#allocation4 + $0x80] sm:$0xff] %vm801_vm6, %v2571_v54  ;;  %v2572_v0 = vadd.f32 %v2552_v61, %v2523_v3  ;;  %v2948_v54 = vld [vmem:[#allocation4 + $0x58] sm:$0xff] }
 0x26e   : > { %2594 = vst.msk [vmem:[#allocation4 + $0x98] sm:$0xff] %vm801_vm6, %v2574_v59 }
 0x26f   : > { %2592 = vst.msk [vmem:[#allocation4 + $0x88] sm:$0xff] %vm801_vm6, %v2572_v0 }
 0x271   : > { %v7302_v1 = vpop.f32.mrb[120].mxu0 }
 0x272   : > { %v2959_v13 = vadd.f32 %v7302_v1, %v2939_v2  ;;  %v2858_v4 = vpop.f32.mrb[121].mxu0 }
 0x273   : > { %v2957_v6 = vadd.f32 %v2937_v5, %v2858_v4  ;;  %v7303_v7 = vpop.f32.mrb[122].mxu0 }
 0x274   : > { %2979 = vst.msk [vmem:[#allocation4 + $0x10] sm:$0xff] %vm801_vm6, %v2959_v13  ;;  %v2960_v10 = vadd.f32 %v7303_v7, %v2940_v8  ;;  %v2861_v11 = vpop.f32.mrb[123].mxu0  ;;  %v2949_v7 = vld [vmem:[#allocation4 + $0x60] sm:$0xff] }
 0x275   : > { %2977 = vst.msk [vmem:[#allocation4] sm:$0xff] %vm801_vm6, %v2957_v6  ;;  %v2958_v15 = vadd.f32 %v2938_v12, %v2861_v11  ;;  %v2952_v11 = vld [vmem:[#allocation4 + $0x78] sm:$0xff] }
 0x276   : > { %2980 = vst.msk [vmem:[#allocation4 + $0x18] sm:$0xff] %vm801_vm6, %v2960_v10 }
 0x277   : > { %2978 = vst.msk [vmem:[#allocation4 + $0x8] sm:$0xff] %vm801_vm6, %v2958_v15 }
 0x279   : > { %v7306_v55 = vpop.f32.mrb[124].mxu0 }
 0x27a   : > { %v2963_v17 = vadd.f32 %v7306_v55, %v2943_v47  ;;  %v2874_v18 = vpop.f32.mrb[125].mxu0 }
 0x27b   : > { %v2961_v20 = vadd.f32 %v2941_v19, %v2874_v18  ;;  %v7307_v21 = vpop.f32.mrb[126].mxu0  ;;  %v3221_v25 = vld [vmem:[#allocation4 + $0x10] sm:$0xff] }
 0x27c   : > { %2983 = vst.msk [vmem:[#allocation4 + $0x30] sm:$0xff] %vm801_vm6, %v2963_v17  ;;  %v2964_v26 = vadd.f32 %v7307_v21, %v2944_v23  ;;  %v3241_v29 = vadd.f32 %v8591_v22, %v3221_v25  ;;  %v2877_v31 = vpop.f32.mrb[127].mxu0  ;;  %v3219_v36 = vld [vmem:[#allocation4] sm:$0xff] }
 0x27d   : > { %2981 = vst.msk [vmem:[#allocation4 + $0x20] sm:$0xff] %vm801_vm6, %v2961_v20  ;;  %v2962_v38 = vadd.f32 %v2942_v35, %v2877_v31  ;;  %v3239_v40 = vadd.f32 %v3219_v36, %v8594_v32  ;;  %v3222_v41 = vld [vmem:[#allocation4 + $0x18] sm:$0xff]  ;;  %v2947_v32 = vld [vmem:[#allocation4 + $0x50] sm:$0xff] }
 0x27e   : > { %2984 = vst.msk [vmem:[#allocation4 + $0x38] sm:$0xff] %vm801_vm6, %v2964_v26  ;;  %3261 = vst.msk [vmem:[#allocation4 + $0x10] sm:$0xff] %vm801_vm6, %v3241_v29  ;;  %v3242_v42 = vadd.f32 %v8597_v27, %v3222_v41  ;;  %v3220_v44 = vld [vmem:[#allocation4 + $0x8] sm:$0xff]  ;;  %v2953_v29 = vld [vmem:[#allocation4 + $0x80] sm:$0xff] }
 0x27f   : > { %2982 = vst.msk [vmem:[#allocation4 + $0x28] sm:$0xff] %vm801_vm6, %v2962_v38  ;;  %3259 = vst.msk [vmem:[#allocation4] sm:$0xff] %vm801_vm6, %v3239_v40  ;;  %v3240_v22 = vadd.f32 %v3220_v44, %v8600_v28  ;;  %v2946_v28 = vld [vmem:[#allocation4 + $0x48] sm:$0xff]  ;;  %v2956_v36 = vld [vmem:[#allocation4 + $0x98] sm:$0xff] }
 0x280   : > { %3262 = vst.msk [vmem:[#allocation4 + $0x18] sm:$0xff] %vm801_vm6, %v3242_v42 }
 0x281   : > { %3260 = vst.msk [vmem:[#allocation4 + $0x8] sm:$0xff] %vm801_vm6, %v3240_v22  ;;  %v7310_v48 = vpop.f32.mrb[128].mxu0 }
 0x282   : > { %v2967_v49 = vadd.f32 %v7310_v48, %v2947_v32  ;;  %v2890_v50 = vpop.f32.mrb[129].mxu0 }
 0x283   : > { %v2965_v52 = vadd.f32 %v2945_v51, %v2890_v50  ;;  %v7311_v53 = vpop.f32.mrb[130].mxu0  ;;  %v3225_v27 = vld [vmem:[#allocation4 + $0x30] sm:$0xff] }
 0x284   : > { %2987 = vst.msk [vmem:[#allocation4 + $0x50] sm:$0xff] %vm801_vm6, %v2967_v49  ;;  %v2968_v56 = vadd.f32 %v7311_v53, %v2948_v54  ;;  %v3245_v58 = vadd.f32 %v8603_v39, %v3225_v27  ;;  %v2893_v59 = vpop.f32.mrb[131].mxu0  ;;  %v3223_v3 = vld [vmem:[#allocation4 + $0x20] sm:$0xff] }
 0x285   : > { %2985 = vst.msk [vmem:[#allocation4 + $0x40] sm:$0xff] %vm801_vm6, %v2965_v52  ;;  %v2966_v61 = vadd.f32 %v2946_v28, %v2893_v59  ;;  %v3243_v0 = vadd.f32 %v3223_v3, %v8606_v43  ;;  %v3226_v1 = vld [vmem:[#allocation4 + $0x38] sm:$0xff]  ;;  %v2951_v43 = vld [vmem:[#allocation4 + $0x70] sm:$0xff] }
 0x286   : > { %2988 = vst.msk [vmem:[#allocation4 + $0x58] sm:$0xff] %vm801_vm6, %v2968_v56  ;;  %3265 = vst.msk [vmem:[#allocation4 + $0x30] sm:$0xff] %vm801_vm6, %v3245_v58  ;;  %v3246_v2 = vadd.f32 %v8609_v45, %v3226_v1  ;;  %v3224_v13 = vld [vmem:[#allocation4 + $0x28] sm:$0xff]  ;;  %v3621_v53 = vld [vmem:[#allocation4] sm:$0xff] }
 0x287   : > { %2986 = vst.msk [vmem:[#allocation4 + $0x48] sm:$0xff] %vm801_vm6, %v2966_v61  ;;  %3263 = vst.msk [vmem:[#allocation4 + $0x20] sm:$0xff] %vm801_vm6, %v3243_v0  ;;  %v3244_v39 = vadd.f32 %v3224_v13, %v8612_v46  ;;  %v2950_v46 = vld [vmem:[#allocation4 + $0x68] sm:$0xff] }
 0x288   : > { %3266 = vst.msk [vmem:[#allocation4 + $0x38] sm:$0xff] %vm801_vm6, %v3246_v2  ;;  %v3622_v3 = vld [vmem:[#allocation4 + $0x8] sm:$0xff] }
 0x289   : > { %3264 = vst.msk [vmem:[#allocation4 + $0x28] sm:$0xff] %vm801_vm6, %v3244_v39  ;;  %v7314_v4 = vpop.f32.mrb[132].mxu0 }
 0x28a   : > { %v2971_v5 = vadd.f32 %v7314_v4, %v2951_v43  ;;  %v2906_v6 = vpop.f32.mrb[133].mxu0 }
 0x28b   : > { %v2969_v8 = vadd.f32 %v2949_v7, %v2906_v6  ;;  %v7315_v10 = vpop.f32.mrb[134].mxu0  ;;  %v3229_v45 = vld [vmem:[#allocation4 + $0x50] sm:$0xff] }
 0x28c   : > { %2991 = vst.msk [vmem:[#allocation4 + $0x70] sm:$0xff] %vm801_vm6, %v2971_v5  ;;  %v2972_v12 = vadd.f32 %v7315_v10, %v2952_v11  ;;  %v3249_v15 = vadd.f32 %v8615_v57, %v3229_v45  ;;  %v2909_v55 = vpop.f32.mrb[135].mxu0  ;;  %v3227_v47 = vld [vmem:[#allocation4 + $0x40] sm:$0xff] }
 0x28d   : > { %2989 = vst.msk [vmem:[#allocation4 + $0x60] sm:$0xff] %vm801_vm6, %v2969_v8  ;;  %v2970_v17 = vadd.f32 %v2950_v46, %v2909_v55  ;;  %v3247_v18 = vadd.f32 %v3227_v47, %v8618_v60  ;;  %v3230_v19 = vld [vmem:[#allocation4 + $0x58] sm:$0xff]  ;;  %v2955_v60 = vld [vmem:[#allocation4 + $0x90] sm:$0xff] }
 0x28e   : > { %2992 = vst.msk [vmem:[#allocation4 + $0x78] sm:$0xff] %vm801_vm6, %v2972_v12  ;;  %3269 = vst.msk [vmem:[#allocation4 + $0x50] sm:$0xff] %vm801_vm6, %v3249_v15  ;;  %v3250_v20 = vadd.f32 %v8621_v62, %v3230_v19  ;;  %v3228_v21 = vld [vmem:[#allocation4 + $0x48] sm:$0xff]  ;;  %v3627_v4 = vld [vmem:[#allocation4 + $0x30] sm:$0xff] }
 0x28f   : > { %2990 = vst.msk [vmem:[#allocation4 + $0x68] sm:$0xff] %vm801_vm6, %v2970_v17  ;;  %3267 = vst.msk [vmem:[#allocation4 + $0x40] sm:$0xff] %vm801_vm6, %v3247_v18  ;;  %v3248_v57 = vadd.f32 %v3228_v21, %v8624_v63  ;;  %v2954_v63 = vld [vmem:[#allocation4 + $0x88] sm:$0xff]  ;;  %v3625_v5 = vld [vmem:[#allocation4 + $0x20] sm:$0xff] }
 0x290   : > { %3270 = vst.msk [vmem:[#allocation4 + $0x58] sm:$0xff] %vm801_vm6, %v3250_v20  ;;  %v3628_v10 = vld [vmem:[#allocation4 + $0x38] sm:$0xff]  ;;  %v3626_v15 = vld [vmem:[#allocation4 + $0x28] sm:$0xff] }
 0x291   : > { %3268 = vst.msk [vmem:[#allocation4 + $0x48] sm:$0xff] %vm801_vm6, %v3248_v57  ;;  %v7318_v23 = vpop.f32.mrb[136].mxu0 }
 0x292   : > { %v2975_v25 = vadd.f32 %v7318_v23, %v2955_v60  ;;  %v2922_v26 = vpop.f32.mrb[137].mxu0 }
 0x293   : > { %v2973_v31 = vadd.f32 %v2953_v29, %v2922_v26  ;;  %v7319_v35 = vpop.f32.mrb[138].mxu0  ;;  %v3233_v62 = vld [vmem:[#allocation4 + $0x70] sm:$0xff] }
 0x294   : > { %2995 = vst.msk [vmem:[#allocation4 + $0x90] sm:$0xff] %vm801_vm6, %v2975_v25  ;;  %v2976_v38 = vadd.f32 %v7319_v35, %v2956_v36  ;;  %v3253_v40 = vadd.f32 %v8627_v9, %v3233_v62  ;;  %v2925_v41 = vpop.f32.mrb[139].mxu0  ;;  %v3231_v42 = vld [vmem:[#allocation4 + $0x60] sm:$0xff] }
 0x295   : > { %2993 = vst.msk [vmem:[#allocation4 + $0x80] sm:$0xff] %vm801_vm6, %v2973_v31  ;;  %v2974_v44 = vadd.f32 %v2954_v63, %v2925_v41  ;;  %v3251_v22 = vadd.f32 %v3231_v42, %v8630_v14  ;;  %v3234_v48 = vld [vmem:[#allocation4 + $0x78] sm:$0xff]  ;;  %v3623_v14 = vld [vmem:[#allocation4 + $0x10] sm:$0xff] }
 0x296   : > { %2996 = vst.msk [vmem:[#allocation4 + $0x98] sm:$0xff] %vm801_vm6, %v2976_v38  ;;  %3273 = vst.msk [vmem:[#allocation4 + $0x70] sm:$0xff] %vm801_vm6, %v3253_v40  ;;  %v3254_v32 = vadd.f32 %v8633_v16, %v3234_v48  ;;  %v3232_v49 = vld [vmem:[#allocation4 + $0x68] sm:$0xff]  ;;  %v3624_v16 = vld [vmem:[#allocation4 + $0x18] sm:$0xff] }
 0x297   : > { %2994 = vst.msk [vmem:[#allocation4 + $0x88] sm:$0xff] %vm801_vm6, %v2974_v44  ;;  %3271 = vst.msk [vmem:[#allocation4 + $0x60] sm:$0xff] %vm801_vm6, %v3251_v22  ;;  %v3252_v9 = vadd.f32 %v3232_v49, %v8636_v37  ;;  %v3631_v25 = vld [vmem:[#allocation4 + $0x50] sm:$0xff]  ;;  %v3629_v35 = vld [vmem:[#allocation4 + $0x40] sm:$0xff] }
 0x298   : > { %3274 = vst.msk [vmem:[#allocation4 + $0x78] sm:$0xff] %vm801_vm6, %v3254_v32  ;;  %v3632_v41 = vld [vmem:[#allocation4 + $0x58] sm:$0xff]  ;;  %v3630_v32 = vld [vmem:[#allocation4 + $0x48] sm:$0xff] }
 0x299   : > { %3272 = vst.msk [vmem:[#allocation4 + $0x68] sm:$0xff] %vm801_vm6, %v3252_v9  ;;  %v7346_v50 = vpop.f32.mrb[140].mxu0 }
 0x29a   : > { %v3643_v51 = vadd.f32 %v7346_v50, %v3623_v14  ;;  %v3542_v52 = vpop.f32.mrb[141].mxu0 }
 0x29b   : > { %v3641_v54 = vadd.f32 %v3621_v53, %v3542_v52  ;;  %v3237_v27 = vld [vmem:[#allocation4 + $0x90] sm:$0xff]  ;;  %v7347_v56 = vpop.f32.mrb[142].mxu0 }
 0x29c   : > { %3663 = vst.msk [vmem:[#allocation4 + $0x10] sm:$0xff] %vm801_vm6, %v3643_v51  ;;  %v3257_v58 = vadd.f32 %v8639_v24, %v3237_v27  ;;  %v3644_v59 = vadd.f32 %v7347_v56, %v3624_v16  ;;  %v3235_v28 = vld [vmem:[#allocation4 + $0x80] sm:$0xff]  ;;  %v3545_v37 = vpop.f32.mrb[143].mxu0 }
 0x29d   : > { %3661 = vst.msk [vmem:[#allocation4] sm:$0xff] %vm801_vm6, %v3641_v54  ;;  %v3255_v61 = vadd.f32 %v3235_v28, %v8642_v30  ;;  %v3642_v0 = vadd.f32 %v3622_v3, %v3545_v37  ;;  %v3238_v1 = vld [vmem:[#allocation4 + $0x98] sm:$0xff]  ;;  %v8793_v30 = vld [vmem:[%s9085_s2] ss:$0 sm:$0xff] }
 0x29e   : > { %3277 = vst.msk [vmem:[#allocation4 + $0x90] sm:$0xff] %vm801_vm6, %v3257_v58  ;;  %3664 = vst.msk [vmem:[#allocation4 + $0x18] sm:$0xff] %vm801_vm6, %v3644_v59  ;;  %v3258_v2 = vadd.f32 %v8645_v33, %v3238_v1  ;;  %v3236_v13 = vld [vmem:[#allocation4 + $0x88] sm:$0xff]  ;;  %v3635_v59 = vld [vmem:[#allocation4 + $0x70] sm:$0xff] }
 0x29f   : > { %3275 = vst.msk [vmem:[#allocation4 + $0x80] sm:$0xff] %vm801_vm6, %v3255_v61  ;;  %3662 = vst.msk [vmem:[#allocation4 + $0x8] sm:$0xff] %vm801_vm6, %v3642_v0  ;;  %v3256_v24 = vadd.f32 %v3236_v13, %v8648_v34  ;;  %v3633_v61 = vld [vmem:[#allocation4 + $0x60] sm:$0xff] }
 0x2a0   : > { %3278 = vst.msk [vmem:[#allocation4 + $0x98] sm:$0xff] %vm801_vm6, %v3258_v2 }
 0x2a1   : > { %3276 = vst.msk [vmem:[#allocation4 + $0x88] sm:$0xff] %vm801_vm6, %v3256_v24  ;;  %v7350_v39 = vpop.f32.mrb[144].mxu0  ;;  %v3636_v24 = vld [vmem:[#allocation4 + $0x78] sm:$0xff] }
 0x2a2   : > { %v3647_v43 = vadd.f32 %v7350_v39, %v3627_v4  ;;  %v3558_v33 = vpop.f32.mrb[145].mxu0 }
 0x2a3   : > { %v3683_v6 = vld [vmem:[#allocation4 + $0x10] sm:$0xff]  ;;  %v3645_v7 = vadd.f32 %v3625_v5, %v3558_v33  ;;  %v7351_v8 = vpop.f32.mrb[146].mxu0 }
 0x2a4   : > { %v3710_v34 = vadd.f32 %v8793_v30, %v3683_v6  ;;  %v3681_v11 = vld [vmem:[#allocation4] sm:$0xff]  ;;  %3667 = vst.msk [vmem:[#allocation4 + $0x30] sm:$0xff] %vm801_vm6, %v3647_v43  ;;  %v3648_v45 = vadd.f32 %v7351_v8, %v3628_v10  ;;  %v3561_v12 = vpop.f32.mrb[147].mxu0  ;;  %v3634_v6 = vld [vmem:[#allocation4 + $0x68] sm:$0xff] }
 0x2a5   : > { %v3708_v55 = vadd.f32 %v8793_v30, %v3681_v11  ;;  %v3684_v46 = vld [vmem:[#allocation4 + $0x18] sm:$0xff]  ;;  %3665 = vst.msk [vmem:[#allocation4 + $0x20] sm:$0xff] %vm801_vm6, %v3645_v7  ;;  %v3646_v47 = vadd.f32 %v3626_v15, %v3561_v12 }
 0x2a6   : > { %v3711_v17 = vadd.f32 %v8793_v30, %v3684_v46  ;;  %v3682_v18 = vld [vmem:[#allocation4 + $0x8] sm:$0xff]  ;;  %3668 = vst.msk [vmem:[#allocation4 + $0x38] sm:$0xff] %vm801_vm6, %v3648_v45  ;;  %v3730_v20 = vmax.f32 %v3710_v34, 0.0 }
 0x2a7   : > { %v3709_v19 = vadd.f32 %v8793_v30, %v3682_v18  ;;  %3666 = vst.msk [vmem:[#allocation4 + $0x28] sm:$0xff] %vm801_vm6, %v3646_v47  ;;  %v3728_v57 = vmax.f32 %v3708_v55, 0.0  ;;  %v3639_v18 = vld [vmem:[#allocation4 + $0x90] sm:$0xff] }
 0x2a8   : > { %v3731_v21 = vmax.f32 %v3711_v17, 0.0 }
 0x2a9   : > { %v3729_v23 = vmax.f32 %v3709_v19, 0.0  ;;  %v7354_v60 = vpop.f32.mrb[148].mxu0 }
 0x2aa   : > { %v3749_v26 = vpack.c.bf16 %v3731_v21, %v3730_v20  ;;  %v3651_v29 = vadd.f32 %v7354_v60, %v3631_v25  ;;  %v3574_v31 = vpop.f32.mrb[149].mxu0 }
 0x2ab   : > { %v3748_v36 = vpack.c.bf16 %v3729_v23, %v3728_v57  ;;  %v3687_v62 = vld [vmem:[#allocation4 + $0x30] sm:$0xff]  ;;  %v3649_v38 = vadd.f32 %v3629_v35, %v3574_v31  ;;  %v7355_v40 = vpop.f32.mrb[150].mxu0  ;;  %v3637_v57 = vld [vmem:[#allocation4 + $0x80] sm:$0xff] }
 0x2ac   : > { %v3791_v63 = vrot.slane %v3749_v26, 4  ;;  %v3714_v42 = vadd.f32 %v8793_v30, %v3687_v62  ;;  %v3685_v44 = vld [vmem:[#allocation4 + $0x20] sm:$0xff]  ;;  %3671 = vst.msk [vmem:[#allocation4 + $0x50] sm:$0xff] %vm801_vm6, %v3651_v29  ;;  %v3652_v22 = vadd.f32 %v7355_v40, %v3632_v41  ;;  %v3577_v48 = vpop.f32.mrb[151].mxu0  ;;  %v3640_v29 = vld [vmem:[#allocation4 + $0x98] sm:$0xff]  ;;  %v3638_v40 = vld [vmem:[#allocation4 + $0x88] sm:$0xff] }
 0x2ad   : > { %v3790_v49 = vrot.slane %v3748_v36, 4  ;;  %v3712_v9 = vadd.f32 %v8793_v30, %v3685_v44  ;;  %v3688_v50 = vld [vmem:[#allocation4 + $0x38] sm:$0xff]  ;;  %3669 = vst.msk [vmem:[#allocation4 + $0x40] sm:$0xff] %vm801_vm6, %v3649_v38  ;;  %v3650_v14 = vadd.f32 %v3630_v32, %v3577_v48 }
 0x2ae   : > { %3812 = vst.msk [vmem:[#allocation3 + $0x10] sm:$0xf0] %vm3769_vm8, %v3791_v63  ;;  %v3715_v51 = vadd.f32 %v8793_v30, %v3688_v50  ;;  %v3686_v52 = vld [vmem:[#allocation4 + $0x28] sm:$0xff]  ;;  %v3734_v54 = vmax.f32 %v3714_v42, 0.0 }
 0x2af   : > { %3813 = vst.msk [vmem:[#allocation3 + $0x18] sm:$0xf] %vm3758_vm7, %v3791_v63  ;;  %3811 = vst.msk [vmem:[#allocation3 + $0x8] sm:$0xf] %vm3758_vm7, %v3790_v49  ;;  %v3713_v53 = vadd.f32 %v8793_v30, %v3686_v52  ;;  %v3732_v56 = vmax.f32 %v3712_v9, 0.0 }
 0x2b0   : > { %3672 = vst.msk [vmem:[#allocation4 + $0x58] sm:$0xff] %vm801_vm6, %v3652_v22  ;;  %3670 = vst.msk [vmem:[#allocation4 + $0x48] sm:$0xff] %vm801_vm6, %v3650_v14  ;;  %v3735_v27 = vmax.f32 %v3715_v51, 0.0 }
 0x2b1   : > { %3810 = vst.msk [vmem:[#allocation3] sm:$0xf0] %vm3769_vm8, %v3790_v49  ;;  %v3733_v16 = vmax.f32 %v3713_v53, 0.0  ;;  %v7358_v58 = vpop.f32.mrb[152].mxu0 }
 0x2b2   : > { %v3751_v28 = vpack.c.bf16 %v3735_v27, %v3734_v54  ;;  %v3655_v37 = vadd.f32 %v7358_v58, %v3635_v59  ;;  %v3590_v3 = vpop.f32.mrb[153].mxu0 }
 0x2b3   : > { %v3750_v0 = vpack.c.bf16 %v3733_v16, %v3732_v56  ;;  %v3691_v1 = vld [vmem:[#allocation4 + $0x50] sm:$0xff]  ;;  %v3653_v2 = vadd.f32 %v3633_v61, %v3590_v3  ;;  %v7359_v13 = vpop.f32.mrb[154].mxu0 }
 0x2b4   : > { %v3793_v39 = vrot.slane %v3751_v28, 4  ;;  %v3718_v4 = vadd.f32 %v8793_v30, %v3691_v1  ;;  %v3689_v43 = vld [vmem:[#allocation4 + $0x40] sm:$0xff]  ;;  %3675 = vst.msk [vmem:[#allocation4 + $0x70] sm:$0xff] %vm801_vm6, %v3655_v37  ;;  %v3656_v33 = vadd.f32 %v7359_v13, %v3636_v24  ;;  %v3593_v5 = vpop.f32.mrb[155].mxu0 }
 0x2b5   : > { %v3792_v7 = vrot.slane %v3750_v0, 4  ;;  %v3716_v8 = vadd.f32 %v8793_v30, %v3689_v43  ;;  %3673 = vst.msk [vmem:[#allocation4 + $0x60] sm:$0xff] %vm801_vm6, %v3653_v2  ;;  %v3654_v34 = vadd.f32 %v3634_v6, %v3593_v5 }
 0x2b6   : > { %3816 = vst.msk [vmem:[#allocation3 + $0x30] sm:$0xf0] %vm3769_vm8, %v3793_v39  ;;  %v3738_v15 = vmax.f32 %v3718_v4, 0.0 }
 0x2b7   : > { %v3692_v10 = vld [vmem:[#allocation4 + $0x58] sm:$0xff]  ;;  %3817 = vst.msk [vmem:[#allocation3 + $0x38] sm:$0xf] %vm3758_vm7, %v3793_v39  ;;  %v3690_v45 = vld [vmem:[#allocation4 + $0x48] sm:$0xff]  ;;  %3815 = vst.msk [vmem:[#allocation3 + $0x28] sm:$0xf] %vm3758_vm7, %v3792_v7 }
 0x2b8   : > { %v3719_v11 = vadd.f32 %v8793_v30, %v3692_v10  ;;  %3676 = vst.msk [vmem:[#allocation4 + $0x78] sm:$0xff] %vm801_vm6, %v3656_v33  ;;  %v3717_v12 = vadd.f32 %v8793_v30, %v3690_v45  ;;  %3674 = vst.msk [vmem:[#allocation4 + $0x68] sm:$0xff] %vm801_vm6, %v3654_v34  ;;  %v3736_v46 = vmax.f32 %v3716_v8, 0.0 }
 0x2b9   : > { %3814 = vst.msk [vmem:[#allocation3 + $0x20] sm:$0xf0] %vm3769_vm8, %v3792_v7  ;;  %v7362_v17 = vpop.f32.mrb[156].mxu0 }
 0x2ba   : > { %v3739_v55 = vmax.f32 %v3719_v11, 0.0  ;;  %v3737_v47 = vmax.f32 %v3717_v12, 0.0  ;;  %v3659_v20 = vadd.f32 %v7362_v17, %v3639_v18  ;;  %v3606_v21 = vpop.f32.mrb[157].mxu0 }
 0x2bb   : > { %v3695_v60 = vld [vmem:[#allocation4 + $0x70] sm:$0xff]  ;;  %v3657_v25 = vadd.f32 %v3637_v57, %v3606_v21  ;;  %v7363_v26 = vpop.f32.mrb[158].mxu0 }
 0x2bc   : > { %v3753_v19 = vpack.c.bf16 %v3739_v55, %v3738_v15  ;;  %v3752_v23 = vpack.c.bf16 %v3737_v47, %v3736_v46  ;;  %v3722_v35 = vadd.f32 %v8793_v30, %v3695_v60  ;;  %v3693_v36 = vld [vmem:[#allocation4 + $0x60] sm:$0xff]  ;;  %3679 = vst.msk [vmem:[#allocation4 + $0x90] sm:$0xff] %vm801_vm6, %v3659_v20  ;;  %v3660_v62 = vadd.f32 %v7363_v26, %v3640_v29  ;;  %v3609_v38 = vpop.f32.mrb[159].mxu0 }
 0x2bd   : > { %v3720_v63 = vadd.f32 %v8793_v30, %v3693_v36  ;;  %3677 = vst.msk [vmem:[#allocation4 + $0x80] sm:$0xff] %vm801_vm6, %v3657_v25  ;;  %v3658_v44 = vadd.f32 %v3638_v40, %v3609_v38 }
 0x2be   : > { %v3795_v31 = vrot.slane %v3753_v19, 4  ;;  %v3794_v41 = vrot.slane %v3752_v23, 4  ;;  %3680 = vst.msk [vmem:[#allocation4 + $0x98] sm:$0xff] %vm801_vm6, %v3660_v62  ;;  %v3742_v49 = vmax.f32 %v3722_v35, 0.0 }
 0x2bf   : > { %v3696_v42 = vld [vmem:[#allocation4 + $0x78] sm:$0xff]  ;;  %v3694_v48 = vld [vmem:[#allocation4 + $0x68] sm:$0xff]  ;;  %3678 = vst.msk [vmem:[#allocation4 + $0x88] sm:$0xff] %vm801_vm6, %v3658_v44  ;;  %v3740_v50 = vmax.f32 %v3720_v63, 0.0 }
 0x2c0   : > { %3820 = vst.msk [vmem:[#allocation3 + $0x50] sm:$0xf0] %vm3769_vm8, %v3795_v31  ;;  %v3723_v22 = vadd.f32 %v8793_v30, %v3696_v42  ;;  %3818 = vst.msk [vmem:[#allocation3 + $0x40] sm:$0xf0] %vm3769_vm8, %v3794_v41  ;;  %v3721_v32 = vadd.f32 %v8793_v30, %v3694_v48 }
 0x2c1   : > { %3821 = vst.msk [vmem:[#allocation3 + $0x58] sm:$0xf] %vm3758_vm7, %v3795_v31  ;;  %3819 = vst.msk [vmem:[#allocation3 + $0x48] sm:$0xf] %vm3758_vm7, %v3794_v41 }
 0x2c2   : > { %v3743_v9 = vmax.f32 %v3723_v22, 0.0  ;;  %v3741_v14 = vmax.f32 %v3721_v32, 0.0 }
 0x2c3   : > { %v3699_v53 = vld [vmem:[#allocation4 + $0x90] sm:$0xff] }
 0x2c4   : > { %v3755_v51 = vpack.c.bf16 %v3743_v9, %v3742_v49  ;;  %v3754_v52 = vpack.c.bf16 %v3741_v14, %v3740_v50  ;;  %v3726_v27 = vadd.f32 %v8793_v30, %v3699_v53  ;;  %v3697_v56 = vld [vmem:[#allocation4 + $0x80] sm:$0xff] }
 0x2c5   : > { %v3724_v58 = vadd.f32 %v8793_v30, %v3697_v56  ;;  %v3700_v59 = vld [vmem:[#allocation4 + $0x98] sm:$0xff] }
 0x2c6   : > { %v3797_v54 = vrot.slane %v3755_v51, 4  ;;  %v3796_v16 = vrot.slane %v3754_v52, 4  ;;  %v3727_v28 = vadd.f32 %v8793_v30, %v3700_v59  ;;  %v3698_v37 = vld [vmem:[#allocation4 + $0x88] sm:$0xff]  ;;  %v3746_v61 = vmax.f32 %v3726_v27, 0.0 }
 0x2c7   : > { %v3725_v3 = vadd.f32 %v8793_v30, %v3698_v37  ;;  %v3744_v1 = vmax.f32 %v3724_v58, 0.0  ;;  %v7968_v30 = vmov (!%p6767_p1), 0  }
 0x2c8   : > { %3824 = vst.msk [vmem:[#allocation3 + $0x70] sm:$0xf0] %vm3769_vm8, %v3797_v54  ;;  %3822 = vst.msk [vmem:[#allocation3 + $0x60] sm:$0xf0] %vm3769_vm8, %v3796_v16  ;;  %v3747_v0 = vmax.f32 %v3727_v28, 0.0 }
 0x2c9   : > { %3825 = vst.msk [vmem:[#allocation3 + $0x78] sm:$0xf] %vm3758_vm7, %v3797_v54  ;;  %3823 = vst.msk [vmem:[#allocation3 + $0x68] sm:$0xf] %vm3758_vm7, %v3796_v16  ;;  %v3745_v2 = vmax.f32 %v3725_v3, 0.0 }
 0x2ca   : > { %v3757_v13 = vpack.c.bf16 %v3747_v0, %v3746_v61  ;;  %3832 = sbr.rel (%p6767_p1) target bundleno = 721 (0x2d1), region = 72  ;;  %3833 = vst.msk [vmem:[#allocation3] sm:$0xff] (!%p6767_p1), %vm801_vm6, %v7968_v30  ;;  %3834 = vst.msk [vmem:[#allocation3 + $0x8] sm:$0xff] (!%p6767_p1), %vm801_vm6, %v7968_v30 }
 0x2cb   : > { %v3756_v24 = vpack.c.bf16 %v3745_v2, %v3744_v1 }
 0x2cc   : > { %v3799_v39 = vrot.slane %v3757_v13, 4 }
 0x2cd   : > { %v3798_v4 = vrot.slane %v3756_v24, 4 }
 0x2ce   : > { %3828 = vst.msk [vmem:[#allocation3 + $0x90] sm:$0xf0] %vm3769_vm8, %v3799_v39 }
 0x2cf   : > { %3829 = vst.msk [vmem:[#allocation3 + $0x98] sm:$0xf] %vm3758_vm7, %v3799_v39  ;;  %3827 = vst.msk [vmem:[#allocation3 + $0x88] sm:$0xf] %vm3758_vm7, %v3798_v4 }
 0x2d0   : > { %3826 = vst.msk [vmem:[#allocation3 + $0x80] sm:$0xf0] %vm3769_vm8, %v3798_v4 }
 0x2d1 PF: > { %3837 = sbr.rel (%p6771_p5) target bundleno = 728 (0x2d8), region = 76  ;;  %v7969_v43 = vmov (!%p6771_p5), 0  }
 0x2d2   : > { %3839 = vst.msk [vmem:[#allocation3 + $0x90] sm:$0xff] (!%p6771_p5), %vm801_vm6, %v7969_v43  ;;  %3840 = vst.msk [vmem:[#allocation3 + $0x98] sm:$0xff] (!%p6771_p5), %vm801_vm6, %v7969_v43 }
 0x2d8 PF: > { %v7782_v33 = vld [vmem:[#allocation10] sm:$0xff]   ;;  %v7783_v5 = vld [vmem:[#allocation10 + $0x8] sm:$0xff]   ;;  %v3841_v6 = vld [vmem:[#allocation3] sm:$0xf8]  ;;  %vm6603_vm9 = vcmask 15360  }
 0x2d9   : > { %7364 = vmatprep.subr.bf16.mxu1 %v7782_v33  ;;  %v3842_v7 = vld [vmem:[#allocation3 + $0x8] sm:$0xf]  ;;  %v3843_v8 = vld [vmem:[#allocation3 + $0x10] sm:$0xf8]  ;;  %v3858_v10 = vshrl.u32 %v3841_v6, 16  ;;  %v3861_v34 = vshll.u32 %v3841_v6, 16 }
 0x2da   : > { %7365 = vmatpush3.bf16.msra.mxu1 %v7782_v33  ;;  %v3866_v11 = vshrl.u32 %v3842_v7, 16  ;;  %v3869_v45 = vshll.u32 %v3842_v7, 16  ;;  %v3844_v12 = vld [vmem:[#allocation3 + $0x18] sm:$0xf]  ;;  %v3875_v15 = vshrl.u32 %v3843_v8, 16  ;;  %v3878_v55 = vshll.u32 %v3843_v8, 16 }
 0x2db   : > { %7366 = vmatprep.subr.bf16.mxu1 %v7783_v5  ;;  %v3883_v46 = vshrl.u32 %v3844_v12, 16  ;;  %v3886_v47 = vshll.u32 %v3844_v12, 16  ;;  %v3860_v17 = vrot.slane %v3858_v10, 3  ;;  %v3863_v18 = vrot.slane %v3861_v34, 4  ;;  %v7784_v25 = vld [vmem:[#allocation10 + $0x10] sm:$0xff]   ;;  %v7785_v9 = vld [vmem:[#allocation10 + $0x18] sm:$0xff]  }
 0x2dc   : > { %v3868_v19 = vrot.slane %v3866_v11, 3  ;;  %v3871_v20 = vrot.slane %v3869_v45, 4  ;;  %v3877_v21 = vrot.slane %v3875_v15, 3  ;;  %v3880_v57 = vrot.slane %v3878_v55, 4  ;;  %v3845_v31 = vld [vmem:[#allocation3 + $0x20] sm:$0xf8] }
 0x2dd   : > { %v3885_v23 = vrot.slane %v3883_v46, 3  ;;  %v3888_v60 = vrot.slane %v3886_v47, 4  ;;  %v3864_v26 = vor.u32 %v3863_v18, %v3860_v17  ;;  %v3846_v35 = vld [vmem:[#allocation3 + $0x28] sm:$0xf]  ;;  %v3847_v36 = vld [vmem:[#allocation3 + $0x30] sm:$0xf8] }
 0x2de   : > { %7367 = vmatpush3.bf16.msra.mxu1 %v7783_v5  ;;  %v3872_v29 = vor.u32 %v3871_v20, %v3868_v19  ;;  %v3881_v62 = vor.u32 %v3880_v57, %v3877_v21  ;;  %v3892_v40 = vshrl.u32 %v3845_v31, 16  ;;  %v3895_v41 = vshll.u32 %v3845_v31, 16  ;;  %v3848_v63 = vld [vmem:[#allocation3 + $0x38] sm:$0xf]  ;;  %v3849_v42 = vld [vmem:[#allocation3 + $0x40] sm:$0xf8] }
 0x2df   : > { %v3889_v38 = vor.u32 %v3888_v60, %v3885_v23  ;;  %7384 = vmatprep.subr.bf16.mxu1 %v7784_v25  ;;  %v3900_v22 = vshrl.u32 %v3846_v35, 16  ;;  %v3903_v48 = vshll.u32 %v3846_v35, 16  ;;  %v3909_v32 = vshrl.u32 %v3847_v36, 16  ;;  %v3850_v49 = vld [vmem:[#allocation3 + $0x48] sm:$0xf] }
 0x2e0   : > { %v3873_v44 = vsel %vm478_vm2, %v3864_v26, %v3872_v29  ;;  %v3894_v14 = vrot.slane %v3892_v40, 3  ;;  %v3897_v51 = vrot.slane %v3895_v41, 4  ;;  %v3912_v52 = vshll.u32 %v3847_v36, 16  ;;  %v3851_v53 = vld [vmem:[#allocation3 + $0x50] sm:$0xf8]  ;;  %v8864_v13 = vld [vmem:[#allocation10 + $0x20] sm:$0xff]  }
 0x2e1   : > { %7368 = vmatprep.mubr.msk.bf16.mxu1 %vm801_vm6, %v3873_v44  ;;  %v3890_v50 = vsel %vm478_vm2, %v3881_v62, %v3889_v38  ;;  %v3902_v54 = vrot.slane %v3900_v22, 3  ;;  %v3905_v27 = vrot.slane %v3903_v48, 4  ;;  %v3911_v56 = vrot.slane %v3909_v32, 3  ;;  %v3852_v58 = vld [vmem:[#allocation3 + $0x58] sm:$0xf] }
 0x2e2   : > { %7369 = vmatmul.mubr.msk.bf16.vlgmr.msra.gmra.mrb[20].mxu1 %vm801_vm6, %v3890_v50  ;;  %v3917_v16 = vshrl.u32 %v3848_v63, 16  ;;  %v3898_v59 = vor.u32 %v3897_v51, %v3894_v14  ;;  %v3914_v28 = vrot.slane %v3912_v52, 4  ;;  %v3920_v37 = vshll.u32 %v3848_v63, 16  ;;  %v3853_v43 = vld [vmem:[#allocation3 + $0x60] sm:$0xf8] }
 0x2e3   : > { %7385 = vmatpush3.bf16.msra.mxu1 %v7784_v25  ;;  %v3926_v3 = vshrl.u32 %v3849_v42, 16  ;;  %v3906_v61 = vor.u32 %v3905_v27, %v3902_v54  ;;  %v3929_v1 = vshll.u32 %v3849_v42, 16  ;;  %v3934_v2 = vshrl.u32 %v3850_v49, 16  ;;  %v3854_v45 = vld [vmem:[#allocation3 + $0x68] sm:$0xf] }
 0x2e4   : > { %v3919_v0 = vrot.slane %v3917_v16, 3  ;;  %7386 = vmatprep.subr.bf16.mxu1 %v7785_v9  ;;  %v3915_v24 = vor.u32 %v3914_v28, %v3911_v56  ;;  %v3922_v39 = vrot.slane %v3920_v37, 4  ;;  %v3937_v30 = vshll.u32 %v3850_v49, 16  ;;  %v3855_v47 = vld [vmem:[#allocation3 + $0x70] sm:$0xf8] }
 0x2e5   : > { %v3928_v4 = vrot.slane %v3926_v3, 3  ;;  %v3907_v33 = vsel %vm478_vm2, %v3898_v59, %v3906_v61  ;;  %v3931_v5 = vrot.slane %v3929_v1, 4  ;;  %v3936_v6 = vrot.slane %v3934_v2, 3  ;;  %v3856_v25 = vld [vmem:[#allocation3 + $0x78] sm:$0xf] }
 0x2e6   : > { %v3943_v7 = vshrl.u32 %v3851_v53, 16  ;;  %7372 = vmatprep.mubr.msk.bf16.mxu1 %vm801_vm6, %v3907_v33  ;;  %v3923_v8 = vor.u32 %v3922_v39, %v3919_v0  ;;  %v3939_v10 = vrot.slane %v3937_v30, 4  ;;  %v3946_v34 = vshll.u32 %v3851_v53, 16  ;;  %v4146_v51 = vld [vmem:[#allocation3] sm:$0xf0]  ;;  %v7787_v39 = vld [vmem:[#allocation10 + $0x28] sm:$0xff]  }
 0x2e7   : > { %v3951_v11 = vshrl.u32 %v3852_v58, 16  ;;  %7387 = vmatpush3.bf16.msra.mxu1 %v7785_v9  ;;  %v3932_v12 = vor.u32 %v3931_v5, %v3928_v4  ;;  %v3954_v55 = vshll.u32 %v3852_v58, 16  ;;  %v3960_v46 = vshrl.u32 %v3853_v43, 16  ;;  %v4147_v52 = vld [vmem:[#allocation3 + $0x8] sm:$0xf] }
 0x2e8   : > { %v3945_v15 = vrot.slane %v3943_v7, 3  ;;  %7404 = vmatprep.subr.bf16.mxu1 %v8864_v13  ;;  %v3924_v17 = vsel %vm478_vm2, %v3915_v24, %v3923_v8  ;;  %v3940_v18 = vor.u32 %v3939_v10, %v3936_v6  ;;  %v3948_v19 = vrot.slane %v3946_v34, 4  ;;  %v4148_v59 = vld [vmem:[#allocation3 + $0x10] sm:$0xf0]  ;;  %v4149_v28 = vld [vmem:[#allocation3 + $0x18] sm:$0xf] }
 0x2e9   : > { %v3953_v20 = vrot.slane %v3951_v11, 3  ;;  %v3956_v21 = vrot.slane %v3954_v55, 4  ;;  %v3962_v57 = vrot.slane %v3960_v46, 3  ;;  %v3963_v23 = vshll.u32 %v3853_v43, 16  ;;  %v4150_v37 = vld [vmem:[#allocation3 + $0x20] sm:$0xf0] }
 0x2ea   : > { %7373 = vmatmul.mubr.msk.bf16.gmra.mrb[24].mxu1 %vm801_vm6, %v3924_v17  ;;  %v3968_v60 = vshrl.u32 %v3854_v45, 16  ;;  %v3941_v26 = vsel %vm478_vm2, %v3932_v12, %v3940_v18  ;;  %v3949_v29 = vor.u32 %v3948_v19, %v3945_v15  ;;  %v3971_v31 = vshll.u32 %v3854_v45, 16  ;;  %v4151_v3 = vld [vmem:[#allocation3 + $0x28] sm:$0xf]  ;;  %v4152_v30 = vld [vmem:[#allocation3 + $0x30] sm:$0xf0] }
 0x2eb   : > { %v3977_v35 = vshrl.u32 %v3855_v47, 16  ;;  %7376 = vmatprep.mubr.msk.bf16.mxu1 %vm801_vm6, %v3941_v26  ;;  %v3957_v36 = vor.u32 %v3956_v21, %v3953_v20  ;;  %v3965_v62 = vrot.slane %v3963_v23, 4  ;;  %v3980_v40 = vshll.u32 %v3855_v47, 16  ;;  %v4153_v43 = vld [vmem:[#allocation3 + $0x38] sm:$0xf] }
 0x2ec   : > { %v3970_v38 = vrot.slane %v3968_v60, 3  ;;  %v3973_v41 = vrot.slane %v3971_v31, 4  ;;  %v3985_v63 = vshrl.u32 %v3856_v25, 16  ;;  %v3988_v42 = vshll.u32 %v3856_v25, 16  ;;  %v4154_v33 = vld [vmem:[#allocation3 + $0x40] sm:$0xf0] }
 0x2ed   : > { %v3958_v44 = vsel %vm478_vm2, %v3949_v29, %v3957_v36  ;;  %v3966_v22 = vor.u32 %v3965_v62, %v3962_v57  ;;  %v3979_v48 = vrot.slane %v3977_v35, 3  ;;  %v3982_v49 = vrot.slane %v3980_v40, 4  ;;  %v4155_v5 = vld [vmem:[#allocation3 + $0x48] sm:$0xf]  ;;  %v8886_v34 = vld [vmem:[#allocation10 + $0x30] sm:$0xff]  }
 0x2ee   : > { %v3974_v32 = vor.u32 %v3973_v41, %v3970_v38  ;;  %v3987_v9 = vrot.slane %v3985_v63, 3  ;;  %v3990_v50 = vrot.slane %v3988_v42, 4  ;;  %v4178_v27 = vrot.slane %v4146_v51, 4  ;;  %v4156_v45 = vld [vmem:[#allocation3 + $0x50] sm:$0xf0] }
 0x2ef   : > { %v3983_v53 = vor.u32 %v3982_v49, %v3979_v48  ;;  %v4179_v56 = vrot.slane %v4147_v52, 4  ;;  %v4181_v61 = vrot.slane %v4148_v59, 4  ;;  %v4182_v0 = vrot.slane %v4149_v28, 4  ;;  %v4157_v12 = vld [vmem:[#allocation3 + $0x58] sm:$0xf] }
 0x2f0   : > { %v3975_v14 = vsel %vm478_vm2, %v3966_v22, %v3974_v32  ;;  %v3991_v54 = vor.u32 %v3990_v50, %v3987_v9  ;;  %v4184_v1 = vrot.slane %v4150_v37, 4  ;;  %v4185_v2 = vrot.slane %v4151_v3, 4  ;;  %v4158_v55 = vld [vmem:[#allocation3 + $0x60] sm:$0xf0]  ;;  %v4389_v47 = vld [vmem:[#allocation3 + $0x8] sm:$0x1f] }
 0x2f1   : > { %v4180_v58 = vsel %vm862_vm4, %v4178_v27, %v4179_v56  ;;  %v4183_v24 = vsel %vm862_vm4, %v4181_v61, %v4182_v0  ;;  %v4187_v6 = vrot.slane %v4152_v30, 4  ;;  %v4188_v7 = vrot.slane %v4153_v43, 4  ;;  %v4388_v46 = vld [vmem:[#allocation3] sm:$0xf0]  ;;  %v4390_v26 = vld [vmem:[#allocation3 + $0x10] sm:$0xf0] }
 0x2f2   : > { %7377 = vmatmul.mubr.msk.bf16.gmra.mrb[28].mxu1 %vm801_vm6, %v3958_v44  ;;  %v3992_v16 = vsel %vm478_vm2, %v3983_v53, %v3991_v54  ;;  %v4186_v4 = vsel %vm862_vm4, %v4184_v1, %v4185_v2  ;;  %v4190_v8 = vrot.slane %v4154_v33, 4  ;;  %v4191_v10 = vrot.slane %v4155_v5, 4  ;;  %v4391_v62 = vld [vmem:[#allocation3 + $0x18] sm:$0x1f]  ;;  %v4160_v40 = vld [vmem:[#allocation3 + $0x70] sm:$0xf0] }
 0x2f3   : > { %7380 = vmatprep.mubr.msk.bf16.mxu1 %vm801_vm6, %v3975_v14  ;;  %v4189_v11 = vsel %vm862_vm4, %v4187_v6, %v4188_v7  ;;  %v4193_v17 = vrot.slane %v4156_v45, 4  ;;  %v4194_v18 = vrot.slane %v4157_v12, 4  ;;  %v4405_v19 = vshrl.u32 %v4388_v46, 16  ;;  %v4161_v41 = vld [vmem:[#allocation3 + $0x78] sm:$0xf] }
 0x2f4   : > { %v4192_v15 = vsel %vm862_vm4, %v4190_v8, %v4191_v10  ;;  %v4408_v20 = vshll.u32 %v4388_v46, 16  ;;  %v4413_v21 = vshrl.u32 %v4389_v47, 16  ;;  %v4416_v57 = vshll.u32 %v4389_v47, 16  ;;  %v4392_v63 = vld [vmem:[#allocation3 + $0x20] sm:$0xf0] }
 0x2f5   : > { %v4196_v23 = vrot.slane %v4158_v55, 4  ;;  %v4195_v25 = vsel %vm862_vm4, %v4193_v17, %v4194_v18  ;;  %v4407_v29 = vrot.slane %v4405_v19, 4  ;;  %v4393_v42 = vld [vmem:[#allocation3 + $0x28] sm:$0x1f]  ;;  %v4422_v44 = vshrl.u32 %v4390_v26, 16 }
 0x2f6   : > { %v4410_v31 = vrot.slane %v4408_v20, 5  ;;  %v4415_v35 = vrot.slane %v4413_v21, 4  ;;  %v4418_v36 = vrot.slane %v4416_v57, 5  ;;  %v4425_v22 = vshll.u32 %v4390_v26, 16  ;;  %v4394_v59 = vld [vmem:[#allocation3 + $0x30] sm:$0xf0] }
 0x2f7   : > { %v4430_v48 = vshrl.u32 %v4391_v62, 16  ;;  %v4433_v32 = vshll.u32 %v4391_v62, 16  ;;  %v4199_v49 = vrot.slane %v4160_v40, 4  ;;  %v4200_v9 = vrot.slane %v4161_v41, 4  ;;  %v4395_v3 = vld [vmem:[#allocation3 + $0x38] sm:$0x1f] }
 0x2f8   : > { %v4411_v50 = vor.u32 %v4410_v31, %v4407_v29  ;;  %v4419_v14 = vor.u32 %v4418_v36, %v4415_v35  ;;  %v4439_v51 = vshrl.u32 %v4392_v63, 16  ;;  %v4442_v52 = vshll.u32 %v4392_v63, 16  ;;  %v4396_v61 = vld [vmem:[#allocation3 + $0x40] sm:$0xf0]  ;;  %v4399_v17 = vld [vmem:[#allocation3 + $0x58] sm:$0x1f] }
 0x2f9   : > { %v4447_v53 = vshrl.u32 %v4393_v42, 16  ;;  %v4450_v54 = vshll.u32 %v4393_v42, 16  ;;  %v4424_v27 = vrot.slane %v4422_v44, 4  ;;  %v4427_v56 = vrot.slane %v4425_v22, 5  ;;  %v4401_v36 = vld [vmem:[#allocation3 + $0x68] sm:$0x1f] }
 0x2fa   : > { %7381 = vmatmul.mubr.msk.bf16.gmra.mrb[32].mxu1 %vm801_vm6, %v3992_v16  ;;  %v4432_v16 = vrot.slane %v4430_v48, 4  ;;  %v4201_v28 = vsel %vm862_vm4, %v4199_v49, %v4200_v9  ;;  %v4420_v37 = vsel %vm1125_vm5, %v4411_v50, %v4419_v14  ;;  %v4441_v0 = vrot.slane %v4439_v51, 4  ;;  %v8906_v48 = vld [vmem:[#allocation10 + $0x40] sm:$0xff]   ;;  %v4402_v14 = vld [vmem:[#allocation3 + $0x70] sm:$0xf0] }
 0x2fb   : > { %7388 = vmatprep.mubr.msk.bf16.mxu1 %vm801_vm6, %v4180_v58  ;;  %v4435_v58 = vrot.slane %v4433_v32, 5  ;;  %v4444_v1 = vrot.slane %v4442_v52, 5  ;;  %v4449_v2 = vrot.slane %v4447_v53, 4  ;;  %v4459_v30 = vshll.u32 %v4394_v59, 16  ;;  %v4403_v52 = vld [vmem:[#allocation3 + $0x78] sm:$0x1f] }
 0x2fc   : > { %v4464_v43 = vshrl.u32 %v4395_v3, 16  ;;  %v4467_v33 = vshll.u32 %v4395_v3, 16  ;;  %v4428_v5 = vor.u32 %v4427_v56, %v4424_v27  ;;  %v4473_v7 = vshrl.u32 %v4396_v61, 16  ;;  %v4727_v53 = vld [vmem:[#allocation3 + $0x10] sm:$0xf8] }
 0x2fd   : > { %v4436_v6 = vor.u32 %v4435_v58, %v4432_v16  ;;  %v4476_v8 = vshll.u32 %v4396_v61, 16  ;;  %v4445_v10 = vor.u32 %v4444_v1, %v4441_v0  ;;  %v4461_v46 = vrot.slane %v4459_v30, 5  ;;  %v4728_v58 = vld [vmem:[#allocation3 + $0x18] sm:$0xf] }
 0x2fe   : > { %v4466_v47 = vrot.slane %v4464_v43, 4  ;;  %v4475_v19 = vrot.slane %v4473_v7, 4  ;;  %v4498_v31 = vshrl.u32 %v4399_v17, 16  ;;  %v4501_v35 = vshll.u32 %v4399_v17, 16 }
 0x2ff   : > { %v4437_v18 = vsel %vm1125_vm5, %v4428_v5, %v4436_v6  ;;  %v4478_v20 = vrot.slane %v4476_v8, 5  ;;  %v4515_v44 = vshrl.u32 %v4401_v36, 16  ;;  %v4518_v22 = vshll.u32 %v4401_v36, 16  ;;  %v4730_v5 = vld [vmem:[#allocation3 + $0x28] sm:$0xf] }
 0x300   : > { %v4500_v9 = vrot.slane %v4498_v31, 4  ;;  %v4503_v50 = vrot.slane %v4501_v35, 5  ;;  %v4527_v3 = vshll.u32 %v4402_v14, 16  ;;  %v4532_v61 = vshrl.u32 %v4403_v52, 16  ;;  %v4733_v31 = vld [vmem:[#allocation3 + $0x40] sm:$0xf8] }
 0x301   : > { %v4479_v40 = vor.u32 %v4478_v20, %v4475_v19  ;;  %v4517_v56 = vrot.slane %v4515_v44, 4  ;;  %v4520_v16 = vrot.slane %v4518_v22, 5  ;;  %v4535_v0 = vshll.u32 %v4403_v52, 16 }
 0x302   : > { %7389 = vmatmul.mubr.msk.bf16.vlgmr.msra.gmra.mrb[20].mxu1 %vm801_vm6, %v4183_v24  ;;  %v4452_v24 = vrot.slane %v4450_v54, 5  ;;  %v4744_v1 = vshrl.u32 %v4727_v53, 16  ;;  %v4529_v7 = vrot.slane %v4527_v3, 5  ;;  %v4534_v8 = vrot.slane %v4532_v61, 4 }
 0x303   : > { %7405 = vmatpush3.bf16.msra.mxu1 %v8864_v13  ;;  %7392 = vmatprep.mubr.msk.bf16.mxu1 %vm801_vm6, %v4186_v4  ;;  %v4159_v13 = vld [vmem:[#allocation3 + $0x68] sm:$0xf]  ;;  %v4456_v4 = vshrl.u32 %v4394_v59, 16  ;;  %v4521_v30 = vor.u32 %v4520_v16, %v4517_v56  ;;  %v4772_v19 = vshll.u32 %v4730_v5, 16 }
 0x304   : > { %7406 = vmatprep.subr.bf16.mxu1 %v7787_v39  ;;  %v4197_v60 = vrot.slane %v4159_v13, 4  ;;  %v4469_v13 = vrot.slane %v4467_v33, 5  ;;  %v4729_v33 = vld [vmem:[#allocation3 + $0x20] sm:$0xf8] }
 0x305   : > { %v4458_v55 = vrot.slane %v4456_v4, 4  ;;  %v4764_v17 = vshll.u32 %v4729_v33, 16 }
 0x306   : > { %v4198_v38 = vsel %vm862_vm4, %v4196_v23, %v4197_v60  ;;  %v7789_v60 = vld [vmem:[#allocation10 + $0x38] sm:$0xff]  }
 0x307   : > { %7407 = vmatpush3.bf16.msra.mxu1 %v7787_v39  ;;  %v4397_v39 = vld [vmem:[#allocation3 + $0x48] sm:$0x1f]  ;;  %v4462_v62 = vor.u32 %v4461_v46, %v4458_v55  ;;  %v4731_v46 = vld [vmem:[#allocation3 + $0x30] sm:$0xf8]  ;;  %v4766_v36 = vrot.slane %v4764_v17, 4 }
 0x308   : > { %7424 = vmatprep.subr.bf16.mxu1 %v8886_v34  ;;  %v4481_v45 = vshrl.u32 %v4397_v39, 16  ;;  %v4484_v12 = vshll.u32 %v4397_v39, 16  ;;  %v4755_v39 = vshll.u32 %v4728_v58, 16 }
 0x30a   : > { %7393 = vmatmul.mubr.msk.bf16.gmra.mrb[24].mxu1 %vm801_vm6, %v4189_v11  ;;  %v4453_v11 = vor.u32 %v4452_v24, %v4449_v2  ;;  %v4483_v57 = vrot.slane %v4481_v45, 4  ;;  %v4486_v23 = vrot.slane %v4484_v12, 5  ;;  %v4747_v2 = vshll.u32 %v4727_v53, 16 }
 0x30b   : > { %7396 = vmatprep.mubr.msk.bf16.mxu1 %vm801_vm6, %v4192_v15  ;;  %v4398_v15 = vld [vmem:[#allocation3 + $0x50] sm:$0xf0]  ;;  %v4752_v24 = vshrl.u32 %v4728_v58, 16 }
 0x30c   : > { %v4454_v21 = vsel %vm1125_vm5, %v4445_v10, %v4453_v11  ;;  %v4490_v26 = vshrl.u32 %v4398_v15, 16  ;;  %v4493_v29 = vshll.u32 %v4398_v15, 16  ;;  %v4487_v63 = vor.u32 %v4486_v23, %v4483_v57 }
 0x30d   : > { %v4537_v10 = vrot.slane %v4535_v0, 5  ;;  %v4746_v11 = vrot.slane %v4744_v1, 3  ;;  %v4749_v45 = vrot.slane %v4747_v2, 4  ;;  %v4754_v12 = vrot.slane %v4752_v24, 3  ;;  %v4737_v1 = vld [vmem:[#allocation3 + $0x60] sm:$0xf8] }
 0x30e   : > { %v4492_v32 = vrot.slane %v4490_v26, 4  ;;  %v4495_v49 = vrot.slane %v4493_v29, 5  ;;  %v4488_v54 = vsel %vm1125_vm5, %v4479_v40, %v4487_v63  ;;  %v4757_v15 = vrot.slane %v4755_v39, 4  ;;  %v4734_v63 = vld [vmem:[#allocation3 + $0x48] sm:$0xf] }
 0x30f   : > { %v4750_v57 = vor.u32 %v4749_v45, %v4746_v11  ;;  %v4803_v52 = vshrl.u32 %v4734_v63, 16  ;;  %v4806_v53 = vshll.u32 %v4734_v63, 16 }
 0x310   : > { %v4496_v59 = vor.u32 %v4495_v49, %v4492_v32  ;;  %v4758_v23 = vor.u32 %v4757_v15, %v4754_v12 }
 0x311   : > { %v4805_v61 = vrot.slane %v4803_v52, 3  ;;  %v4808_v0 = vrot.slane %v4806_v53, 4 }
 0x312   : > { %7397 = vmatmul.mubr.msk.bf16.gmra.mrb[28].mxu1 %vm801_vm6, %v4195_v25  ;;  %v4400_v25 = vld [vmem:[#allocation3 + $0x60] sm:$0xf0] }
 0x313   : > { %7400 = vmatprep.mubr.msk.bf16.mxu1 %vm801_vm6, %v4198_v38  ;;  %v4470_v38 = vor.u32 %v4469_v13, %v4466_v47  ;;  %v4507_v41 = vshrl.u32 %v4400_v25, 16  ;;  %v4510_v42 = vshll.u32 %v4400_v25, 16  ;;  %v4732_v47 = vld [vmem:[#allocation3 + $0x38] sm:$0xf]  ;;  %v4761_v13 = vshrl.u32 %v4729_v33, 16  ;;  %v7791_v33 = vld [vmem:[#allocation10 + $0x48] sm:$0xff]  }
 0x314   : > { %v4781_v25 = vshll.u32 %v4731_v46, 16  ;;  %v4786_v26 = vshrl.u32 %v4732_v47, 16  ;;  %v4789_v29 = vshll.u32 %v4732_v47, 16  ;;  %v4809_v12 = vor.u32 %v4808_v0, %v4805_v61 }
 0x315   : > { %v4509_v51 = vrot.slane %v4507_v41, 4  ;;  %v4512_v27 = vrot.slane %v4510_v42, 5  ;;  %v4763_v35 = vrot.slane %v4761_v13, 3  ;;  %v4759_v41 = vsel %vm478_vm2, %v4750_v57, %v4758_v23  ;;  %v4735_v42 = vld [vmem:[#allocation3 + $0x50] sm:$0xf8] }
 0x316   : > { %v4783_v22 = vrot.slane %v4781_v25, 4  ;;  %v4788_v32 = vrot.slane %v4786_v26, 3  ;;  %v4791_v49 = vrot.slane %v4789_v29, 4 }
 0x317   : > { %v4513_v4 = vor.u32 %v4512_v27, %v4509_v51  ;;  %v4815_v27 = vshll.u32 %v4735_v42, 16 }
 0x319   : > { %v4522_v55 = vsel %vm1125_vm5, %v4513_v4, %v4521_v30  ;;  %v4817_v24 = vrot.slane %v4815_v27, 4  ;;  %v4738_v30 = vld [vmem:[#allocation3 + $0x68] sm:$0xf] }
 0x31a   : > { %7401 = vmatmul.mubr.msk.bf16.gmra.mrb[32].mxu1 %vm801_vm6, %v4201_v28  ;;  %v4504_v28 = vor.u32 %v4503_v50, %v4500_v9  ;;  %v4736_v9 = vld [vmem:[#allocation3 + $0x58] sm:$0xf]  ;;  %v4795_v50 = vshrl.u32 %v4733_v31, 16  ;;  %v4837_v11 = vshrl.u32 %v4738_v30, 16  ;;  %v4840_v45 = vshll.u32 %v4738_v30, 16  ;;  %v7793_v30 = vld [vmem:[#allocation10 + $0x58] sm:$0xff]  }
 0x31b   : > { %7408 = vmatprep.mubr.msk.bf16.mxu1 %vm801_vm6, %v4420_v37  ;;  %v4524_v37 = vshrl.u32 %v4402_v14, 16  ;;  %v4798_v14 = vshll.u32 %v4733_v31, 16  ;;  %v4820_v56 = vshrl.u32 %v4736_v9, 16  ;;  %v4823_v16 = vshll.u32 %v4736_v9, 16 }
 0x31c   : > { %v4505_v43 = vsel %vm1125_vm5, %v4496_v59, %v4504_v28  ;;  %v4792_v59 = vor.u32 %v4791_v49, %v4788_v32  ;;  %v4797_v28 = vrot.slane %v4795_v50, 3  ;;  %v4842_v57 = vrot.slane %v4840_v45, 4 }
 0x31d   : > { %v4526_v6 = vrot.slane %v4524_v37, 4  ;;  %v4800_v37 = vrot.slane %v4798_v14, 4  ;;  %v4822_v39 = vrot.slane %v4820_v56, 3  ;;  %v4825_v4 = vrot.slane %v4823_v16, 4 }
 0x31f   : > { %v4530_v20 = vor.u32 %v4529_v7, %v4526_v6  ;;  %v4739_v6 = vld [vmem:[#allocation3 + $0x70] sm:$0xf8]  ;;  %v4740_v7 = vld [vmem:[#allocation3 + $0x78] sm:$0xf] }
 0x320   : > { %v4849_v47 = vshll.u32 %v4739_v6, 16  ;;  %v4854_v13 = vshrl.u32 %v4740_v7, 16  ;;  %v4857_v17 = vshll.u32 %v4740_v7, 16 }
 0x322   : > { %7409 = vmatmul.mubr.msk.bf16.vlgmr.msra.gmra.mrb[20].mxu1 %vm801_vm6, %v4437_v18  ;;  %v4769_v18 = vshrl.u32 %v4730_v5, 16  ;;  %v4801_v5 = vor.u32 %v4800_v37, %v4797_v28  ;;  %v4851_v26 = vrot.slane %v4849_v47, 4  ;;  %v4856_v29 = vrot.slane %v4854_v13, 3  ;;  %v5069_v28 = vld [vmem:[#allocation3 + $0x30] sm:$0xf0] }
 0x323   : > { %7425 = vmatpush3.bf16.msra.mxu1 %v8886_v34  ;;  %7412 = vmatprep.mubr.msk.bf16.mxu1 %vm801_vm6, %v4454_v21  ;;  %v4471_v34 = vsel %vm1125_vm5, %v4462_v62, %v4470_v38  ;;  %v4538_v21 = vor.u32 %v4537_v10, %v4534_v8  ;;  %v4774_v38 = vrot.slane %v4772_v19, 4  ;;  %v4829_v8 = vshrl.u32 %v4737_v1, 16  ;;  %v5070_v37 = vld [vmem:[#allocation3 + $0x38] sm:$0xf] }
 0x324   : > { %7426 = vmatprep.subr.bf16.mxu1 %v7789_v60  ;;  %v4771_v62 = vrot.slane %v4769_v18, 3  ;;  %v4832_v10 = vshll.u32 %v4737_v1, 16  ;;  %v7792_v18 = vld [vmem:[#allocation10 + $0x50] sm:$0xff]   ;;  %v4810_v23 = vsel %vm478_vm2, %v4801_v5, %v4809_v12  ;;  %v4859_v31 = vrot.slane %v4857_v17, 4  ;;  %v5075_v12 = vld [vmem:[#allocation3 + $0x60] sm:$0xf0] }
 0x325   : > { %v4539_v40 = vsel %vm1125_vm5, %v4530_v20, %v4538_v21  ;;  %v4831_v19 = vrot.slane %v4829_v8, 3  ;;  %v4839_v21 = vrot.slane %v4837_v11, 3  ;;  %v5103_v0 = vrot.slane %v5069_v28, 4  ;;  %v5078_v47 = vld [vmem:[#allocation3 + $0x78] sm:$0xf] }
 0x326   : > { %v4775_v51 = vor.u32 %v4774_v38, %v4771_v62  ;;  %v4834_v20 = vrot.slane %v4832_v10, 4  ;;  %v5104_v1 = vrot.slane %v5070_v37, 4  ;;  %v8942_v10 = vld [vmem:[#allocation10 + $0x60] sm:$0xff]   ;;  %v5308_v13 = vld [vmem:[#allocation3 + $0x18] sm:$0x1f]  ;;  %v5112_v17 = vrot.slane %v5075_v12, 4 }
 0x327   : > { %7427 = vmatpush3.bf16.msra.mxu1 %v7789_v60  ;;  %v4778_v60 = vshrl.u32 %v4731_v46, 16  ;;  %v4846_v46 = vshrl.u32 %v4739_v6, 16  ;;  %v4843_v62 = vor.u32 %v4842_v57, %v4839_v21  ;;  %v5116_v57 = vrot.slane %v5078_v47, 4  ;;  %v5313_v28 = vld [vmem:[#allocation3 + $0x40] sm:$0xf0] }
 0x328   : > { %7444 = vmatprep.subr.bf16.mxu1 %v8906_v48  ;;  %v5314_v37 = vld [vmem:[#allocation3 + $0x48] sm:$0x1f]  ;;  %v5317_v47 = vld [vmem:[#allocation3 + $0x60] sm:$0xf0] }
 0x329   : > { %v4780_v44 = vrot.slane %v4778_v60, 3  ;;  %v4848_v25 = vrot.slane %v4846_v46, 3  ;;  %v5077_v46 = vld [vmem:[#allocation3 + $0x70] sm:$0xf0] }
 0x32a   : > { %7413 = vmatmul.mubr.msk.bf16.gmra.mrb[24].mxu1 %vm801_vm6, %v4471_v34  ;;  %v4767_v34 = vor.u32 %v4766_v36, %v4763_v35  ;;  %v4742_v35 = vld [vmem:[#allocation3 + $0x88] sm:$0xf]  ;;  %v4835_v36 = vor.u32 %v4834_v20, %v4831_v19  ;;  %v5115_v21 = vrot.slane %v5077_v46, 4 }
 0x32b   : > { %7416 = vmatprep.mubr.msk.bf16.mxu1 %vm801_vm6, %v4488_v54  ;;  %v4812_v54 = vshrl.u32 %v4735_v42, 16  ;;  %v4784_v58 = vor.u32 %v4783_v22, %v4780_v44  ;;  %v4874_v63 = vshll.u32 %v4742_v35, 16  ;;  %v4852_v42 = vor.u32 %v4851_v26, %v4848_v25 }
 0x32c   : > { %v4776_v3 = vsel %vm478_vm2, %v4767_v34, %v4775_v51  ;;  %v4860_v44 = vor.u32 %v4859_v31, %v4856_v29  ;;  %v4844_v22 = vsel %vm478_vm2, %v4835_v36, %v4843_v62  ;;  %v5065_v34 = vld [vmem:[#allocation3 + $0x10] sm:$0xf0]  ;;  %v5066_v51 = vld [vmem:[#allocation3 + $0x18] sm:$0xf]  ;;  %v5309_v31 = vld [vmem:[#allocation3 + $0x20] sm:$0xf0]  ;;  %v5117_v36 = vsel %vm862_vm4, %v5115_v21, %v5116_v57 }
 0x32d   : > { %v4814_v2 = vrot.slane %v4812_v54, 3  ;;  %v4876_v50 = vrot.slane %v4874_v63, 4  ;;  %v5097_v54 = vrot.slane %v5065_v34, 4  ;;  %v5098_v27 = vrot.slane %v5066_v51, 4  ;;  %v5080_v62 = vld [vmem:[#allocation3 + $0x88] sm:$0xf] }
 0x32e   : > { %v4861_v14 = vsel %vm478_vm2, %v4852_v42, %v4860_v44  ;;  %v5312_v63 = vld [vmem:[#allocation3 + $0x38] sm:$0x1f]  ;;  %v5341_v42 = vshrl.u32 %v5309_v31, 16  ;;  %v5344_v44 = vshll.u32 %v5309_v31, 16 }
 0x32f   : > { %v4818_v15 = vor.u32 %v4817_v24, %v4814_v2  ;;  %v5099_v16 = vsel %vm862_vm4, %v5097_v54, %v5098_v27  ;;  %v5105_v24 = vsel %vm862_vm4, %v5103_v0, %v5104_v1 }
 0x330   : > { %v5343_v54 = vrot.slane %v5341_v42, 4  ;;  %v5346_v27 = vrot.slane %v5344_v44, 5 }
 0x332   : > { %7417 = vmatmul.mubr.msk.bf16.gmra.mrb[28].mxu1 %vm801_vm6, %v4505_v43  ;;  %v4793_v43 = vsel %vm478_vm2, %v4784_v58, %v4792_v59  ;;  %v5067_v58 = vld [vmem:[#allocation3 + $0x20] sm:$0xf0]  ;;  %v5068_v59 = vld [vmem:[#allocation3 + $0x28] sm:$0xf] }
 0x333   : > { %7420 = vmatprep.mubr.msk.bf16.mxu1 %vm801_vm6, %v4522_v55  ;;  %v4826_v55 = vor.u32 %v4825_v4, %v4822_v39  ;;  %v5101_v61 = vrot.slane %v5068_v59, 4  ;;  %v5071_v39 = vld [vmem:[#allocation3 + $0x40] sm:$0xf0]  ;;  %v5072_v4 = vld [vmem:[#allocation3 + $0x48] sm:$0xf] }
 0x334   : > { %v5106_v5 = vrot.slane %v5071_v39, 4  ;;  %v5107_v6 = vrot.slane %v5072_v4, 4  ;;  %v5347_v39 = vor.u32 %v5346_v27, %v5343_v54 }
 0x335   : > { %v4827_v60 = vsel %vm478_vm2, %v4818_v15, %v4826_v55  ;;  %v5076_v15 = vld [vmem:[#allocation3 + $0x68] sm:$0xf]  ;;  %v5307_v55 = vld [vmem:[#allocation3 + $0x10] sm:$0xf0] }
 0x336   : > { %v5108_v11 = vsel %vm862_vm4, %v5106_v5, %v5107_v6  ;;  %v5324_v19 = vshrl.u32 %v5307_v55, 16  ;;  %v5327_v20 = vshll.u32 %v5307_v55, 16  ;;  %v5386_v5 = vshll.u32 %v5314_v37, 16 }
 0x338   : > { %v5326_v26 = vrot.slane %v5324_v19, 4  ;;  %v5329_v29 = vrot.slane %v5327_v20, 5 }
 0x33a   : > { %7421 = vmatmul.mubr.msk.bf16.gmra.mrb[32].mxu1 %vm801_vm6, %v4539_v40 }
 0x33b   : > { %7428 = vmatprep.mubr.msk.bf16.mxu1 %vm801_vm6, %v4759_v41  ;;  %v4871_v41 = vshrl.u32 %v4742_v35, 16  ;;  %v5310_v35 = vld [vmem:[#allocation3 + $0x28] sm:$0x1f] }
 0x33d   : > { %v4873_v9 = vrot.slane %v4871_v41, 3  ;;  %v5311_v41 = vld [vmem:[#allocation3 + $0x30] sm:$0xf0] }
 0x33e   : > { %v5361_v51 = vshll.u32 %v5311_v41, 16 }
 0x33f   : > { %v4877_v53 = vor.u32 %v4876_v50, %v4873_v9  ;;  %v5119_v9 = vrot.slane %v5080_v62, 4  ;;  %v5330_v50 = vor.u32 %v5329_v29, %v5326_v26  ;;  %v5412_v26 = vshll.u32 %v5317_v47, 16 }
 0x342   : > { %7429 = vmatmul.mubr.msk.bf16.vlgmr.msra.gmra.mrb[20].mxu1 %vm801_vm6, %v4776_v3  ;;  %v5100_v3 = vrot.slane %v5067_v58, 4 }
 0x343   : > { %7445 = vmatpush3.bf16.msra.mxu1 %v8906_v48  ;;  %7432 = vmatprep.mubr.msk.bf16.mxu1 %vm801_vm6, %v4793_v43  ;;  %v4741_v48 = vld [vmem:[#allocation3 + $0x80] sm:$0xf8]  ;;  %v5073_v43 = vld [vmem:[#allocation3 + $0x50] sm:$0xf0] }
 0x344   : > { %7446 = vmatprep.subr.bf16.mxu1 %v7791_v33  ;;  %v4863_v38 = vshrl.u32 %v4741_v48, 16  ;;  %v4866_v40 = vshll.u32 %v4741_v48, 16  ;;  %v5102_v2 = vsel %vm862_vm4, %v5100_v3, %v5101_v61  ;;  %v5109_v7 = vrot.slane %v5073_v43, 4  ;;  %v5079_v48 = vld [vmem:[#allocation3 + $0x80] sm:$0xf0] }
 0x345   : > { %v5363_v61 = vrot.slane %v5361_v51, 5  ;;  %v5378_v43 = vshll.u32 %v5313_v28, 16  ;;  %v5322_v51 = vld [vmem:[#allocation3 + $0x88] sm:$0x1f] }
 0x346   : > { %v4865_v32 = vrot.slane %v4863_v38, 3  ;;  %v4868_v49 = vrot.slane %v4866_v40, 4 }
 0x347   : > { %7447 = vmatpush3.bf16.msra.mxu1 %v7791_v33  ;;  %v5074_v33 = vld [vmem:[#allocation3 + $0x58] sm:$0xf]  ;;  %v5380_v46 = vrot.slane %v5378_v43, 5 }
 0x348   : > { %7464 = vmatprep.subr.bf16.mxu1 %v7792_v18  ;;  %v4869_v52 = vor.u32 %v4868_v49, %v4865_v32  ;;  %v5110_v8 = vrot.slane %v5074_v33, 4  ;;  %v5352_v32 = vshll.u32 %v5310_v35, 16  ;;  %v5118_v49 = vrot.slane %v5079_v48, 4  ;;  %v5319_v48 = vld [vmem:[#allocation3 + $0x70] sm:$0xf0] }
 0x349   : > { %v5383_v33 = vshrl.u32 %v5314_v37, 16 }
 0x34a   : > { %7433 = vmatmul.mubr.msk.bf16.gmra.mrb[24].mxu1 %vm801_vm6, %v4810_v23  ;;  %v4878_v56 = vsel %vm478_vm2, %v4869_v52, %v4877_v53  ;;  %v5111_v45 = vsel %vm862_vm4, %v5109_v7, %v5110_v8  ;;  %v5332_v23 = vshrl.u32 %v5308_v13, 16  ;;  %v5366_v52 = vshrl.u32 %v5312_v63, 16 }
 0x34b   : > { %7436 = vmatprep.mubr.msk.bf16.mxu1 %vm801_vm6, %v4827_v60  ;;  %v5335_v60 = vshll.u32 %v5308_v13, 16  ;;  %v5369_v53 = vshll.u32 %v5312_v63, 16  ;;  %v5120_v58 = vsel %vm862_vm4, %v5118_v49, %v5119_v9  ;;  %v5318_v13 = vld [vmem:[#allocation3 + $0x68] sm:$0x1f]  ;;  %v5429_v63 = vshll.u32 %v5319_v48, 16 }
 0x34c   : > { %v5334_v38 = vrot.slane %v5332_v23, 4  ;;  %v5368_v0 = vrot.slane %v5366_v52, 4  ;;  %v5417_v29 = vshrl.u32 %v5318_v13, 16  ;;  %v5420_v31 = vshll.u32 %v5318_v13, 16  ;;  %v5646_v52 = vld [vmem:[#allocation3 + $0x20] sm:$0xf8] }
 0x34d   : > { %v5337_v40 = vrot.slane %v5335_v60, 5  ;;  %v5371_v1 = vrot.slane %v5369_v53, 5  ;;  %v7795_v60 = vld [vmem:[#allocation10 + $0x68] sm:$0xff]   ;;  %v5414_v49 = vrot.slane %v5412_v26, 5  ;;  %v5431_v54 = vrot.slane %v5429_v63, 5 }
 0x34e   : > { %v5419_v9 = vrot.slane %v5417_v29, 4  ;;  %v5654_v63 = vld [vmem:[#allocation3 + $0x60] sm:$0xf8] }
 0x34f   : > { %v5338_v34 = vor.u32 %v5337_v40, %v5334_v38  ;;  %v5426_v40 = vshrl.u32 %v5319_v48, 16 }
 0x351   : > { %v5339_v3 = vsel %vm1125_vm5, %v5330_v50, %v5338_v34  ;;  %v5422_v50 = vrot.slane %v5420_v31, 5  ;;  %v5428_v34 = vrot.slane %v5426_v40, 4 }
 0x352   : > { %7437 = vmatmul.mubr.msk.bf16.gmra.mrb[28].mxu1 %vm801_vm6, %v4844_v22  ;;  %v5349_v22 = vshrl.u32 %v5310_v35, 16  ;;  %v5320_v35 = vld [vmem:[#allocation3 + $0x78] sm:$0x1f] }
 0x353   : > { %7440 = vmatprep.mubr.msk.bf16.mxu1 %vm801_vm6, %v4861_v14  ;;  %v5358_v14 = vshrl.u32 %v5311_v41, 16  ;;  %v5434_v42 = vshrl.u32 %v5320_v35, 16  ;;  %v5437_v44 = vshll.u32 %v5320_v35, 16 }
 0x355   : > { %v5360_v59 = vrot.slane %v5358_v14, 4  ;;  %v5321_v14 = vld [vmem:[#allocation3 + $0x80] sm:$0xf0]  ;;  %v5436_v27 = vrot.slane %v5434_v42, 4 }
 0x356   : > { %v5446_v37 = vshll.u32 %v5321_v14, 16 }
 0x357   : > { %v5364_v8 = vor.u32 %v5363_v61, %v5360_v59  ;;  %v5423_v59 = vor.u32 %v5422_v50, %v5419_v9  ;;  %v5454_v61 = vshll.u32 %v5322_v51, 16  ;;  %v5655_v9 = vld [vmem:[#allocation3 + $0x68] sm:$0xf] }
 0x35a   : > { %7441 = vmatmul.mubr.msk.bf16.gmra.mrb[32].mxu1 %vm801_vm6, %v4878_v56  ;;  %v5351_v56 = vrot.slane %v5349_v22, 4  ;;  %v8962_v22 = vld [vmem:[#allocation10 + $0x70] sm:$0xff]  }
 0x35b   : > { %7448 = vmatprep.mubr.msk.bf16.mxu1 %vm801_vm6, %v5099_v16  ;;  %v5354_v16 = vrot.slane %v5352_v32, 5 }
 0x35d   : > { %v5355_v4 = vor.u32 %v5354_v16, %v5351_v56  ;;  %v5439_v56 = vrot.slane %v5437_v44, 5  ;;  %v5647_v16 = vld [vmem:[#allocation3 + $0x28] sm:$0xf] }
 0x362   : > { %7449 = vmatmul.mubr.msk.bf16.vlgmr.msra.gmra.mrb[20].mxu1 %vm801_vm6, %v5102_v2  ;;  %v5315_v2 = vld [vmem:[#allocation3 + $0x50] sm:$0xf0] }
 0x363   : > { %7465 = vmatpush3.bf16.msra.mxu1 %v7792_v18  ;;  %7452 = vmatprep.mubr.msk.bf16.mxu1 %vm801_vm6, %v5105_v24  ;;  %v5113_v18 = vrot.slane %v5076_v15, 4  ;;  %v5316_v24 = vld [vmem:[#allocation3 + $0x58] sm:$0x1f]  ;;  %v5392_v6 = vshrl.u32 %v5315_v2, 16  ;;  %v5395_v7 = vshll.u32 %v5315_v2, 16  ;;  %v5356_v15 = vsel %vm1125_vm5, %v5347_v39, %v5355_v4 }
 0x364   : > { %7466 = vmatprep.subr.bf16.mxu1 %v7793_v30  ;;  %v5403_v12 = vshll.u32 %v5316_v24, 16  ;;  %v5671_v2 = vshrl.u32 %v5647_v16, 16  ;;  %v5432_v39 = vor.u32 %v5431_v54, %v5428_v34  ;;  %v5440_v4 = vor.u32 %v5439_v56, %v5436_v27 }
 0x365   : > { %v5114_v25 = vsel %vm862_vm4, %v5112_v17, %v5113_v18  ;;  %v5385_v17 = vrot.slane %v5383_v33, 4  ;;  %v5388_v18 = vrot.slane %v5386_v5, 5  ;;  %v5394_v19 = vrot.slane %v5392_v6, 4 }
 0x366   : > { %v5397_v20 = vrot.slane %v5395_v7, 5  ;;  %v5405_v23 = vrot.slane %v5403_v12, 5  ;;  %v5448_v33 = vrot.slane %v5446_v37, 5  ;;  %v5456_v6 = vrot.slane %v5454_v61, 5  ;;  %v5648_v7 = vld [vmem:[#allocation3 + $0x30] sm:$0xf8] }
 0x367   : > { %7467 = vmatpush3.bf16.msra.mxu1 %v7793_v30  ;;  %v5375_v30 = vshrl.u32 %v5313_v28, 16  ;;  %v5389_v62 = vor.u32 %v5388_v18, %v5385_v17  ;;  %v5443_v28 = vshrl.u32 %v5321_v14, 16  ;;  %v5680_v13 = vshrl.u32 %v5648_v7, 16 }
 0x368   : > { %7484 = vmatprep.subr.bf16.mxu1 %v8942_v10  ;;  %v5398_v38 = vor.u32 %v5397_v20, %v5394_v19  ;;  %v5683_v17 = vshll.u32 %v5648_v7, 16  ;;  %v5734_v54 = vshll.u32 %v5654_v63, 16  ;;  %v5739_v27 = vshrl.u32 %v5655_v9, 16 }
 0x369   : > { %v5377_v55 = vrot.slane %v5375_v30, 4  ;;  %v5445_v43 = vrot.slane %v5443_v28, 4  ;;  %v5682_v29 = vrot.slane %v5680_v13, 3  ;;  %v5742_v56 = vshll.u32 %v5655_v9, 16 }
 0x36a   : > { %7453 = vmatmul.mubr.msk.bf16.gmra.mrb[24].mxu1 %vm801_vm6, %v5108_v11  ;;  %v5372_v11 = vor.u32 %v5371_v1, %v5368_v0  ;;  %v5663_v0 = vshrl.u32 %v5646_v52, 16  ;;  %v5666_v1 = vshll.u32 %v5646_v52, 16  ;;  %v5685_v31 = vrot.slane %v5683_v17, 4 }
 0x36b   : > { %7456 = vmatprep.mubr.msk.bf16.mxu1 %vm801_vm6, %v5111_v45  ;;  %v5400_v45 = vshrl.u32 %v5316_v24, 16  ;;  %v5674_v24 = vshll.u32 %v5647_v16, 16  ;;  %v5449_v20 = vor.u32 %v5448_v33, %v5445_v43  ;;  %v7797_v43 = vld [vmem:[#allocation10 + $0x78] sm:$0xff]  }
 0x36c   : > { %v5373_v21 = vsel %vm1125_vm5, %v5364_v8, %v5372_v11  ;;  %v5665_v8 = vrot.slane %v5663_v0, 3  ;;  %v5668_v11 = vrot.slane %v5666_v1, 4  ;;  %v5656_v0 = vld [vmem:[#allocation3 + $0x70] sm:$0xf8] }
 0x36d   : > { %v5402_v57 = vrot.slane %v5400_v45, 4  ;;  %v5673_v45 = vrot.slane %v5671_v2, 3  ;;  %v5676_v12 = vrot.slane %v5674_v24, 4  ;;  %v5736_v2 = vrot.slane %v5734_v54, 4 }
 0x36e   : > { %v5741_v24 = vrot.slane %v5739_v27, 3  ;;  %v5748_v7 = vshrl.u32 %v5656_v0, 16 }
 0x36f   : > { %v5406_v41 = vor.u32 %v5405_v23, %v5402_v57  ;;  %v5669_v57 = vor.u32 %v5668_v11, %v5665_v8  ;;  %v5677_v23 = vor.u32 %v5676_v12, %v5673_v45  ;;  %v5751_v8 = vshll.u32 %v5656_v0, 16 }
 0x371   : > { %v5407_v53 = vsel %vm1125_vm5, %v5398_v38, %v5406_v41  ;;  %v5678_v40 = vsel %vm478_vm2, %v5669_v57, %v5677_v23  ;;  %v5653_v41 = vld [vmem:[#allocation3 + $0x58] sm:$0xf] }
 0x372   : > { %7457 = vmatmul.mubr.msk.bf16.gmra.mrb[28].mxu1 %vm801_vm6, %v5114_v25  ;;  %v5409_v25 = vshrl.u32 %v5317_v47, 16  ;;  %v5651_v47 = vld [vmem:[#allocation3 + $0x48] sm:$0xf]  ;;  %v5725_v52 = vshll.u32 %v5653_v41, 16 }
 0x373   : > { %7460 = vmatprep.mubr.msk.bf16.mxu1 %vm801_vm6, %v5117_v36  ;;  %v5381_v36 = vor.u32 %v5380_v46, %v5377_v55  ;;  %v5441_v55 = vsel %vm1125_vm5, %v5432_v39, %v5440_v4  ;;  %v5650_v46 = vld [vmem:[#allocation3 + $0x40] sm:$0xf8]  ;;  %v5708_v26 = vshll.u32 %v5651_v47, 16  ;;  %v5744_v39 = vrot.slane %v5742_v56, 4  ;;  %v5657_v4 = vld [vmem:[#allocation3 + $0x78] sm:$0xf] }
 0x374   : > { %v5411_v32 = vrot.slane %v5409_v25, 4  ;;  %v5700_v48 = vshll.u32 %v5650_v46, 16  ;;  %v5705_v25 = vshrl.u32 %v5651_v47, 16  ;;  %v5727_v61 = vrot.slane %v5725_v52, 4 }
 0x375   : > { %v5756_v11 = vshrl.u32 %v5657_v4, 16  ;;  %v5759_v45 = vshll.u32 %v5657_v4, 16  ;;  %v7799_v4 = vld [vmem:[#allocation10 + $0x88] sm:$0xff]  }
 0x376   : > { %v5702_v44 = vrot.slane %v5700_v48, 4 }
 0x377   : > { %v5761_v57 = vrot.slane %v5759_v45, 4 }
 0x37a   : > { %7461 = vmatmul.mubr.msk.bf16.gmra.mrb[32].mxu1 %vm801_vm6, %v5120_v58  ;;  %v5415_v58 = vor.u32 %v5414_v49, %v5411_v32  ;;  %v5707_v32 = vrot.slane %v5705_v25, 3  ;;  %v5710_v49 = vrot.slane %v5708_v26, 4 }
 0x37b   : > { %7468 = vmatprep.mubr.msk.bf16.mxu1 %vm801_vm6, %v5339_v3  ;;  %v5451_v3 = vshrl.u32 %v5322_v51, 16  ;;  %v5722_v51 = vshrl.u32 %v5653_v41, 16 }
 0x37c   : > { %v5424_v30 = vsel %vm1125_vm5, %v5415_v58, %v5423_v59  ;;  %v5711_v58 = vor.u32 %v5710_v49, %v5707_v32 }
 0x37d   : > { %v5453_v5 = vrot.slane %v5451_v3, 4  ;;  %v5724_v3 = vrot.slane %v5722_v51, 3 }
 0x37f   : > { %v5728_v12 = vor.u32 %v5727_v61, %v5724_v3 }
 0x382   : > { %7469 = vmatmul.mubr.msk.bf16.vlgmr.msra.gmra.mrb[20].mxu1 %vm801_vm6, %v5356_v15  ;;  %v5649_v15 = vld [vmem:[#allocation3 + $0x38] sm:$0xf] }
 0x383   : > { %7485 = vmatpush3.bf16.msra.mxu1 %v8942_v10  ;;  %7472 = vmatprep.mubr.msk.bf16.mxu1 %vm801_vm6, %v5373_v21  ;;  %v5390_v10 = vsel %vm1125_vm5, %v5381_v36, %v5389_v62  ;;  %v5688_v18 = vshrl.u32 %v5649_v15, 16  ;;  %v5691_v19 = vshll.u32 %v5649_v15, 16  ;;  %v5457_v21 = vor.u32 %v5456_v6, %v5453_v5  ;;  %v5652_v62 = vld [vmem:[#allocation3 + $0x50] sm:$0xf8]  ;;  %v5658_v5 = vld [vmem:[#allocation3 + $0x80] sm:$0xf8] }
 0x384   : > { %7486 = vmatprep.subr.bf16.mxu1 %v7795_v60  ;;  %v5714_v50 = vshrl.u32 %v5652_v62, 16  ;;  %v5717_v14 = vshll.u32 %v5652_v62, 16  ;;  %v5659_v6 = vld [vmem:[#allocation3 + $0x88] sm:$0xf]  ;;  %v5768_v47 = vshll.u32 %v5658_v5, 16 }
 0x385   : > { %v5690_v35 = vrot.slane %v5688_v18, 3  ;;  %v5693_v36 = vrot.slane %v5691_v19, 4  ;;  %v5458_v38 = vsel %vm1125_vm5, %v5449_v20, %v5457_v21  ;;  %v5773_v13 = vshrl.u32 %v5659_v6, 16  ;;  %v7798_v18 = vld [vmem:[#allocation10 + $0x80] sm:$0xff]  }
 0x386   : > { %v5716_v59 = vrot.slane %v5714_v50, 3  ;;  %v5719_v28 = vrot.slane %v5717_v14, 4  ;;  %v5776_v17 = vshll.u32 %v5659_v6, 16  ;;  %v5750_v19 = vrot.slane %v5748_v7, 3 }
 0x387   : > { %7487 = vmatpush3.bf16.msra.mxu1 %v7795_v60  ;;  %v5697_v60 = vshrl.u32 %v5650_v46, 16  ;;  %v5694_v34 = vor.u32 %v5693_v36, %v5690_v35  ;;  %v5765_v46 = vshrl.u32 %v5658_v5, 16  ;;  %v5753_v20 = vrot.slane %v5751_v8, 4 }
 0x388   : > { %7504 = vmatprep.subr.bf16.mxu1 %v8962_v22  ;;  %v5720_v33 = vor.u32 %v5719_v28, %v5716_v59  ;;  %v5758_v21 = vrot.slane %v5756_v11, 3  ;;  %v5770_v25 = vrot.slane %v5768_v47, 4  ;;  %v5775_v26 = vrot.slane %v5773_v13, 3  ;;  %v5988_v59 = vld [vmem:[#allocation3 + $0x40] sm:$0xf0] }
 0x389   : > { %v5699_v42 = vrot.slane %v5697_v60, 3  ;;  %v5767_v48 = vrot.slane %v5765_v46, 3  ;;  %v5754_v35 = vor.u32 %v5753_v20, %v5750_v19  ;;  %v5989_v28 = vld [vmem:[#allocation3 + $0x48] sm:$0xf]  ;;  %v6022_v61 = vrot.slane %v5988_v59, 4 }
 0x38a   : > { %7473 = vmatmul.mubr.msk.bf16.gmra.mrb[24].mxu1 %vm801_vm6, %v5390_v10  ;;  %v5686_v10 = vor.u32 %v5685_v31, %v5682_v29  ;;  %v5729_v23 = vsel %vm478_vm2, %v5720_v33, %v5728_v12  ;;  %v5778_v29 = vrot.slane %v5776_v17, 4  ;;  %v5661_v31 = vld [vmem:[#allocation3 + $0x98] sm:$0xf]  ;;  %v5762_v36 = vor.u32 %v5761_v57, %v5758_v21  ;;  %v5994_v11 = vld [vmem:[#allocation3 + $0x70] sm:$0xf0] }
 0x38b   : > { %7476 = vmatprep.mubr.msk.bf16.mxu1 %vm801_vm6, %v5407_v53  ;;  %v5731_v53 = vshrl.u32 %v5654_v63, 16  ;;  %v5703_v16 = vor.u32 %v5702_v44, %v5699_v42  ;;  %v5793_v41 = vshll.u32 %v5661_v31, 16  ;;  %v5771_v63 = vor.u32 %v5770_v25, %v5767_v48  ;;  %v5995_v12 = vld [vmem:[#allocation3 + $0x78] sm:$0xf]  ;;  %v6226_v46 = vld [vmem:[#allocation3 + $0x20] sm:$0xf0] }
 0x38c   : > { %v5695_v37 = vsel %vm478_vm2, %v5686_v10, %v5694_v34  ;;  %v5779_v42 = vor.u32 %v5778_v29, %v5775_v26  ;;  %v5763_v44 = vsel %vm478_vm2, %v5754_v35, %v5762_v36  ;;  %v5984_v10 = vld [vmem:[#allocation3 + $0x20] sm:$0xf0]  ;;  %v5985_v34 = vld [vmem:[#allocation3 + $0x28] sm:$0xf]  ;;  %v6023_v0 = vrot.slane %v5989_v28, 4 }
 0x38d   : > { %v5733_v1 = vrot.slane %v5731_v53, 3  ;;  %v5795_v50 = vrot.slane %v5793_v41, 4  ;;  %v6016_v53 = vrot.slane %v5984_v10, 4  ;;  %v6017_v54 = vrot.slane %v5985_v34, 4  ;;  %v6227_v47 = vld [vmem:[#allocation3 + $0x28] sm:$0x1f] }
 0x38e   : > { %v5780_v14 = vsel %vm478_vm2, %v5771_v63, %v5779_v42  ;;  %v6031_v13 = vrot.slane %v5994_v11, 4  ;;  %v6032_v17 = vrot.slane %v5995_v12, 4  ;;  %v6243_v20 = vshrl.u32 %v6226_v46, 16  ;;  %v5998_v26 = vld [vmem:[#allocation3 + $0x90] sm:$0xf0] }
 0x38f   : > { %v5737_v15 = vor.u32 %v5736_v2, %v5733_v1  ;;  %v6018_v56 = vsel %vm862_vm4, %v6016_v53, %v6017_v54  ;;  %v6024_v2 = vsel %vm862_vm4, %v6022_v61, %v6023_v0  ;;  %v6246_v21 = vshll.u32 %v6226_v46, 16  ;;  %v5999_v29 = vld [vmem:[#allocation3 + $0x98] sm:$0xf]  ;;  %v6232_v59 = vld [vmem:[#allocation3 + $0x50] sm:$0xf0] }
 0x390   : > { %v6251_v57 = vshrl.u32 %v6227_v47, 16  ;;  %v6033_v48 = vsel %vm862_vm4, %v6031_v13, %v6032_v17  ;;  %v6233_v28 = vld [vmem:[#allocation3 + $0x58] sm:$0x1f]  ;;  %v6234_v0 = vld [vmem:[#allocation3 + $0x60] sm:$0xf0] }
 0x391   : > { %v6248_v35 = vrot.slane %v6246_v21, 5 }
 0x392   : > { %7477 = vmatmul.mubr.msk.bf16.gmra.mrb[28].mxu1 %vm801_vm6, %v5424_v30  ;;  %v5712_v30 = vsel %vm478_vm2, %v5703_v16, %v5711_v58  ;;  %v5986_v16 = vld [vmem:[#allocation3 + $0x30] sm:$0xf0]  ;;  %v5987_v58 = vld [vmem:[#allocation3 + $0x38] sm:$0xf]  ;;  %v6253_v36 = vrot.slane %v6251_v57, 4 }
 0x393   : > { %7480 = vmatprep.mubr.msk.bf16.mxu1 %vm801_vm6, %v5441_v55  ;;  %v5745_v55 = vor.u32 %v5744_v39, %v5741_v24  ;;  %v6020_v3 = vrot.slane %v5987_v58, 4  ;;  %v5990_v24 = vld [vmem:[#allocation3 + $0x50] sm:$0xf0]  ;;  %v5991_v39 = vld [vmem:[#allocation3 + $0x58] sm:$0xf] }
 0x394   : > { %v6025_v33 = vrot.slane %v5990_v24, 4  ;;  %v6026_v5 = vrot.slane %v5991_v39, 4  ;;  %v6294_v39 = vshrl.u32 %v6232_v59, 16  ;;  %v6238_v57 = vld [vmem:[#allocation3 + $0x80] sm:$0xf0] }
 0x395   : > { %v5746_v60 = vsel %vm478_vm2, %v5737_v15, %v5745_v55  ;;  %v5996_v15 = vld [vmem:[#allocation3 + $0x80] sm:$0xf0]  ;;  %v5997_v55 = vld [vmem:[#allocation3 + $0x88] sm:$0xf] }
 0x396   : > { %v6027_v8 = vsel %vm862_vm4, %v6025_v33, %v6026_v5  ;;  %v6035_v19 = vrot.slane %v5997_v55, 4  ;;  %v6311_v33 = vshrl.u32 %v6234_v0, 16  ;;  %v6314_v5 = vshll.u32 %v6234_v0, 16 }
 0x397   : > { %v6296_v12 = vrot.slane %v6294_v39, 4 }
 0x398   : > { %v6313_v13 = vrot.slane %v6311_v33, 4  ;;  %v6316_v17 = vrot.slane %v6314_v5, 5 }
 0x39a   : > { %7481 = vmatmul.mubr.msk.bf16.gmra.mrb[32].mxu1 %vm801_vm6, %v5458_v38 }
 0x39b   : > { %7488 = vmatprep.mubr.msk.bf16.mxu1 %vm801_vm6, %v5678_v40  ;;  %v5790_v40 = vshrl.u32 %v5661_v31, 16  ;;  %v6245_v31 = vrot.slane %v6243_v20, 4  ;;  %v6237_v20 = vld [vmem:[#allocation3 + $0x78] sm:$0x1f] }
 0x39d   : > { %v5792_v9 = vrot.slane %v5790_v40, 3 }
 0x39f   : > { %v5796_v52 = vor.u32 %v5795_v50, %v5792_v9 }
 0x3a2   : > { %7489 = vmatmul.mubr.msk.bf16.vlgmr.msra.gmra.mrb[20].mxu1 %vm801_vm6, %v5695_v37  ;;  %v6019_v37 = vrot.slane %v5986_v16, 4 }
 0x3a3   : > { %7505 = vmatpush3.bf16.msra.mxu1 %v8962_v22  ;;  %7492 = vmatprep.mubr.msk.bf16.mxu1 %vm801_vm6, %v5712_v30  ;;  %v5660_v22 = vld [vmem:[#allocation3 + $0x90] sm:$0xf8]  ;;  %v5992_v30 = vld [vmem:[#allocation3 + $0x60] sm:$0xf0] }
 0x3a4   : > { %7506 = vmatprep.subr.bf16.mxu1 %v7797_v43  ;;  %v5782_v62 = vshrl.u32 %v5660_v22, 16  ;;  %v5785_v38 = vshll.u32 %v5660_v22, 16  ;;  %v6021_v1 = vsel %vm862_vm4, %v6019_v37, %v6020_v3  ;;  %v6028_v6 = vrot.slane %v5992_v30, 4  ;;  %v6229_v22 = vld [vmem:[#allocation3 + $0x38] sm:$0x1f] }
 0x3a5   : > { %v6268_v63 = vshrl.u32 %v6229_v22, 16  ;;  %v6271_v42 = vshll.u32 %v6229_v22, 16  ;;  %v6302_v30 = vshrl.u32 %v6233_v28, 16 }
 0x3a6   : > { %v5784_v32 = vrot.slane %v5782_v62, 3  ;;  %v5787_v49 = vrot.slane %v5785_v38, 4  ;;  %v6230_v38 = vld [vmem:[#allocation3 + $0x40] sm:$0xf0] }
 0x3a7   : > { %7507 = vmatpush3.bf16.msra.mxu1 %v7797_v43  ;;  %v5993_v43 = vld [vmem:[#allocation3 + $0x68] sm:$0xf]  ;;  %v6277_v9 = vshrl.u32 %v6230_v38, 16  ;;  %v6280_v50 = vshll.u32 %v6230_v38, 16  ;;  %v6270_v54 = vrot.slane %v6268_v63, 4  ;;  %v6304_v55 = vrot.slane %v6302_v30, 4 }
 0x3a8   : > { %7524 = vmatprep.subr.bf16.mxu1 %v7798_v18  ;;  %v5788_v51 = vor.u32 %v5787_v49, %v5784_v32  ;;  %v6029_v7 = vrot.slane %v5993_v43, 4  ;;  %v6037_v32 = vrot.slane %v5998_v26, 4  ;;  %v6038_v49 = vrot.slane %v5999_v29, 4 }
 0x3a9   : > { %v6279_v16 = vrot.slane %v6277_v9, 4  ;;  %v6282_v58 = vrot.slane %v6280_v50, 5  ;;  %v6305_v43 = vshll.u32 %v6233_v28, 16  ;;  %v6240_v9 = vld [vmem:[#allocation3 + $0x90] sm:$0xf0] }
 0x3aa   : > { %7493 = vmatmul.mubr.msk.bf16.gmra.mrb[24].mxu1 %vm801_vm6, %v5729_v23  ;;  %v5797_v27 = vsel %vm478_vm2, %v5788_v51, %v5796_v52  ;;  %v6030_v45 = vsel %vm862_vm4, %v6028_v6, %v6029_v7  ;;  %v6254_v23 = vshll.u32 %v6227_v47, 16  ;;  %v6236_v47 = vld [vmem:[#allocation3 + $0x70] sm:$0xf0] }
 0x3ab   : > { %7496 = vmatprep.mubr.msk.bf16.mxu1 %vm801_vm6, %v5746_v60  ;;  %v6228_v60 = vld [vmem:[#allocation3 + $0x30] sm:$0xf0]  ;;  %v6307_v46 = vrot.slane %v6305_v43, 5  ;;  %v6331_v22 = vshll.u32 %v6236_v47, 16 }
 0x3ac   : > { %v6256_v62 = vrot.slane %v6254_v23, 5  ;;  %v6260_v40 = vshrl.u32 %v6228_v60, 16  ;;  %v6263_v41 = vshll.u32 %v6228_v60, 16  ;;  %v6239_v23 = vld [vmem:[#allocation3 + $0x88] sm:$0x1f]  ;;  %v6328_v60 = vshrl.u32 %v6236_v47, 16 }
 0x3ad   : > { %v6308_v29 = vor.u32 %v6307_v46, %v6304_v55  ;;  %v6353_v38 = vshrl.u32 %v6239_v23, 16  ;;  %v6333_v63 = vrot.slane %v6331_v22, 5 }
 0x3ae   : > { %v6257_v10 = vor.u32 %v6256_v62, %v6253_v36  ;;  %v6262_v52 = vrot.slane %v6260_v40, 4  ;;  %v6265_v53 = vrot.slane %v6263_v41, 5  ;;  %v6345_v36 = vshrl.u32 %v6238_v57, 16 }
 0x3af   : > { %v6348_v62 = vshll.u32 %v6238_v57, 16  ;;  %v6356_v40 = vshll.u32 %v6239_v23, 16  ;;  %v6330_v41 = vrot.slane %v6328_v60, 4 }
 0x3b0   : > { %v6347_v50 = vrot.slane %v6345_v36, 4 }
 0x3b2   : > { %7497 = vmatmul.mubr.msk.bf16.gmra.mrb[28].mxu1 %vm801_vm6, %v5763_v44  ;;  %v6231_v44 = vld [vmem:[#allocation3 + $0x48] sm:$0x1f] }
 0x3b3   : > { %7500 = vmatprep.mubr.msk.bf16.mxu1 %vm801_vm6, %v5780_v14  ;;  %v6249_v14 = vor.u32 %v6248_v35, %v6245_v31  ;;  %v6285_v34 = vshrl.u32 %v6231_v44, 16  ;;  %v6288_v51 = vshll.u32 %v6231_v44, 16  ;;  %v6317_v31 = vor.u32 %v6316_v17, %v6313_v13 }
 0x3b5   : > { %v6258_v37 = vsel %vm1125_vm5, %v6249_v14, %v6257_v10  ;;  %v6287_v3 = vrot.slane %v6285_v34, 4  ;;  %v6290_v61 = vrot.slane %v6288_v51, 5  ;;  %v6350_v14 = vrot.slane %v6348_v62, 5  ;;  %v6241_v51 = vld [vmem:[#allocation3 + $0x98] sm:$0x1f] }
 0x3b6   : > { %v6355_v10 = vrot.slane %v6353_v38, 4  ;;  %v6358_v34 = vrot.slane %v6356_v40, 5 }
 0x3b7   : > { %v6291_v11 = vor.u32 %v6290_v61, %v6287_v3 }
 0x3ba   : > { %7501 = vmatmul.mubr.msk.bf16.gmra.mrb[32].mxu1 %vm801_vm6, %v5797_v27  ;;  %v6273_v27 = vrot.slane %v6271_v42, 5 }
 0x3bb   : > { %7508 = vmatprep.mubr.msk.bf16.mxu1 %vm801_vm6, %v6018_v56  ;;  %v6039_v56 = vsel %vm862_vm4, %v6037_v32, %v6038_v49 }
 0x3bc   : > { %v6274_v24 = vor.u32 %v6273_v27, %v6270_v54  ;;  %v6362_v54 = vshrl.u32 %v6240_v9, 16  ;;  %v6365_v27 = vshll.u32 %v6240_v9, 16 }
 0x3be   : > { %v6367_v3 = vrot.slane %v6365_v27, 5 }
 0x3c2   : > { %7509 = vmatmul.mubr.msk.bf16.vlgmr.msra.gmra.mrb[20].mxu1 %vm801_vm6, %v6021_v1  ;;  %v6235_v1 = vld [vmem:[#allocation3 + $0x68] sm:$0x1f] }
 0x3c3   : > { %7525 = vmatpush3.bf16.msra.mxu1 %v7798_v18  ;;  %7512 = vmatprep.mubr.msk.bf16.mxu1 %vm801_vm6, %v6024_v2  ;;  %v6034_v18 = vrot.slane %v5996_v15, 4  ;;  %v6266_v2 = vor.u32 %v6265_v53, %v6262_v52  ;;  %v6319_v6 = vshrl.u32 %v6235_v1, 16  ;;  %v6322_v7 = vshll.u32 %v6235_v1, 16 }
 0x3c4   : > { %7526 = vmatprep.subr.bf16.mxu1 %v7799_v4  ;;  %v6334_v52 = vor.u32 %v6333_v63, %v6330_v41 }
 0x3c5   : > { %v6036_v25 = vsel %vm862_vm4, %v6034_v18, %v6035_v19  ;;  %v6321_v18 = vrot.slane %v6319_v6, 4  ;;  %v6324_v19 = vrot.slane %v6322_v7, 5 }
 0x3c7   : > { %7527 = vmatpush3.bf16.msra.mxu1 %v7799_v4  ;;  %v6297_v4 = vshll.u32 %v6232_v59, 16  ;;  %v6325_v35 = vor.u32 %v6324_v19, %v6321_v18  ;;  %v6359_v59 = vor.u32 %v6358_v34, %v6355_v10 }
 0x3c9   : > { %v6299_v15 = vrot.slane %v6297_v4, 5  ;;  %v6326_v49 = vsel %vm1125_vm5, %v6317_v31, %v6325_v35  ;;  %v6971_v4 = vld [vmem:[%s9087_s4] ss:$0 sm:$0xff] }
 0x3ca   : > { %7513 = vmatmul.mubr.msk.bf16.gmra.mrb[24].mxu1 %vm801_vm6, %v6027_v8  ;;  %v6283_v8 = vor.u32 %v6282_v58, %v6279_v16  ;;  %v6373_v16 = vshll.u32 %v6241_v51, 16  ;;  %v6351_v58 = vor.u32 %v6350_v14, %v6347_v50 }
 0x3cb   : > { %7516 = vmatprep.mubr.msk.bf16.mxu1 %vm801_vm6, %v6030_v45  ;;  %v6275_v45 = vsel %vm1125_vm5, %v6266_v2, %v6274_v24  ;;  %v6300_v26 = vor.u32 %v6299_v15, %v6296_v12 }
 0x3cc   : > { %v6292_v21 = vsel %vm1125_vm5, %v6283_v8, %v6291_v11  ;;  %v6375_v0 = vrot.slane %v6373_v16, 5  ;;  %v6360_v1 = vsel %vm1125_vm5, %v6351_v58, %v6359_v59 }
 0x3cd   : > { %v6309_v32 = vsel %vm1125_vm5, %v6300_v26, %v6308_v29 }
 0x3d2   : > { %7517 = vmatmul.mubr.msk.bf16.gmra.mrb[28].mxu1 %vm801_vm6, %v6033_v48  ;;  %v6336_v48 = vshrl.u32 %v6237_v20, 16 }
 0x3d3   : > { %7520 = vmatprep.mubr.msk.bf16.mxu1 %vm801_vm6, %v6036_v25  ;;  %v6339_v25 = vshll.u32 %v6237_v20, 16 }
 0x3d4   : > { %v6338_v42 = vrot.slane %v6336_v48, 4 }
 0x3d5   : > { %v6341_v44 = vrot.slane %v6339_v25, 5 }
 0x3d7   : > { %v6342_v53 = vor.u32 %v6341_v44, %v6338_v42 }
 0x3d9   : > { %v6343_v28 = vsel %vm1125_vm5, %v6334_v52, %v6342_v53 }
 0x3da   : > { %7521 = vmatmul.mubr.msk.bf16.gmra.mrb[32].mxu1 %vm801_vm6, %v6039_v56  ;;  %v6370_v56 = vshrl.u32 %v6241_v51, 16 }
 0x3db   : > { %7528 = vmatprep.mubr.msk.bf16.mxu1 %vm801_vm6, %v6258_v37  ;;  %v6364_v37 = vrot.slane %v6362_v54, 4 }
 0x3dc   : > { %v6372_v61 = vrot.slane %v6370_v56, 4 }
 0x3dd   : > { %v6368_v2 = vor.u32 %v6367_v3, %v6364_v37 }
 0x3de   : > { %v6376_v24 = vor.u32 %v6375_v0, %v6372_v61 }
 0x3e0   : > { %v6377_v39 = vsel %vm1125_vm5, %v6368_v2, %v6376_v24 }
 0x3e2   : > { %7529 = vmatmul.mubr.msk.bf16.vlgmr.msra.gmra.mrb[20].mxu1 %vm801_vm6, %v6275_v45 }
 0x3e3   : > { %7532 = vmatprep.mubr.msk.bf16.mxu1 %vm801_vm6, %v6292_v21 }
 0x3ea   : > { %7533 = vmatmul.mubr.msk.bf16.gmra.mrb[24].mxu1 %vm801_vm6, %v6309_v32 }
 0x3eb   : > { %7536 = vmatprep.mubr.msk.bf16.mxu1 %vm801_vm6, %v6326_v49 }
 0x3f2   : > { %7537 = vmatmul.mubr.msk.bf16.gmra.mrb[28].mxu1 %vm801_vm6, %v6343_v28 }
 0x3f3   : > { %7540 = vmatprep.mubr.msk.bf16.mxu1 %vm801_vm6, %v6360_v1 }
 0x3fa   : > { %7541 = vmatmul.mubr.msk.bf16.gmra.mrb[32].mxu1 %vm801_vm6, %v6377_v39 }
 0x4b5   : > { %v7530_v30 = vpop.f32.mrb[20].mxu1 }
 0x4b6   : > { %v6589_v43 = vadd.f32 %v7530_v30, %v6971_v4  ;;  %v6453_v33 = vpop.f32.mrb[21].mxu1 }
 0x4b7   : > { %v6587_v5 = vadd.f32 %v6971_v4, %v6453_v33  ;;  %v7531_v6 = vpop.f32.mrb[22].mxu1 }
 0x4b8   : > { %6606 = vst.msk [vmem:[%s8261_s13 + $0x10] sm:$0xff] %vm6603_vm9, %v6589_v43  ;;  %v6590_v7 = vadd.f32 %v7531_v6, %v6971_v4  ;;  %v6456_v8 = vpop.f32.mrb[23].mxu1 }
 0x4b9   : > { %6604 = vst.msk [vmem:[%s8261_s13] sm:$0xff] %vm6603_vm9, %v6587_v5  ;;  %v6588_v11 = vadd.f32 %v6971_v4, %v6456_v8 }
 0x4ba   : > { %6607 = vst.msk [vmem:[%s8261_s13 + $0x18] sm:$0xff] %vm6603_vm9, %v6590_v7 }
 0x4bb   : > { %6605 = vst.msk [vmem:[%s8261_s13 + $0x8] sm:$0xff] %vm6603_vm9, %v6588_v11 }
 0x4bd   : > { %v7534_v45 = vpop.f32.mrb[24].mxu1 }
 0x4be   : > { %v6593_v12 = vadd.f32 %v7534_v45, %v6971_v4  ;;  %v6469_v15 = vpop.f32.mrb[25].mxu1 }
 0x4bf   : > { %v6591_v55 = vadd.f32 %v6971_v4, %v6469_v15  ;;  %v7535_v46 = vpop.f32.mrb[26].mxu1 }
 0x4c0   : > { %6610 = vst.msk [vmem:[%s8261_s13 + $0x30] sm:$0xff] %vm6603_vm9, %v6593_v12  ;;  %v6594_v47 = vadd.f32 %v7535_v46, %v6971_v4  ;;  %v6472_v13 = vpop.f32.mrb[27].mxu1 }
 0x4c1   : > { %6608 = vst.msk [vmem:[%s8261_s13 + $0x20] sm:$0xff] %vm6603_vm9, %v6591_v55  ;;  %v6592_v17 = vadd.f32 %v6971_v4, %v6472_v13 }
 0x4c2   : > { %6611 = vst.msk [vmem:[%s8261_s13 + $0x38] sm:$0xff] %vm6603_vm9, %v6594_v47 }
 0x4c3   : > { %6609 = vst.msk [vmem:[%s8261_s13 + $0x28] sm:$0xff] %vm6603_vm9, %v6592_v17 }
 0x4c5   : > { %v7538_v18 = vpop.f32.mrb[28].mxu1 }
 0x4c6   : > { %v6597_v19 = vadd.f32 %v7538_v18, %v6971_v4  ;;  %v6485_v20 = vpop.f32.mrb[29].mxu1 }
 0x4c7   : > { %v6595_v21 = vadd.f32 %v6971_v4, %v6485_v20  ;;  %v7539_v57 = vpop.f32.mrb[30].mxu1 }
 0x4c8   : > { %6614 = vst.msk [vmem:[%s8261_s13 + $0x50] sm:$0xff] %vm6603_vm9, %v6597_v19  ;;  %v6598_v23 = vadd.f32 %v7539_v57, %v6971_v4  ;;  %v6488_v60 = vpop.f32.mrb[31].mxu1 }
 0x4c9   : > { %6612 = vst.msk [vmem:[%s8261_s13 + $0x40] sm:$0xff] %vm6603_vm9, %v6595_v21  ;;  %v6596_v22 = vadd.f32 %v6971_v4, %v6488_v60 }
 0x4ca   : > { %6615 = vst.msk [vmem:[%s8261_s13 + $0x58] sm:$0xff] %vm6603_vm9, %v6598_v23 }
 0x4cb   : > { %6613 = vst.msk [vmem:[%s8261_s13 + $0x48] sm:$0xff] %vm6603_vm9, %v6596_v22 }
 0x4cd   : > { %v7542_v48 = vpop.f32.mrb[32].mxu1 }
 0x4ce   : > { %v6601_v25 = vadd.f32 %v7542_v48, %v6971_v4  ;;  %v6501_v26 = vpop.f32.mrb[33].mxu1 }
 0x4cf   : > { %v6599_v29 = vadd.f32 %v6971_v4, %v6501_v26  ;;  %v7543_v31 = vpop.f32.mrb[34].mxu1 }
 0x4d0   : > { %6618 = vst.msk [vmem:[%s8261_s13 + $0x70] sm:$0xff] %vm6603_vm9, %v6601_v25  ;;  %v6602_v35 = vadd.f32 %v7543_v31, %v6971_v4  ;;  %v6504_v36 = vpop.f32.mrb[35].mxu1 }
 0x4d1   : > { %6616 = vst.msk [vmem:[%s8261_s13 + $0x60] sm:$0xff] %vm6603_vm9, %v6599_v29  ;;  %v6600_v62 = vadd.f32 %v6971_v4, %v6504_v36 }
 0x4d2   : > { %6619 = vst.msk [vmem:[%s8261_s13 + $0x78] sm:$0xff] %vm6603_vm9, %v6602_v35 }
 0x4d3   : > { %6617 = vst.msk [vmem:[%s8261_s13 + $0x68] sm:$0xff] %vm6603_vm9, %v6600_v62 }
 0x4d4 PF: > { %s19_s25 = sadd.s32 1, %s7956_s25   ;;  %s9102_s18 = smov %s7932_s19 }
 0x4d5   : > { %p16_p7 = scmp.ge.s32.totalorder %s19_s25, 6   ;;  %s9103_s19 = smov %s7936_s20 }
 0x4d6   : > { %s9104_s20 = smov %s8147_s30  ;;  %s9105_s21 = smov %s7948_s23 }
 0x4d7   : > { %s9106_s22 = smov %s7952_s24  ;;  %s9107_s23 = smov %s9110_s8 }
 0x4d8   : > { %s9108_s24 = smov %s9114_s10  ;;  %18 = sbr.rel (!%p16_p7) target bundleno = 6 (0x6), region = 138 }
 0x4df   :  { %6652 = vsyncpa [#allocation7], 1 }
 0x4e0   :  { %6654 = vsyncpa [#allocation7 + $0x1], 1 }
 0x4e1   :  { %6655 = vsyncpa [#allocation9], 1 }

</bundles_post_ra>
